<compile_context>
chip_gen: v5e
topology: v5e:2x2
jax: 0.10.0
libtpu: 0.0.40
codegen_flags: <defaults>
</compile_context>

<pallas_src>
import functools

import jax
import jax.numpy as jnp
import numpy as np
from jax import lax
from jax.experimental import pallas as pl
from jax.experimental.pallas import tpu as pltpu

EPS = 1e-5
# Plenty for these tile sizes.  Tune per generation: v5e/v6e (128 MiB VMEM) can
# raise this and grow tiles toward the HBM roofline; keep <= ~48 MiB on v7x.
VMEM_LIMIT = 32 * 1024 * 1024


def _swish(v):
    return v * jax.nn.sigmoid(v)


def _cparams(*sems):
    return pltpu.CompilerParams(dimension_semantics=sems,
                                vmem_limit_bytes=VMEM_LIMIT)


def _row_tile(rows):
    """Largest row tile (multiple of 8, <=512) that divides `rows`."""
    for cand in (512, 256, 128, 64, 32, 16, 8):
        if rows % cand == 0:
            return cand
    return rows


# ---------------------------------------------------------------------------
# Pass 1: expand 1x1 conv (MXU, kron-packed) — BN0 partial statistics ONLY.
# The expanded tensor is recomputed in pass 2, so it never touches HBM.
# ---------------------------------------------------------------------------
def _expand_stats_kernel(x_ref, ke_ref, st_ref):
    t = jnp.dot(x_ref[...], ke_ref[...], preferred_element_type=jnp.float32)
    st_ref[0:1, :] = jnp.sum(t, axis=0, keepdims=True)
    st_ref[1:2, :] = jnp.sum(t * t, axis=0, keepdims=True)


# ---------------------------------------------------------------------------
# Pass 2: expand recompute + BN0 affine + swish + depthwise 3x3 (zero-halo
# scratch) + packed BN1 partial statistics.  d is written in bf16.
# ---------------------------------------------------------------------------
def _dw_kernel(x_ref, ke_ref, s0_ref, b0_ref, wdw_ref, d_ref, st_ref, pad_ref,
               *, h, w, c):
    wc = w * c
    t = jnp.dot(x_ref[...], ke_ref[...], preferred_element_type=jnp.float32)
    a = _swish(t * s0_ref[...] + b0_ref[...])                   # (h, w*c)
    # Halo-only zeroing (kept per-step: with "parallel" grid sharding each core
    # owns its own scratch, so a program_id==0 guard would be unsafe).
    pad_ref[0:1, :] = jnp.zeros((1, (w + 2) * c), jnp.float32)
    pad_ref[h + 1:h + 2, :] = jnp.zeros((1, (w + 2) * c), jnp.float32)
    pad_ref[1:h + 1, 0:c] = jnp.zeros((h, c), jnp.float32)
    pad_ref[1:h + 1, (w + 1) * c:(w + 2) * c] = jnp.zeros((h, c), jnp.float32)
    pad_ref[1:h + 1, c:(w + 1) * c] = a
    acc = jnp.zeros((h, wc), jnp.float32)
    for dh in range(3):
        for dwi in range(3):
            k = 3 * dh + dwi
            tap = pad_ref[dh:dh + h, dwi * c:dwi * c + wc]       # ref slice
            acc = acc + tap * wdw_ref[k:k + 1, :]
    d_ref[...] = acc.astype(d_ref.dtype)
    st_ref[0:1, :] = jnp.sum(acc, axis=0, keepdims=True)
    st_ref[1:2, :] = jnp.sum(acc * acc, axis=0, keepdims=True)


# ---------------------------------------------------------------------------
# Pass 3: BN1 affine + swish + fused SE (pool -> reduce -> expand -> gate) +
# project 1x1 (MXU, kron-packed) + packed BN2 partial statistics.  p in bf16.
# ---------------------------------------------------------------------------
def _project_kernel(d_ref, s1_ref, b1_ref, selT_ref, wsr_ref, bsr_ref,
                    wse_ref, bse_ref, sel_ref, kp_ref, p_ref, st_ref,
                    *, inv_hw):
    u = _swish(d_ref[...].astype(jnp.float32) * s1_ref[...] + b1_ref[...])
    # fused global-average pool (whole sample is resident): sum rows, then a
    # (1, w*c_mid)@(w*c_mid, c_mid) reduce over the w pixel groups.
    us = jnp.sum(u, axis=0, keepdims=True)
    pool = jnp.dot(us, selT_ref[...],
                   preferred_element_type=jnp.float32) * inv_hw   # (1, c_mid)
    r = _swish(jnp.dot(pool, wsr_ref[...],
                       preferred_element_type=jnp.float32) + bsr_ref[...])
    g = jax.nn.sigmoid(jnp.dot(r, wse_ref[...],
                               preferred_element_type=jnp.float32) + bse_ref[...])
    gate = jnp.dot(g, sel_ref[...],
                   preferred_element_type=jnp.float32)            # (1, w*c_mid)
    p = jnp.dot(u * gate, kp_ref[...], preferred_element_type=jnp.float32)
    p_ref[...] = p.astype(p_ref.dtype)
    st_ref[0:1, :] = jnp.sum(p, axis=0, keepdims=True)
    st_ref[1:2, :] = jnp.sum(p * p, axis=0, keepdims=True)


# ---------------------------------------------------------------------------
# Pass 4: BN2 affine (+ residual) over flattened (N*H, W*C_out) row tiles.
# ---------------------------------------------------------------------------
def _out_res_kernel(p_ref, x_ref, s2_ref, b2_ref, o_ref):
    o_ref[...] = (p_ref[...].astype(jnp.float32) * s2_ref[...] + b2_ref[...]
                  + x_ref[...])


def _out_kernel(p_ref, s2_ref, b2_ref, o_ref):
    o_ref[...] = p_ref[...].astype(jnp.float32) * s2_ref[...] + b2_ref[...]


# ---------------------------------------------------------------------------
# Cross-tile BN finalization (tiny (C,)-sized JAX glue between passes).
# stats: (G, 2, w*c) with row 0 = sum, row 1 = sumsq over the tile's pixels.
# ---------------------------------------------------------------------------
def _bn_affine_packed(stats, count, w, c, gamma, beta):
    s = jnp.sum(stats[:, 0, :].reshape(-1, w, c), axis=(0, 1))
    ss = jnp.sum(stats[:, 1, :].reshape(-1, w, c), axis=(0, 1))
    mean = s / count
    # TODO(synk): E[x^2]-E[x]^2 in f32 can cancel for huge N*H*W / large means;
    # switch to shifted sums for production sizes.
    var = ss / count - mean * mean                  # biased (training) variance
    scale = gamma.reshape(-1) * lax.rsqrt(var + EPS)
    shift = beta.reshape(-1) - mean * scale
    return jnp.tile(scale, w)[None, :], jnp.tile(shift, w)[None, :]


# ---------------------------------------------------------------------------
# Block in packed (N, H, W*C) layout
# ---------------------------------------------------------------------------
def _efficientnet_block_packed(xp, params, *, n, h, w, c_in, c_mid, c_out,
                               residual):
    f32, bf16 = jnp.float32, jnp.bfloat16
    c_se = params["w_se_reduce"].shape[1]
    wc_in, wc_mid, wc_out = w * c_in, w * c_mid, w * c_out
    nh = n * h
    nhw = float(n * h * w)

    kron_e = jnp.kron(jnp.eye(w, dtype=f32), params["w_expand"].astype(f32))
    kron_p = jnp.kron(jnp.eye(w, dtype=f32), params["w_project"].astype(f32))
    wdw_p = jnp.tile(params["w_dw"].astype(f32), (1, w))          # (9, w*c_mid)
    sel = jnp.tile(jnp.eye(c_mid, dtype=f32), (1, w))             # gate broadcast
    selT = jnp.transpose(sel)                                     # pool reduce

    # ---- pass 1: expand 1x1, BN0 partial stats only (no HBM write of t) ----
    x2 = xp.reshape(nh, wc_in)
    tm = _row_tile(nh)
    g1 = nh // tm
    st0 = pl.pallas_call(
        _expand_stats_kernel,
        grid=(g1,),
        in_specs=[pl.BlockSpec((tm, wc_in), lambda i: (i, 0)),
                  pl.BlockSpec((wc_in, wc_mid), lambda i: (0, 0))],
        out_specs=pl.BlockSpec((None, 2, wc_mid), lambda i: (i, 0, 0)),
        out_shape=jax.ShapeDtypeStruct((g1, 2, wc_mid), f32),
        compiler_params=_cparams("parallel"),
    )(x2, kron_e)
    s0, b0 = _bn_affine_packed(st0, nhw, w, c_mid, params["g0"], params["b0"])

    # ---- pass 2: expand recompute + BN0 + swish + depthwise + BN1 stats ----
    d, st1 = pl.pallas_call(
        functools.partial(_dw_kernel, h=h, w=w, c=c_mid),
        grid=(n,),
        in_specs=[
            pl.BlockSpec((None, h, wc_in), lambda i: (i, 0, 0)),
            pl.BlockSpec((wc_in, wc_mid), lambda i: (0, 0)),
            pl.BlockSpec((1, wc_mid), lambda i: (0, 0)),
            pl.BlockSpec((1, wc_mid), lambda i: (0, 0)),
            pl.BlockSpec((9, wc_mid), lambda i: (0, 0)),
        ],
        out_specs=(
            pl.BlockSpec((None, h, wc_mid), lambda i: (i, 0, 0)),
            pl.BlockSpec((None, 2, wc_mid), lambda i: (i, 0, 0)),
        ),
        out_shape=(
            jax.ShapeDtypeStruct((n, h, wc_mid), bf16),
            jax.ShapeDtypeStruct((n, 2, wc_mid), f32),
        ),
        scratch_shapes=[pltpu.VMEM((h + 2, (w + 2) * c_mid), f32)],
        compiler_params=_cparams("parallel"),
    )(xp, kron_e, s0, b0, wdw_p)
    s1, b1 = _bn_affine_packed(st1, nhw, w, c_mid, params["g1"], params["b1"])

    # ---- pass 3: BN1 + swish + fused SE + project 1x1 + BN2 stats ----------
    p, st2 = pl.pallas_call(
        functools.partial(_project_kernel, inv_hw=1.0 / float(h * w)),
        grid=(n,),
        in_specs=[
            pl.BlockSpec((None, h, wc_mid), lambda i: (i, 0, 0)),   # d (bf16)
            pl.BlockSpec((1, wc_mid), lambda i: (0, 0)),            # s1
            pl.BlockSpec((1, wc_mid), lambda i: (0, 0)),            # b1
            pl.BlockSpec((wc_mid, c_mid), lambda i: (0, 0)),        # selT
            pl.BlockSpec((c_mid, c_se), lambda i: (0, 0)),          # w_se_reduce
            pl.BlockSpec((1, c_se), lambda i: (0, 0)),              # b_se_reduce
            pl.BlockSpec((c_se, c_mid), lambda i: (0, 0)),          # w_se_expand
            pl.BlockSpec((1, c_mid), lambda i: (0, 0)),             # b_se_expand
            pl.BlockSpec((c_mid, wc_mid), lambda i: (0, 0)),        # sel
            pl.BlockSpec((wc_mid, wc_out), lambda i: (0, 0)),       # kron_p
        ],
        out_specs=(
            pl.BlockSpec((None, h, wc_out), lambda i: (i, 0, 0)),
            pl.BlockSpec((None, 2, wc_out), lambda i: (i, 0, 0)),
        ),
        out_shape=(
            jax.ShapeDtypeStruct((n, h, wc_out), bf16),
            jax.ShapeDtypeStruct((n, 2, wc_out), f32),
        ),
        compiler_params=_cparams("parallel"),
    )(d, s1, b1, selT, params["w_se_reduce"].astype(f32),
      params["b_se_reduce"].astype(f32), params["w_se_expand"].astype(f32),
      params["b_se_expand"].astype(f32), sel, kron_p)
    s2, b2 = _bn_affine_packed(st2, nhw, w, c_out, params["g2"], params["b2"])

    # ---- pass 4: BN2 affine (+ residual) over (N*H, W*C_out) row tiles -----
    # TODO(synk): wc_out < 128 leaves masked partial stores; fold H rows per
    # lane row for real shapes.
    p2 = p.reshape(nh, wc_out)
    tm4 = _row_tile(nh)
    g4 = nh // tm4
    if residual:
        out2 = pl.pallas_call(
            _out_res_kernel,
            grid=(g4,),
            in_specs=[
                pl.BlockSpec((tm4, wc_out), lambda i: (i, 0)),
                pl.BlockSpec((tm4, wc_out), lambda i: (i, 0)),
                pl.BlockSpec((1, wc_out), lambda i: (0, 0)),
                pl.BlockSpec((1, wc_out), lambda i: (0, 0)),
            ],
            out_specs=pl.BlockSpec((tm4, wc_out), lambda i: (i, 0)),
            out_shape=jax.ShapeDtypeStruct((nh, wc_out), f32),
            compiler_params=_cparams("parallel"),
        )(p2, xp.reshape(nh, wc_in), s2, b2)
    else:
        out2 = pl.pallas_call(
            _out_kernel,
            grid=(g4,),
            in_specs=[
                pl.BlockSpec((tm4, wc_out), lambda i: (i, 0)),
                pl.BlockSpec((1, wc_out), lambda i: (0, 0)),
                pl.BlockSpec((1, wc_out), lambda i: (0, 0)),
            ],
            out_specs=pl.BlockSpec((tm4, wc_out), lambda i: (i, 0)),
            out_shape=jax.ShapeDtypeStruct((nh, wc_out), f32),
            compiler_params=_cparams("parallel"),
        )(p2, s2, b2)
    return out2.reshape(n, h, wc_out)


def efficientnet_block(x_nchw, params, *, stride=1):
    assert stride == 1, "only stride=1 is implemented"
    n, c_in, h, w = x_nchw.shape
    c_mid = params["w_expand"].shape[1]
    c_out = params["w_project"].shape[1]
    residual = (stride == 1) and (c_in == c_out)
    xp = jnp.transpose(x_nchw, (0, 2, 3, 1)).astype(jnp.float32)
    xp = xp.reshape(n, h, w * c_in)                  # lane-dense packed layout
    out_p = _efficientnet_block_packed(xp, params, n=n, h=h, w=w, c_in=c_in,
                                       c_mid=c_mid, c_out=c_out,
                                       residual=residual)
    return jnp.transpose(out_p.reshape(n, h, w, c_out), (0, 3, 1, 2))


# ---------------------------------------------------------------------------
# Params + pure-JAX reference (mirrors the torch forward in training mode)
# ---------------------------------------------------------------------------
def init_params(key, c_in, expansion, c_out):
    c_mid = c_in * expansion
    c_se = c_mid // 4
    ks = jax.random.split(key, 16)

    def rnd(k, shape, scale=0.3):
        return jax.random.normal(k, shape, jnp.float32) * scale

    return dict(
        w_expand=rnd(ks[0], (c_in, c_mid)),
        g0=1.0 + 0.1 * jax.random.normal(ks[1], (1, c_mid), jnp.float32),
        b0=rnd(ks[2], (1, c_mid), 0.1),
        w_dw=rnd(ks[3], (9, c_mid)),
        g1=1.0 + 0.1 * jax.random.normal(ks[4], (1, c_mid), jnp.float32),
        b1=rnd(ks[5], (1, c_mid), 0.1),
        w_se_reduce=rnd(ks[6], (c_mid, c_se)),
        b_se_reduce=rnd(ks[7], (1, c_se), 0.1),
        w_se_expand=rnd(ks[8], (c_se, c_mid)),
        b_se_expand=rnd(ks[9], (1, c_mid), 0.1),
        w_project=rnd(ks[10], (c_mid, c_out)),
        g2=1.0 + 0.1 * jax.random.normal(ks[11], (1, c_out), jnp.float32),
        b2=rnd(ks[12], (1, c_out), 0.1),
    )


def reference(x, p, stride=1):
    def conv1x1(v, w_km):
        w = jnp.transpose(w_km)[:, :, None, None]
        return lax.conv_general_dilated(
            v, w, (1, 1), "VALID",
            dimension_numbers=("NCHW", "OIHW", "NCHW"))

    def bn(v, g, b):
        mean = v.mean(axis=(0, 2, 3), keepdims=True)
        var = jnp.square(v - mean).mean(axis=(0, 2, 3), keepdims=True)
        return ((v - mean) * lax.rsqrt(var + EPS) * g.reshape(1, -1, 1, 1)
                + b.reshape(1, -1, 1, 1))

    sw = lambda v: v * jax.nn.sigmoid(v)
    c_mid = p["w_expand"].shape[1]

    out = sw(bn(conv1x1(x, p["w_expand"]), p["g0"], p["b0"]))
    wdw = jnp.transpose(p["w_dw"].reshape(3, 3, c_mid), (2, 0, 1))[:, None, :, :]
    out = lax.conv_general_dilated(
        out, wdw, (stride, stride), ((1, 1), (1, 1)),
        dimension_numbers=("NCHW", "OIHW", "NCHW"),
        feature_group_count=c_mid)
    out = sw(bn(out, p["g1"], p["b1"]))
    se = out.mean(axis=(2, 3), keepdims=True)
    se = sw(conv1x1(se, p["w_se_reduce"]) + p["b_se_reduce"].reshape(1, -1, 1, 1))
    se = jax.nn.sigmoid(conv1x1(se, p["w_se_expand"])
                        + p["b_se_expand"].reshape(1, -1, 1, 1))
    out = out * se
    out = bn(conv1x1(out, p["w_project"]), p["g2"], p["b2"])
    if stride == 1 and x.shape == out.shape:
        out = out + x
    return out


if __name__ == "__main__":
    key = jax.random.PRNGKey(0)
    kx, kp = jax.random.split(key)

    N, C_in, H, W = 2, 4, 16, 16
    expansion, C_out, stride = 4, 4, 1

    x = jax.random.normal(kx, (N, C_in, H, W), jnp.float32)
    params = init_params(kp, C_in, expansion, C_out)

    out = jax.block_until_ready(jax.jit(efficientnet_block)(x, params))
    ref = jax.block_until_ready(reference(x, params, stride=stride))

    assert out.shape == ref.shape == (N, C_out, H, W)
    # Inter-pass activations (d, p) are stored in bfloat16 by design, so the
    # comparison against the f32 reference uses a correspondingly looser bound.
    np.testing.assert_allclose(np.asarray(out), np.asarray(ref),
                               rtol=2e-2, atol=2e-2)
    print("KERNEL_OK")
</pallas_src>

<mosaic_0001>
module attributes {stable_mosaic.version = 11 : i64} {
  func.func @_expand_stats_kernel(%arg0: i32, %arg1: memref<32x64xf32, #tpu.memory_space<vmem>>, %arg2: memref<64x256xf32, #tpu.memory_space<vmem>>, %arg3: memref<1x2x256xf32, #tpu.memory_space<vmem>>) attributes {dimension_semantics = [#tpu.dimension_semantics<parallel>], iteration_bounds = array<i64: 1>, scalar_prefetch = 0 : i64, scratch_operands = 0 : i64, tpu.core_type = #tpu.core_type<tc>, window_params = [{transform_indices = @transform_0, window_bounds = array<i64: 32, 64>}, {pipeline_mode = #tpu.pipeline_mode<synchronous>, transform_indices = @transform_1, window_bounds = array<i64: 64, 256>}, {transform_indices = @transform_2, window_bounds = array<i64: 1, 2, 256>}]} {
    %c0 = arith.constant 0 : index
    %c0_0 = arith.constant 0 : index
    %0 = vector.load %arg1[%c0, %c0_0] : memref<32x64xf32, #tpu.memory_space<vmem>>, vector<32x64xf32>
    %c0_1 = arith.constant 0 : index
    %c0_2 = arith.constant 0 : index
    %1 = vector.load %arg2[%c0_1, %c0_2] : memref<64x256xf32, #tpu.memory_space<vmem>>, vector<64x256xf32>
    %cst = arith.constant dense<0.000000e+00> : vector<32x256xf32>
    %2 = tpu.matmul %0, %1, %cst {dimension_numbers = #tpu.dot_dimension_numbers<[1], [0], [0], [1], [0, 0, 1, 1], [], []>} : vector<32x64xf32>, vector<64x256xf32>, vector<32x256xf32> -> vector<32x256xf32>
    %cst_3 = arith.constant dense<0.000000e+00> : vector<256xf32>
    %3 = vector.multi_reduction <add>, %2, %cst_3 [0] : vector<32x256xf32> to vector<256xf32>
    %4 = vector.shape_cast %3 : vector<256xf32> to vector<1x256xf32>
    %c0_4 = arith.constant 0 : index
    %c0_5 = arith.constant 0 : index
    %c0_6 = arith.constant 0 : index
    %5 = vector.load %arg3[%c0_4, %c0_5, %c0_6] : memref<1x2x256xf32, #tpu.memory_space<vmem>>, vector<1x1x256xf32>
    %6 = vector.shape_cast %5 : vector<1x1x256xf32> to vector<1x256xf32>
    %7 = vector.shape_cast %4 : vector<1x256xf32> to vector<1x1x256xf32>
    tpu.vector_store %arg3[%c0_4, %c0_5, %c0_6], %7 {strides = array<i32>} : memref<1x2x256xf32, #tpu.memory_space<vmem>>, vector<1x1x256xf32>,
    %8 = arith.mulf %2, %2 : vector<32x256xf32>
    %cst_7 = arith.constant dense<0.000000e+00> : vector<256xf32>
    %9 = vector.multi_reduction <add>, %8, %cst_7 [0] : vector<32x256xf32> to vector<256xf32>
    %10 = vector.shape_cast %9 : vector<256xf32> to vector<1x256xf32>
    %c0_8 = arith.constant 0 : index
    %c1 = arith.constant 1 : index
    %c0_9 = arith.constant 0 : index
    %11 = vector.load %arg3[%c0_8, %c1, %c0_9] : memref<1x2x256xf32, #tpu.memory_space<vmem>>, vector<1x1x256xf32>
    %12 = vector.shape_cast %11 : vector<1x1x256xf32> to vector<1x256xf32>
    %13 = vector.shape_cast %10 : vector<1x256xf32> to vector<1x1x256xf32>
    tpu.vector_store %arg3[%c0_8, %c1, %c0_9], %13 {strides = array<i32>} : memref<1x2x256xf32, #tpu.memory_space<vmem>>, vector<1x1x256xf32>,
    return
  }
  func.func @transform_0(%arg0: i32) -> (i32, i32) {
    %c0_i32 = arith.constant 0 : i32
    %c0_i32_0 = arith.constant 0 : i32
    return %arg0, %c0_i32 : i32, i32
  }
  func.func @transform_1(%arg0: i32) -> (i32, i32) {
    %c0_i32 = arith.constant 0 : i32
    %c0_i32_0 = arith.constant 0 : i32
    %c0_i32_1 = arith.constant 0 : i32
    return %c0_i32, %c0_i32_0 : i32, i32
  }
  func.func @transform_2(%arg0: i32) -> (i32, i32, i32) {
    %c0_i32 = arith.constant 0 : i32
    %c0_i32_0 = arith.constant 0 : i32
    %c0_i32_1 = arith.constant 0 : i32
    return %arg0, %c0_i32, %c0_i32_0 : i32, i32, i32
  }
}

module attributes {stable_mosaic.version = 11 : i64} {
  func.func @_dw_kernel(%arg0: i32, %arg1: memref<1x16x64xf32, #tpu.memory_space<vmem>>, %arg2: memref<64x256xf32, #tpu.memory_space<vmem>>, %arg3: memref<1x256xf32, #tpu.memory_space<vmem>>, %arg4: memref<1x256xf32, #tpu.memory_space<vmem>>, %arg5: memref<9x256xf32, #tpu.memory_space<vmem>>, %arg6: memref<1x16x256xbf16, #tpu.memory_space<vmem>>, %arg7: memref<1x2x256xf32, #tpu.memory_space<vmem>>, %arg8: memref<18x288xf32, #tpu.memory_space<vmem>>) attributes {dimension_semantics = [#tpu.dimension_semantics<parallel>], iteration_bounds = array<i64: 2>, scalar_prefetch = 0 : i64, scratch_operands = 1 : i64, tpu.core_type = #tpu.core_type<tc>, window_params = [{transform_indices = @transform_0, window_bounds = array<i64: 1, 16, 64>}, {pipeline_mode = #tpu.pipeline_mode<synchronous>, transform_indices = @transform_1, window_bounds = array<i64: 64, 256>}, {pipeline_mode = #tpu.pipeline_mode<synchronous>, transform_indices = @transform_2, window_bounds = array<i64: 1, 256>}, {pipeline_mode = #tpu.pipeline_mode<synchronous>, transform_indices = @transform_3, window_bounds = array<i64: 1, 256>}, {pipeline_mode = #tpu.pipeline_mode<synchronous>, transform_indices = @transform_4, window_bounds = array<i64: 9, 256>}, {transform_indices = @transform_5, window_bounds = array<i64: 1, 16, 256>}, {transform_indices = @transform_6, window_bounds = array<i64: 1, 2, 256>}]} {
    %c0 = arith.constant 0 : index
    %c0_0 = arith.constant 0 : index
    %c0_1 = arith.constant 0 : index
    %0 = vector.load %arg1[%c0, %c0_0, %c0_1] : memref<1x16x64xf32, #tpu.memory_space<vmem>>, vector<1x16x64xf32>
    %1 = vector.shape_cast %0 : vector<1x16x64xf32> to vector<16x64xf32>
    %c0_2 = arith.constant 0 : index
    %c0_3 = arith.constant 0 : index
    %2 = vector.load %arg2[%c0_2, %c0_3] : memref<64x256xf32, #tpu.memory_space<vmem>>, vector<64x256xf32>
    %cst = arith.constant dense<0.000000e+00> : vector<16x256xf32>
    %3 = tpu.matmul %1, %2, %cst {dimension_numbers = #tpu.dot_dimension_numbers<[1], [0], [0], [1], [0, 0, 1, 1], [], []>} : vector<16x64xf32>, vector<64x256xf32>, vector<16x256xf32> -> vector<16x256xf32>
    %c0_4 = arith.constant 0 : index
    %c0_5 = arith.constant 0 : index
    %4 = vector.load %arg3[%c0_4, %c0_5] : memref<1x256xf32, #tpu.memory_space<vmem>>, vector<1x256xf32>
    %5 = vector.broadcast %4 : vector<1x256xf32> to vector<16x256xf32>
    %6 = arith.mulf %3, %5 : vector<16x256xf32>
    %c0_6 = arith.constant 0 : index
    %c0_7 = arith.constant 0 : index
    %7 = vector.load %arg4[%c0_6, %c0_7] : memref<1x256xf32, #tpu.memory_space<vmem>>, vector<1x256xf32>
    %8 = vector.broadcast %7 : vector<1x256xf32> to vector<16x256xf32>
    %9 = arith.addf %6, %8 : vector<16x256xf32>
    %10 = arith.negf %9 : vector<16x256xf32>
    %11 = math.exp %10 : vector<16x256xf32>
    %cst_8 = arith.constant 1.000000e+00 : f32
    %12 = vector.broadcast %cst_8 : f32 to vector<16x256xf32>
    %13 = arith.addf %12, %11 : vector<16x256xf32>
    %14 = arith.divf %12, %13 : vector<16x256xf32>
    %15 = arith.mulf %9, %14 : vector<16x256xf32>
    %cst_9 = arith.constant 0.000000e+00 : f32
    %16 = vector.broadcast %cst_9 : f32 to vector<1x288xf32>
    %c0_10 = arith.constant 0 : index
    %c0_11 = arith.constant 0 : index
    %17 = vector.load %arg8[%c0_10, %c0_11] : memref<18x288xf32, #tpu.memory_space<vmem>>, vector<1x288xf32>
    tpu.vector_store %arg8[%c0_10, %c0_11], %16 {strides = array<i32>} : memref<18x288xf32, #tpu.memory_space<vmem>>, vector<1x288xf32>,
    %cst_12 = arith.constant 0.000000e+00 : f32
    %18 = vector.broadcast %cst_12 : f32 to vector<1x288xf32>
    %c17 = arith.constant 17 : index
    %c0_13 = arith.constant 0 : index
    %19 = vector.load %arg8[%c17, %c0_13] : memref<18x288xf32, #tpu.memory_space<vmem>>, vector<1x288xf32>
    tpu.vector_store %arg8[%c17, %c0_13], %18 {strides = array<i32>} : memref<18x288xf32, #tpu.memory_space<vmem>>, vector<1x288xf32>,
    %cst_14 = arith.constant 0.000000e+00 : f32
    %20 = vector.broadcast %cst_14 : f32 to vector<16x16xf32>
    %c1 = arith.constant 1 : index
    %c0_15 = arith.constant 0 : index
    %21 = vector.load %arg8[%c1, %c0_15] : memref<18x288xf32, #tpu.memory_space<vmem>>, vector<16x16xf32>
    tpu.vector_store %arg8[%c1, %c0_15], %20 {strides = array<i32>} : memref<18x288xf32, #tpu.memory_space<vmem>>, vector<16x16xf32>,
    %cst_16 = arith.constant 0.000000e+00 : f32
    %22 = vector.broadcast %cst_16 : f32 to vector<16x16xf32>
    %c1_17 = arith.constant 1 : index
    %c272 = arith.constant 272 : index
    %23 = vector.load %arg8[%c1_17, %c272] : memref<18x288xf32, #tpu.memory_space<vmem>>, vector<16x16xf32>
    tpu.vector_store %arg8[%c1_17, %c272], %22 {strides = array<i32>} : memref<18x288xf32, #tpu.memory_space<vmem>>, vector<16x16xf32>,
    %c1_18 = arith.constant 1 : index
    %c16 = arith.constant 16 : index
    %24 = vector.load %arg8[%c1_18, %c16] : memref<18x288xf32, #tpu.memory_space<vmem>>, vector<16x256xf32>
    tpu.vector_store %arg8[%c1_18, %c16], %15 {strides = array<i32>} : memref<18x288xf32, #tpu.memory_space<vmem>>, vector<16x256xf32>,
    %cst_19 = arith.constant 0.000000e+00 : f32
    %25 = vector.broadcast %cst_19 : f32 to vector<16x256xf32>
    %c0_20 = arith.constant 0 : index
    %c0_21 = arith.constant 0 : index
    %26 = vector.load %arg8[%c0_20, %c0_21] : memref<18x288xf32, #tpu.memory_space<vmem>>, vector<16x256xf32>
    %c0_22 = arith.constant 0 : index
    %c0_23 = arith.constant 0 : index
    %27 = vector.load %arg5[%c0_22, %c0_23] : memref<9x256xf32, #tpu.memory_space<vmem>>, vector<1x256xf32>
    %28 = vector.broadcast %27 : vector<1x256xf32> to vector<16x256xf32>
    %29 = arith.mulf %26, %28 : vector<16x256xf32>
    %30 = arith.addf %25, %29 : vector<16x256xf32>
    %c0_24 = arith.constant 0 : index
    %c16_25 = arith.constant 16 : index
    %31 = vector.load %arg8[%c0_24, %c16_25] : memref<18x288xf32, #tpu.memory_space<vmem>>, vector<16x256xf32>
    %c1_26 = arith.constant 1 : index
    %c0_27 = arith.constant 0 : index
    %32 = vector.load %arg5[%c1_26, %c0_27] : memref<9x256xf32, #tpu.memory_space<vmem>>, vector<1x256xf32>
    %33 = vector.broadcast %32 : vector<1x256xf32> to vector<16x256xf32>
    %34 = arith.mulf %31, %33 : vector<16x256xf32>
    %35 = arith.addf %30, %34 : vector<16x256xf32>
    %c0_28 = arith.constant 0 : index
    %c32 = arith.constant 32 : index
    %36 = vector.load %arg8[%c0_28, %c32] : memref<18x288xf32, #tpu.memory_space<vmem>>, vector<16x256xf32>
    %c2 = arith.constant 2 : index
    %c0_29 = arith.constant 0 : index
    %37 = vector.load %arg5[%c2, %c0_29] : memref<9x256xf32, #tpu.memory_space<vmem>>, vector<1x256xf32>
    %38 = vector.broadcast %37 : vector<1x256xf32> to vector<16x256xf32>
    %39 = arith.mulf %36, %38 : vector<16x256xf32>
    %40 = arith.addf %35, %39 : vector<16x256xf32>
    %c1_30 = arith.constant 1 : index
    %c0_31 = arith.constant 0 : index
    %41 = vector.load %arg8[%c1_30, %c0_31] : memref<18x288xf32, #tpu.memory_space<vmem>>, vector<16x256xf32>
    %c3 = arith.constant 3 : index
    %c0_32 = arith.constant 0 : index
    %42 = vector.load %arg5[%c3, %c0_32] : memref<9x256xf32, #tpu.memory_space<vmem>>, vector<1x256xf32>
    %43 = vector.broadcast %42 : vector<1x256xf32> to vector<16x256xf32>
    %44 = arith.mulf %41, %43 : vector<16x256xf32>
    %45 = arith.addf %40, %44 : vector<16x256xf32>
    %c1_33 = arith.constant 1 : index
    %c16_34 = arith.constant 16 : index
    %46 = vector.load %arg8[%c1_33, %c16_34] : memref<18x288xf32, #tpu.memory_space<vmem>>, vector<16x256xf32>
    %c4 = arith.constant 4 : index
    %c0_35 = arith.constant 0 : index
    %47 = vector.load %arg5[%c4, %c0_35] : memref<9x256xf32, #tpu.memory_space<vmem>>, vector<1x256xf32>
    %48 = vector.broadcast %47 : vector<1x256xf32> to vector<16x256xf32>
    %49 = arith.mulf %46, %48 : vector<16x256xf32>
    %50 = arith.addf %45, %49 : vector<16x256xf32>
    %c1_36 = arith.constant 1 : index
    %c32_37 = arith.constant 32 : index
    %51 = vector.load %arg8[%c1_36, %c32_37] : memref<18x288xf32, #tpu.memory_space<vmem>>, vector<16x256xf32>
    %c5 = arith.constant 5 : index
    %c0_38 = arith.constant 0 : index
    %52 = vector.load %arg5[%c5, %c0_38] : memref<9x256xf32, #tpu.memory_space<vmem>>, vector<1x256xf32>
    %53 = vector.broadcast %52 : vector<1x256xf32> to vector<16x256xf32>
    %54 = arith.mulf %51, %53 : vector<16x256xf32>
    %55 = arith.addf %50, %54 : vector<16x256xf32>
    %c2_39 = arith.constant 2 : index
    %c0_40 = arith.constant 0 : index
    %56 = vector.load %arg8[%c2_39, %c0_40] : memref<18x288xf32, #tpu.memory_space<vmem>>, vector<16x256xf32>
    %c6 = arith.constant 6 : index
    %c0_41 = arith.constant 0 : index
    %57 = vector.load %arg5[%c6, %c0_41] : memref<9x256xf32, #tpu.memory_space<vmem>>, vector<1x256xf32>
    %58 = vector.broadcast %57 : vector<1x256xf32> to vector<16x256xf32>
    %59 = arith.mulf %56, %58 : vector<16x256xf32>
    %60 = arith.addf %55, %59 : vector<16x256xf32>
    %c2_42 = arith.constant 2 : index
    %c16_43 = arith.constant 16 : index
    %61 = vector.load %arg8[%c2_42, %c16_43] : memref<18x288xf32, #tpu.memory_space<vmem>>, vector<16x256xf32>
    %c7 = arith.constant 7 : index
    %c0_44 = arith.constant 0 : index
    %62 = vector.load %arg5[%c7, %c0_44] : memref<9x256xf32, #tpu.memory_space<vmem>>, vector<1x256xf32>
    %63 = vector.broadcast %62 : vector<1x256xf32> to vector<16x256xf32>
    %64 = arith.mulf %61, %63 : vector<16x256xf32>
    %65 = arith.addf %60, %64 : vector<16x256xf32>
    %c2_45 = arith.constant 2 : index
    %c32_46 = arith.constant 32 : index
    %66 = vector.load %arg8[%c2_45, %c32_46] : memref<18x288xf32, #tpu.memory_space<vmem>>, vector<16x256xf32>
    %c8 = arith.constant 8 : index
    %c0_47 = arith.constant 0 : index
    %67 = vector.load %arg5[%c8, %c0_47] : memref<9x256xf32, #tpu.memory_space<vmem>>, vector<1x256xf32>
    %68 = vector.broadcast %67 : vector<1x256xf32> to vector<16x256xf32>
    %69 = arith.mulf %66, %68 : vector<16x256xf32>
    %70 = arith.addf %65, %69 : vector<16x256xf32>
    %71 = arith.truncf %70 : vector<16x256xf32> to vector<16x256xbf16>
    %c0_48 = arith.constant 0 : index
    %c0_49 = arith.constant 0 : index
    %c0_50 = arith.constant 0 : index
    %72 = vector.load %arg6[%c0_48, %c0_49, %c0_50] : memref<1x16x256xbf16, #tpu.memory_space<vmem>>, vector<1x16x256xbf16>
    %73 = vector.shape_cast %72 : vector<1x16x256xbf16> to vector<16x256xbf16>
    %74 = vector.shape_cast %71 : vector<16x256xbf16> to vector<1x16x256xbf16>
    tpu.vector_store %arg6[%c0_48, %c0_49, %c0_50], %74 {strides = array<i32>} : memref<1x16x256xbf16, #tpu.memory_space<vmem>>, vector<1x16x256xbf16>,
    %cst_51 = arith.constant dense<0.000000e+00> : vector<256xf32>
    %75 = vector.multi_reduction <add>, %70, %cst_51 [0] : vector<16x256xf32> to vector<256xf32>
    %76 = vector.shape_cast %75 : vector<256xf32> to vector<1x256xf32>
    %c0_52 = arith.constant 0 : index
    %c0_53 = arith.constant 0 : index
    %c0_54 = arith.constant 0 : index
    %77 = vector.load %arg7[%c0_52, %c0_53, %c0_54] : memref<1x2x256xf32, #tpu.memory_space<vmem>>, vector<1x1x256xf32>
    %78 = vector.shape_cast %77 : vector<1x1x256xf32> to vector<1x256xf32>
    %79 = vector.shape_cast %76 : vector<1x256xf32> to vector<1x1x256xf32>
    tpu.vector_store %arg7[%c0_52, %c0_53, %c0_54], %79 {strides = array<i32>} : memref<1x2x256xf32, #tpu.memory_space<vmem>>, vector<1x1x256xf32>,
    %80 = arith.mulf %70, %70 : vector<16x256xf32>
    %cst_55 = arith.constant dense<0.000000e+00> : vector<256xf32>
    %81 = vector.multi_reduction <add>, %80, %cst_55 [0] : vector<16x256xf32> to vector<256xf32>
    %82 = vector.shape_cast %81 : vector<256xf32> to vector<1x256xf32>
    %c0_56 = arith.constant 0 : index
    %c1_57 = arith.constant 1 : index
    %c0_58 = arith.constant 0 : index
    %83 = vector.load %arg7[%c0_56, %c1_57, %c0_58] : memref<1x2x256xf32, #tpu.memory_space<vmem>>, vector<1x1x256xf32>
    %84 = vector.shape_cast %83 : vector<1x1x256xf32> to vector<1x256xf32>
    %85 = vector.shape_cast %82 : vector<1x256xf32> to vector<1x1x256xf32>
    tpu.vector_store %arg7[%c0_56, %c1_57, %c0_58], %85 {strides = array<i32>} : memref<1x2x256xf32, #tpu.memory_space<vmem>>, vector<1x1x256xf32>,
    return
  }
  func.func @transform_0(%arg0: i32) -> (i32, i32, i32) {
    %c0_i32 = arith.constant 0 : i32
    %c0_i32_0 = arith.constant 0 : i32
    %c0_i32_1 = arith.constant 0 : i32
    return %arg0, %c0_i32, %c0_i32_0 : i32, i32, i32
  }
  func.func @transform_1(%arg0: i32) -> (i32, i32) {
    %c0_i32 = arith.constant 0 : i32
    %c0_i32_0 = arith.constant 0 : i32
    %c0_i32_1 = arith.constant 0 : i32
    return %c0_i32, %c0_i32_0 : i32, i32
  }
  func.func @transform_2(%arg0: i32) -> (i32, i32) {
    %c0_i32 = arith.constant 0 : i32
    %c0_i32_0 = arith.constant 0 : i32
    %c0_i32_1 = arith.constant 0 : i32
    return %c0_i32, %c0_i32_0 : i32, i32
  }
  func.func @transform_3(%arg0: i32) -> (i32, i32) {
    %c0_i32 = arith.constant 0 : i32
    %c0_i32_0 = arith.constant 0 : i32
    %c0_i32_1 = arith.constant 0 : i32
    return %c0_i32, %c0_i32_0 : i32, i32
  }
  func.func @transform_4(%arg0: i32) -> (i32, i32) {
    %c0_i32 = arith.constant 0 : i32
    %c0_i32_0 = arith.constant 0 : i32
    %c0_i32_1 = arith.constant 0 : i32
    return %c0_i32, %c0_i32_0 : i32, i32
  }
  func.func @transform_5(%arg0: i32) -> (i32, i32, i32) {
    %c0_i32 = arith.constant 0 : i32
    %c0_i32_0 = arith.constant 0 : i32
    %c0_i32_1 = arith.constant 0 : i32
    return %arg0, %c0_i32, %c0_i32_0 : i32, i32, i32
  }
  func.func @transform_6(%arg0: i32) -> (i32, i32, i32) {
    %c0_i32 = arith.constant 0 : i32
    %c0_i32_0 = arith.constant 0 : i32
    %c0_i32_1 = arith.constant 0 : i32
    return %arg0, %c0_i32, %c0_i32_0 : i32, i32, i32
  }
}

module attributes {stable_mosaic.version = 11 : i64} {
  func.func @_project_kernel(%arg0: i32, %arg1: memref<1x16x256xbf16, #tpu.memory_space<vmem>>, %arg2: memref<1x256xf32, #tpu.memory_space<vmem>>, %arg3: memref<1x256xf32, #tpu.memory_space<vmem>>, %arg4: memref<256x16xf32, #tpu.memory_space<vmem>>, %arg5: memref<16x4xf32, #tpu.memory_space<vmem>>, %arg6: memref<1x4xf32, #tpu.memory_space<vmem>>, %arg7: memref<4x16xf32, #tpu.memory_space<vmem>>, %arg8: memref<1x16xf32, #tpu.memory_space<vmem>>, %arg9: memref<16x256xf32, #tpu.memory_space<vmem>>, %arg10: memref<256x64xf32, #tpu.memory_space<vmem>>, %arg11: memref<1x16x64xbf16, #tpu.memory_space<vmem>>, %arg12: memref<1x2x64xf32, #tpu.memory_space<vmem>>) attributes {dimension_semantics = [#tpu.dimension_semantics<parallel>], iteration_bounds = array<i64: 2>, scalar_prefetch = 0 : i64, scratch_operands = 0 : i64, tpu.core_type = #tpu.core_type<tc>, window_params = [{transform_indices = @transform_0, window_bounds = array<i64: 1, 16, 256>}, {pipeline_mode = #tpu.pipeline_mode<synchronous>, transform_indices = @transform_1, window_bounds = array<i64: 1, 256>}, {pipeline_mode = #tpu.pipeline_mode<synchronous>, transform_indices = @transform_2, window_bounds = array<i64: 1, 256>}, {pipeline_mode = #tpu.pipeline_mode<synchronous>, transform_indices = @transform_3, window_bounds = array<i64: 256, 16>}, {pipeline_mode = #tpu.pipeline_mode<synchronous>, transform_indices = @transform_4, window_bounds = array<i64: 16, 4>}, {pipeline_mode = #tpu.pipeline_mode<synchronous>, transform_indices = @transform_5, window_bounds = array<i64: 1, 4>}, {pipeline_mode = #tpu.pipeline_mode<synchronous>, transform_indices = @transform_6, window_bounds = array<i64: 4, 16>}, {pipeline_mode = #tpu.pipeline_mode<synchronous>, transform_indices = @transform_7, window_bounds = array<i64: 1, 16>}, {pipeline_mode = #tpu.pipeline_mode<synchronous>, transform_indices = @transform_8, window_bounds = array<i64: 16, 256>}, {pipeline_mode = #tpu.pipeline_mode<synchronous>, transform_indices = @transform_9, window_bounds = array<i64: 256, 64>}, {transform_indices = @transform_10, window_bounds = array<i64: 1, 16, 64>}, {transform_indices = @transform_11, window_bounds = array<i64: 1, 2, 64>}]} {
    %c0 = arith.constant 0 : index
    %c0_0 = arith.constant 0 : index
    %c0_1 = arith.constant 0 : index
    %0 = vector.load %arg1[%c0, %c0_0, %c0_1] : memref<1x16x256xbf16, #tpu.memory_space<vmem>>, vector<1x16x256xbf16>
    %1 = vector.shape_cast %0 : vector<1x16x256xbf16> to vector<16x256xbf16>
    %2 = arith.extf %1 : vector<16x256xbf16> to vector<16x256xf32>
    %c0_2 = arith.constant 0 : index
    %c0_3 = arith.constant 0 : index
    %3 = vector.load %arg2[%c0_2, %c0_3] : memref<1x256xf32, #tpu.memory_space<vmem>>, vector<1x256xf32>
    %4 = vector.broadcast %3 : vector<1x256xf32> to vector<16x256xf32>
    %5 = arith.mulf %2, %4 : vector<16x256xf32>
    %c0_4 = arith.constant 0 : index
    %c0_5 = arith.constant 0 : index
    %6 = vector.load %arg3[%c0_4, %c0_5] : memref<1x256xf32, #tpu.memory_space<vmem>>, vector<1x256xf32>
    %7 = vector.broadcast %6 : vector<1x256xf32> to vector<16x256xf32>
    %8 = arith.addf %5, %7 : vector<16x256xf32>
    %9 = arith.negf %8 : vector<16x256xf32>
    %10 = math.exp %9 : vector<16x256xf32>
    %cst = arith.constant 1.000000e+00 : f32
    %11 = vector.broadcast %cst : f32 to vector<16x256xf32>
    %12 = arith.addf %11, %10 : vector<16x256xf32>
    %13 = arith.divf %11, %12 : vector<16x256xf32>
    %14 = arith.mulf %8, %13 : vector<16x256xf32>
    %cst_6 = arith.constant dense<0.000000e+00> : vector<256xf32>
    %15 = vector.multi_reduction <add>, %14, %cst_6 [0] : vector<16x256xf32> to vector<256xf32>
    %16 = vector.shape_cast %15 : vector<256xf32> to vector<1x256xf32>
    %c0_7 = arith.constant 0 : index
    %c0_8 = arith.constant 0 : index
    %17 = vector.load %arg4[%c0_7, %c0_8] : memref<256x16xf32, #tpu.memory_space<vmem>>, vector<256x16xf32>
    %cst_9 = arith.constant dense<0.000000e+00> : vector<1x16xf32>
    %18 = tpu.matmul %16, %17, %cst_9 {dimension_numbers = #tpu.dot_dimension_numbers<[1], [0], [0], [1], [0, 0, 1, 1], [], []>} : vector<1x256xf32>, vector<256x16xf32>, vector<1x16xf32> -> vector<1x16xf32>
    %cst_10 = arith.constant 3.906250e-03 : f32
    %19 = vector.broadcast %cst_10 : f32 to vector<1x16xf32>
    %20 = arith.mulf %18, %19 : vector<1x16xf32>
    %c0_11 = arith.constant 0 : index
    %c0_12 = arith.constant 0 : index
    %21 = vector.load %arg5[%c0_11, %c0_12] : memref<16x4xf32, #tpu.memory_space<vmem>>, vector<16x4xf32>
    %cst_13 = arith.constant dense<0.000000e+00> : vector<1x4xf32>
    %22 = tpu.matmul %20, %21, %cst_13 {dimension_numbers = #tpu.dot_dimension_numbers<[1], [0], [0], [1], [0, 0, 1, 1], [], []>} : vector<1x16xf32>, vector<16x4xf32>, vector<1x4xf32> -> vector<1x4xf32>
    %c0_14 = arith.constant 0 : index
    %c0_15 = arith.constant 0 : index
    %23 = vector.load %arg6[%c0_14, %c0_15] : memref<1x4xf32, #tpu.memory_space<vmem>>, vector<1x4xf32>
    %24 = arith.addf %22, %23 : vector<1x4xf32>
    %25 = arith.negf %24 : vector<1x4xf32>
    %26 = math.exp %25 : vector<1x4xf32>
    %cst_16 = arith.constant 1.000000e+00 : f32
    %27 = vector.broadcast %cst_16 : f32 to vector<1x4xf32>
    %28 = arith.addf %27, %26 : vector<1x4xf32>
    %29 = arith.divf %27, %28 : vector<1x4xf32>
    %30 = arith.mulf %24, %29 : vector<1x4xf32>
    %c0_17 = arith.constant 0 : index
    %c0_18 = arith.constant 0 : index
    %31 = vector.load %arg7[%c0_17, %c0_18] : memref<4x16xf32, #tpu.memory_space<vmem>>, vector<4x16xf32>
    %cst_19 = arith.constant dense<0.000000e+00> : vector<1x16xf32>
    %32 = tpu.matmul %30, %31, %cst_19 {dimension_numbers = #tpu.dot_dimension_numbers<[1], [0], [0], [1], [0, 0, 1, 1], [], []>} : vector<1x4xf32>, vector<4x16xf32>, vector<1x16xf32> -> vector<1x16xf32>
    %c0_20 = arith.constant 0 : index
    %c0_21 = arith.constant 0 : index
    %33 = vector.load %arg8[%c0_20, %c0_21] : memref<1x16xf32, #tpu.memory_space<vmem>>, vector<1x16xf32>
    %34 = arith.addf %32, %33 : vector<1x16xf32>
    %35 = arith.negf %34 : vector<1x16xf32>
    %36 = math.exp %35 : vector<1x16xf32>
    %cst_22 = arith.constant 1.000000e+00 : f32
    %37 = vector.broadcast %cst_22 : f32 to vector<1x16xf32>
    %38 = arith.addf %37, %36 : vector<1x16xf32>
    %39 = arith.divf %37, %38 : vector<1x16xf32>
    %c0_23 = arith.constant 0 : index
    %c0_24 = arith.constant 0 : index
    %40 = vector.load %arg9[%c0_23, %c0_24] : memref<16x256xf32, #tpu.memory_space<vmem>>, vector<16x256xf32>
    %cst_25 = arith.constant dense<0.000000e+00> : vector<1x256xf32>
    %41 = tpu.matmul %39, %40, %cst_25 {dimension_numbers = #tpu.dot_dimension_numbers<[1], [0], [0], [1], [0, 0, 1, 1], [], []>} : vector<1x16xf32>, vector<16x256xf32>, vector<1x256xf32> -> vector<1x256xf32>
    %42 = vector.broadcast %41 : vector<1x256xf32> to vector<16x256xf32>
    %43 = arith.mulf %14, %42 : vector<16x256xf32>
    %c0_26 = arith.constant 0 : index
    %c0_27 = arith.constant 0 : index
    %44 = vector.load %arg10[%c0_26, %c0_27] : memref<256x64xf32, #tpu.memory_space<vmem>>, vector<256x64xf32>
    %cst_28 = arith.constant dense<0.000000e+00> : vector<16x64xf32>
    %45 = tpu.matmul %43, %44, %cst_28 {dimension_numbers = #tpu.dot_dimension_numbers<[1], [0], [0], [1], [0, 0, 1, 1], [], []>} : vector<16x256xf32>, vector<256x64xf32>, vector<16x64xf32> -> vector<16x64xf32>
    %46 = arith.truncf %45 : vector<16x64xf32> to vector<16x64xbf16>
    %c0_29 = arith.constant 0 : index
    %c0_30 = arith.constant 0 : index
    %c0_31 = arith.constant 0 : index
    %47 = vector.load %arg11[%c0_29, %c0_30, %c0_31] : memref<1x16x64xbf16, #tpu.memory_space<vmem>>, vector<1x16x64xbf16>
    %48 = vector.shape_cast %47 : vector<1x16x64xbf16> to vector<16x64xbf16>
    %49 = vector.shape_cast %46 : vector<16x64xbf16> to vector<1x16x64xbf16>
    tpu.vector_store %arg11[%c0_29, %c0_30, %c0_31], %49 {strides = array<i32>} : memref<1x16x64xbf16, #tpu.memory_space<vmem>>, vector<1x16x64xbf16>,
    %cst_32 = arith.constant dense<0.000000e+00> : vector<64xf32>
    %50 = vector.multi_reduction <add>, %45, %cst_32 [0] : vector<16x64xf32> to vector<64xf32>
    %51 = vector.shape_cast %50 : vector<64xf32> to vector<1x64xf32>
    %c0_33 = arith.constant 0 : index
    %c0_34 = arith.constant 0 : index
    %c0_35 = arith.constant 0 : index
    %52 = vector.load %arg12[%c0_33, %c0_34, %c0_35] : memref<1x2x64xf32, #tpu.memory_space<vmem>>, vector<1x1x64xf32>
    %53 = vector.shape_cast %52 : vector<1x1x64xf32> to vector<1x64xf32>
    %54 = vector.shape_cast %51 : vector<1x64xf32> to vector<1x1x64xf32>
    tpu.vector_store %arg12[%c0_33, %c0_34, %c0_35], %54 {strides = array<i32>} : memref<1x2x64xf32, #tpu.memory_space<vmem>>, vector<1x1x64xf32>,
    %55 = arith.mulf %45, %45 : vector<16x64xf32>
    %cst_36 = arith.constant dense<0.000000e+00> : vector<64xf32>
    %56 = vector.multi_reduction <add>, %55, %cst_36 [0] : vector<16x64xf32> to vector<64xf32>
    %57 = vector.shape_cast %56 : vector<64xf32> to vector<1x64xf32>
    %c0_37 = arith.constant 0 : index
    %c1 = arith.constant 1 : index
    %c0_38 = arith.constant 0 : index
    %58 = vector.load %arg12[%c0_37, %c1, %c0_38] : memref<1x2x64xf32, #tpu.memory_space<vmem>>, vector<1x1x64xf32>
    %59 = vector.shape_cast %58 : vector<1x1x64xf32> to vector<1x64xf32>
    %60 = vector.shape_cast %57 : vector<1x64xf32> to vector<1x1x64xf32>
    tpu.vector_store %arg12[%c0_37, %c1, %c0_38], %60 {strides = array<i32>} : memref<1x2x64xf32, #tpu.memory_space<vmem>>, vector<1x1x64xf32>,
    return
  }
  func.func @transform_0(%arg0: i32) -> (i32, i32, i32) {
    %c0_i32 = arith.constant 0 : i32
    %c0_i32_0 = arith.constant 0 : i32
    %c0_i32_1 = arith.constant 0 : i32
    return %arg0, %c0_i32, %c0_i32_0 : i32, i32, i32
  }
  func.func @transform_1(%arg0: i32) -> (i32, i32) {
    %c0_i32 = arith.constant 0 : i32
    %c0_i32_0 = arith.constant 0 : i32
    %c0_i32_1 = arith.constant 0 : i32
    return %c0_i32, %c0_i32_0 : i32, i32
  }
  func.func @transform_2(%arg0: i32) -> (i32, i32) {
    %c0_i32 = arith.constant 0 : i32
    %c0_i32_0 = arith.constant 0 : i32
    %c0_i32_1 = arith.constant 0 : i32
    return %c0_i32, %c0_i32_0 : i32, i32
  }
  func.func @transform_3(%arg0: i32) -> (i32, i32) {
    %c0_i32 = arith.constant 0 : i32
    %c0_i32_0 = arith.constant 0 : i32
    %c0_i32_1 = arith.constant 0 : i32
    return %c0_i32, %c0_i32_0 : i32, i32
  }
  func.func @transform_4(%arg0: i32) -> (i32, i32) {
    %c0_i32 = arith.constant 0 : i32
    %c0_i32_0 = arith.constant 0 : i32
    %c0_i32_1 = arith.constant 0 : i32
    return %c0_i32, %c0_i32_0 : i32, i32
  }
  func.func @transform_5(%arg0: i32) -> (i32, i32) {
    %c0_i32 = arith.constant 0 : i32
    %c0_i32_0 = arith.constant 0 : i32
    %c0_i32_1 = arith.constant 0 : i32
    return %c0_i32, %c0_i32_0 : i32, i32
  }
  func.func @transform_6(%arg0: i32) -> (i32, i32) {
    %c0_i32 = arith.constant 0 : i32
    %c0_i32_0 = arith.constant 0 : i32
    %c0_i32_1 = arith.constant 0 : i32
    return %c0_i32, %c0_i32_0 : i32, i32
  }
  func.func @transform_7(%arg0: i32) -> (i32, i32) {
    %c0_i32 = arith.constant 0 : i32
    %c0_i32_0 = arith.constant 0 : i32
    %c0_i32_1 = arith.constant 0 : i32
    return %c0_i32, %c0_i32_0 : i32, i32
  }
  func.func @transform_8(%arg0: i32) -> (i32, i32) {
    %c0_i32 = arith.constant 0 : i32
    %c0_i32_0 = arith.constant 0 : i32
    %c0_i32_1 = arith.constant 0 : i32
    return %c0_i32, %c0_i32_0 : i32, i32
  }
  func.func @transform_9(%arg0: i32) -> (i32, i32) {
    %c0_i32 = arith.constant 0 : i32
    %c0_i32_0 = arith.constant 0 : i32
    %c0_i32_1 = arith.constant 0 : i32
    return %c0_i32, %c0_i32_0 : i32, i32
  }
  func.func @transform_10(%arg0: i32) -> (i32, i32, i32) {
    %c0_i32 = arith.constant 0 : i32
    %c0_i32_0 = arith.constant 0 : i32
    %c0_i32_1 = arith.constant 0 : i32
    return %arg0, %c0_i32, %c0_i32_0 : i32, i32, i32
  }
  func.func @transform_11(%arg0: i32) -> (i32, i32, i32) {
    %c0_i32 = arith.constant 0 : i32
    %c0_i32_0 = arith.constant 0 : i32
    %c0_i32_1 = arith.constant 0 : i32
    return %arg0, %c0_i32, %c0_i32_0 : i32, i32, i32
  }
}

module attributes {stable_mosaic.version = 11 : i64} {
  func.func @_out_res_kernel(%arg0: i32, %arg1: memref<32x64xbf16, #tpu.memory_space<vmem>>, %arg2: memref<32x64xf32, #tpu.memory_space<vmem>>, %arg3: memref<1x64xf32, #tpu.memory_space<vmem>>, %arg4: memref<1x64xf32, #tpu.memory_space<vmem>>, %arg5: memref<32x64xf32, #tpu.memory_space<vmem>>) attributes {dimension_semantics = [#tpu.dimension_semantics<parallel>], iteration_bounds = array<i64: 1>, scalar_prefetch = 0 : i64, scratch_operands = 0 : i64, tpu.core_type = #tpu.core_type<tc>, window_params = [{transform_indices = @transform_0, window_bounds = array<i64: 32, 64>}, {transform_indices = @transform_1, window_bounds = array<i64: 32, 64>}, {pipeline_mode = #tpu.pipeline_mode<synchronous>, transform_indices = @transform_2, window_bounds = array<i64: 1, 64>}, {pipeline_mode = #tpu.pipeline_mode<synchronous>, transform_indices = @transform_3, window_bounds = array<i64: 1, 64>}, {transform_indices = @transform_4, window_bounds = array<i64: 32, 64>}]} {
    %c0 = arith.constant 0 : index
    %c0_0 = arith.constant 0 : index
    %0 = vector.load %arg1[%c0, %c0_0] : memref<32x64xbf16, #tpu.memory_space<vmem>>, vector<32x64xbf16>
    %1 = arith.extf %0 : vector<32x64xbf16> to vector<32x64xf32>
    %c0_1 = arith.constant 0 : index
    %c0_2 = arith.constant 0 : index
    %2 = vector.load %arg3[%c0_1, %c0_2] : memref<1x64xf32, #tpu.memory_space<vmem>>, vector<1x64xf32>
    %3 = vector.broadcast %2 : vector<1x64xf32> to vector<32x64xf32>
    %4 = arith.mulf %1, %3 : vector<32x64xf32>
    %c0_3 = arith.constant 0 : index
    %c0_4 = arith.constant 0 : index
    %5 = vector.load %arg4[%c0_3, %c0_4] : memref<1x64xf32, #tpu.memory_space<vmem>>, vector<1x64xf32>
    %6 = vector.broadcast %5 : vector<1x64xf32> to vector<32x64xf32>
    %7 = arith.addf %4, %6 : vector<32x64xf32>
    %c0_5 = arith.constant 0 : index
    %c0_6 = arith.constant 0 : index
    %8 = vector.load %arg2[%c0_5, %c0_6] : memref<32x64xf32, #tpu.memory_space<vmem>>, vector<32x64xf32>
    %9 = arith.addf %7, %8 : vector<32x64xf32>
    %c0_7 = arith.constant 0 : index
    %c0_8 = arith.constant 0 : index
    %10 = vector.load %arg5[%c0_7, %c0_8] : memref<32x64xf32, #tpu.memory_space<vmem>>, vector<32x64xf32>
    tpu.vector_store %arg5[%c0_7, %c0_8], %9 {strides = array<i32>} : memref<32x64xf32, #tpu.memory_space<vmem>>, vector<32x64xf32>,
    return
  }
  func.func @transform_0(%arg0: i32) -> (i32, i32) {
    %c0_i32 = arith.constant 0 : i32
    %c0_i32_0 = arith.constant 0 : i32
    return %arg0, %c0_i32 : i32, i32
  }
  func.func @transform_1(%arg0: i32) -> (i32, i32) {
    %c0_i32 = arith.constant 0 : i32
    %c0_i32_0 = arith.constant 0 : i32
    return %arg0, %c0_i32 : i32, i32
  }
  func.func @transform_2(%arg0: i32) -> (i32, i32) {
    %c0_i32 = arith.constant 0 : i32
    %c0_i32_0 = arith.constant 0 : i32
    %c0_i32_1 = arith.constant 0 : i32
    return %c0_i32, %c0_i32_0 : i32, i32
  }
  func.func @transform_3(%arg0: i32) -> (i32, i32) {
    %c0_i32 = arith.constant 0 : i32
    %c0_i32_0 = arith.constant 0 : i32
    %c0_i32_1 = arith.constant 0 : i32
    return %c0_i32, %c0_i32_0 : i32, i32
  }
  func.func @transform_4(%arg0: i32) -> (i32, i32) {
    %c0_i32 = arith.constant 0 : i32
    %c0_i32_0 = arith.constant 0 : i32
    return %arg0, %c0_i32 : i32, i32
  }
}

</mosaic_0001>

<bundles_post_ra>
// kernel: squeeze.7
= control target key start
LH: loop header
LB: loop body
LE: loop exit
PB: predicated region body
PF: predicated region fallthrough
CT: control target
= control target key end

     0   :  { %s66_s8 = smov 80   ;;  %s67_s9 = smov 48   ;;  %vm7_vm0 = vcmask 130048   ;;  %s117_s0 = inlined_call_operand.vmem [shape: f32[256], index: 0, kind: input, shape index: {}]   ;;  %s118_s1 = inlined_call_operand.vmem [shape: f32[16,16], index: 1, kind: output, shape index: {}]  }
   0x1   :  { %v4_v0 = vld [vmem:[%s117_s0] sm:$0x3]  ;;  %s65_s0 = smov 112   ;;  %s68_s10 = smov 96  }
   0x2   :  { %5 = vst [vmem:[#allocation0] sm:$0x3] %v4_v0  ;;  %s69_s11 = smov 64   ;;  %s70_s12 = smov 32  }
   0x3   :  { %s71_s13 = smov 16  }
   0x9   :  { %v9_v1 = vld [vmem:[#allocation0] sm:$0x3]  }
   0xa   :  { %v21_v2 = vld [vmem:[#allocation0] sm:$0x3]   ;;  %10 = vrot.lane.b32.xlu0 %v9_v1, %s65_s0 }
   0xb   :  { %22 = vrot.lane.b32.xlu1 %v21_v2, %s66_s8  ;;  %v33_v3 = vld [vmem:[#allocation0] sm:$0x3]  }
   0xc   :  { %34 = vrot.lane.b32.xlu2 %v33_v3, %s67_s9  ;;  %v15_v4 = vld [vmem:[#allocation0] sm:$0x3]  }
   0xd   :  { %v27_v5 = vld [vmem:[#allocation0] sm:$0x3]  }
   0xe   :  { %v39_v6 = vld [vmem:[#allocation0] sm:$0x3]  }
   0xf   :  { %v45_v7 = vld [vmem:[#allocation0] sm:$0x3]  }
  0x10   :  { %v6_v8 = vld [vmem:[#allocation0] sm:$0x3]  }
  0x11   :  { %8 = vst.msk [vmem:[%s118_s1] ss:$8 sm:$0x3] %vm7_vm0, %v6_v8  }
  0x12   :  { %16 = vrot.lane.b32.xlu0 %v15_v4, %s68_s10 }
  0x13   :  { %28 = vrot.lane.b32.xlu1 %v27_v5, %s69_s11 }
  0x14   :  { %40 = vrot.lane.b32.xlu2 %v39_v6, %s70_s12 }
  0x1a   :  { %46 = vrot.lane.b32.xlu0 %v45_v7, %s71_s13 }
  0x66   :  { %v35_v9 = vpop.permute.xlu2 %34  }
  0x67   :  { %55 = vst.msk [vmem:[%s118_s1 + $0x5] ss:$8 sm:$0x3] %vm7_vm0, %v35_v9  }
  0x6e   :  { %v41_v10 = vpop.permute.xlu2 %40  }
  0x6f   :  { %56 = vst.msk [vmem:[%s118_s1 + $0x6] ss:$8 sm:$0x3] %vm7_vm0, %v41_v10  }
  0x7c   :  { %v11_v11 = vpop.permute.xlu0 %10  }
  0x7d   :  { %v23_v12 = vpop.permute.xlu1 %22   ;;  %51 = vst.msk [vmem:[%s118_s1 + $0x1] ss:$8 sm:$0x3] %vm7_vm0, %v11_v11  }
  0x7e   :  { %53 = vst.msk [vmem:[%s118_s1 + $0x3] ss:$8 sm:$0x3] %vm7_vm0, %v23_v12  }
  0x84   :  { %v17_v13 = vpop.permute.xlu0 %16  }
  0x85   :  { %v29_v14 = vpop.permute.xlu1 %28   ;;  %52 = vst.msk [vmem:[%s118_s1 + $0x2] ss:$8 sm:$0x3] %vm7_vm0, %v17_v13  }
  0x86   :  { %54 = vst.msk [vmem:[%s118_s1 + $0x4] ss:$8 sm:$0x3] %vm7_vm0, %v29_v14  }
  0x8c   :  { %v47_v15 = vpop.permute.xlu0 %46  }
  0x8d   :  { %57 = vst.msk [vmem:[%s118_s1 + $0x7] ss:$8 sm:$0x3] %vm7_vm0, %v47_v15  }

// kernel: tile.53
= control target key start
LH: loop header
LB: loop body
LE: loop exit
PB: predicated region body
PF: predicated region fallthrough
CT: control target
= control target key end

     0   :  { %s28_s0 = inlined_call_operand.vmem [shape: f32[16], index: 0, kind: input, shape index: {}]   ;;  %s29_s1 = inlined_call_operand.vmem [shape: f32[16,16], index: 1, kind: output, shape index: {}]  }
   0x1   :  { %v4_v0 = vld [vmem:[%s28_s0] ss:$0 sm:$0xff] }
   0x2   :  { %5 = vst [vmem:[%s29_s1] sm:$0xff] %v4_v0 }
   0x3   :  { %8 = vst [vmem:[%s29_s1 + $0x8] sm:$0xff] %v4_v0 }

// kernel: tile.54
= control target key start
LH: loop header
LB: loop body
LE: loop exit
PB: predicated region body
PF: predicated region fallthrough
CT: control target
= control target key end

     0   :  { %s7_s6 = smov 3  ;;  %s21_s9 = smov 3  ;;  %vm4_vm0 = vcmask 130048   ;;  %vm11_vm1 = vcmask 1048448   ;;  %vm18_vm2 = vcmask 917248   ;;  %vm25_vm3 = vcmask 786048   ;;  %s129_s0 = inlined_call_operand.vmem [shape: f32[16,16], index: 0, kind: input, shape index: {}]   ;;  %s130_s1 = inlined_call_operand.vmem [shape: f32[1,256], index: 1, kind: output, shape index: {}]  }
   0x1   :  { %v67_v0 = vld [vmem:[%s129_s0 + $0x7] ss:$8 sm:%s7_s6]   ;;  %s82_s10 = smov 112   ;;  %v69_v1 = vld [vmem:[%s129_s0 + $0x5] ss:$8 sm:%s21_s9]   ;;  %s83_s13 = smov 80  }
   0x2   :  { %9 = vrot.lane.b32.xlu0 %v67_v0, %s82_s10  ;;  %23 = vrot.lane.b32.xlu1 %v69_v1, %s83_s13  ;;  %s14_s14 = smov 3  ;;  %s28_s15 = smov 3  ;;  %vm32_vm4 = vcmask 654848   ;;  %vm39_vm5 = vcmask 523648   ;;  %vm46_vm6 = vcmask 392448   ;;  %vm53_vm7 = vcmask 261248  }
   0x3   :  { %s35_s16 = smov 3  ;;  %v68_v3 = vld [vmem:[%s129_s0 + $0x6] ss:$8 sm:%s14_s14]   ;;  %s84_s21 = smov 48   ;;  %v70_v4 = vld [vmem:[%s129_s0 + $0x4] ss:$8 sm:%s28_s15]  }
   0x4   :  { %v71_v2 = vld [vmem:[%s129_s0 + $0x3] ss:$8 sm:%s35_s16]   ;;  %s42_s24 = smov 3  ;;  %s85_s25 = smov 96  }
   0x5   :  { %37 = vrot.lane.b32.xlu2 %v71_v2, %s84_s21  ;;  %s86_s26 = smov 64   ;;  %s49_s27 = smov 3  ;;  %v72_v5 = vld [vmem:[%s129_s0 + $0x2] ss:$8 sm:%s42_s24]  }
   0x6   :  { %v73_v6 = vld [vmem:[%s129_s0 + $0x1] ss:$8 sm:%s49_s27]   ;;  %s87_s3 = smov 32   ;;  %s88_s4 = smov 16  }
   0x7   :  { %s2_s5 = smov 3 }
   0x8   :  { %v3_v7 = vld [vmem:[%s129_s0] ss:$8 sm:%s2_s5]  }
   0x9   :  { %5 = vst.msk [vmem:[#allocation0] ss:$8 sm:$0x3] %vm4_vm0, %v3_v7  }
   0xa   :  { %16 = vrot.lane.b32.xlu0 %v68_v3, %s85_s25  ;;  %30 = vrot.lane.b32.xlu1 %v70_v4, %s86_s26 }
   0xd   :  { %44 = vrot.lane.b32.xlu2 %v72_v5, %s87_s3 }
  0x12   :  { %51 = vrot.lane.b32.xlu0 %v73_v6, %s88_s4 }
  0x5f   :  { %v38_v8 = vpop.permute.xlu2 %37  }
  0x67   :  { %v45_v9 = vpop.permute.xlu2 %44  }
  0x74   :  { %v10_v10 = vpop.permute.xlu0 %9   ;;  %v24_v11 = vpop.permute.xlu1 %23  }
  0x75   :  { %12 = vst.msk [vmem:[#allocation0] ss:$8 sm:$0x3] %vm11_vm1, %v10_v10  }
  0x7c   :  { %v17_v12 = vpop.permute.xlu0 %16   ;;  %v31_v13 = vpop.permute.xlu1 %30  }
  0x7d   :  { %19 = vst.msk [vmem:[#allocation0] ss:$8 sm:$0x3] %vm18_vm2, %v17_v12  }
  0x7e   :  { %26 = vst.msk [vmem:[#allocation0] ss:$8 sm:$0x3] %vm25_vm3, %v24_v11  }
  0x7f   :  { %33 = vst.msk [vmem:[#allocation0] ss:$8 sm:$0x3] %vm32_vm4, %v31_v13  }
  0x80   :  { %40 = vst.msk [vmem:[#allocation0] ss:$8 sm:$0x3] %vm39_vm5, %v38_v8  }
  0x81   :  { %47 = vst.msk [vmem:[#allocation0] ss:$8 sm:$0x3] %vm46_vm6, %v45_v9  }
  0x84   :  { %v52_v14 = vpop.permute.xlu0 %51  }
  0x85   :  { %54 = vst.msk [vmem:[#allocation0] ss:$8 sm:$0x3] %vm53_vm7, %v52_v14  }
  0x8c   :  { %v57_v15 = vld [vmem:[#allocation0] sm:$0x1]  ;;  %v62_v16 = vld [vmem:[#allocation0 + $0x8] sm:$0x1] }
  0x8d   :  { %60 = vst [vmem:[%s130_s1] sm:$0x1] %v57_v15 }
  0x8e   :  { %74 = vst [vmem:[%s130_s1 + $0x1] sm:$0x1] %v62_v16 }

// kernel: tile.44
= control target key start
LH: loop header
LB: loop body
LE: loop exit
PB: predicated region body
PF: predicated region fallthrough
CT: control target
= control target key end

     0   :  { %s81_s6 = smov 3  ;;  %s36_s9 = smov 3  ;;  %vm41_vm0 = vcmask 1043458   ;;  %vm46_vm1 = vcmask 1045508   ;;  %vm51_vm2 = vcmask 1047558   ;;  %vm4_vm3 = vcmask 1047556   ;;  %s878_s0 = inlined_call_operand.vmem [shape: f32[9,16,16], index: 0, kind: input, shape index: {}]   ;;  %s879_s1 = inlined_call_operand.vmem [shape: f32[9,256], index: 1, kind: output, shape index: {}]  }
   0x1   :  { %v426_v0 = vld [vmem:[%s878_s0 + $0x87] ss:$8 sm:%s81_s6]   ;;  %s39_s10 = smov 12  ;;  %s501_s11 = smov 112   ;;  %vm6_vm4 = vcmask 130048   ;;  %vm55_vm5 = vcmask 1048448  }
   0x2   :  { %83 = vrot.lane.b32.xlu1 %v426_v0, %s501_s11  ;;  %v417_v1 = vld [vmem:[%s878_s0 + $0x7] ss:$16 sm:%s36_s9]   ;;  %s44_s14 = smov 48  ;;  %s49_s15 = smov 192  ;;  %vm108_vm6 = vcmask 917248   ;;  %vm161_vm7 = vcmask 786048  }
   0x3   :  { %v418_v2 = vld [vmem:[%s878_s0 + $0x7] ss:$16 sm:%s39_s10]   ;;  %s89_s20 = smov 3  ;;  %s92_s21 = smov 12  ;;  %vm214_vm8 = vcmask 654848   ;;  %vm267_vm9 = vcmask 523648  }
   0x4   :  { %v419_v3 = vld [vmem:[%s878_s0 + $0x7] ss:$16 sm:%s44_s14]   ;;  %v42_v4 = vsel %vm41_vm0, %v418_v2, %v417_v1  ;;  %v428_v6 = vld [vmem:[%s878_s0 + $0x6] ss:$16 sm:%s89_s20]   ;;  %s97_s26 = smov 48  ;;  %s102_s27 = smov 192 }
   0x5   :  { %v420_v5 = vld [vmem:[%s878_s0 + $0x7] ss:$16 sm:%s49_s15]   ;;  %v47_v7 = vsel %vm46_vm1, %v419_v3, %v42_v4  ;;  %v429_v8 = vld [vmem:[%s878_s0 + $0x6] ss:$16 sm:%s92_s21]   ;;  %s58_s3 = smov 3  ;;  %s61_s8 = smov 12 }
   0x6   :  { %v430_v9 = vld [vmem:[%s878_s0 + $0x6] ss:$16 sm:%s97_s26]   ;;  %v52_v10 = vsel %vm51_vm2, %v420_v5, %v47_v7  ;;  %v95_v11 = vsel %vm41_vm0, %v429_v8, %v428_v6  ;;  %v421_v13 = vld [vmem:[%s878_s0 + $0xf] ss:$16 sm:%s58_s3]   ;;  %s66_s9 = smov 48  ;;  %s71_s13 = smov 192 }
   0x7   :  { %v431_v12 = vld [vmem:[%s878_s0 + $0x6] ss:$16 sm:%s102_s27]   ;;  %53 = vrot.lane.b32.xlu0 %v52_v10, %s501_s11  ;;  %v100_v14 = vsel %vm46_vm1, %v430_v9, %v95_v11  ;;  %s164_s18 = smov 3  ;;  %s167_s19 = smov 12  ;;  %vm320_vm10 = vcmask 392448   ;;  %vm373_vm11 = vcmask 261248  }
   0x8   :  { %v422_v15 = vld [vmem:[%s878_s0 + $0xf] ss:$16 sm:%s61_s8]   ;;  %v105_v16 = vsel %vm51_vm2, %v431_v12, %v100_v14  ;;  %v443_v21 = vld [vmem:[%s878_s0 + $0xd] ss:$16 sm:%s164_s18]   ;;  %s172_s24 = smov 48  ;;  %s177_s25 = smov 192 }
   0x9   :  { %v64_v17 = vsel %vm41_vm0, %v422_v15, %v421_v13  ;;  %v423_v18 = vld [vmem:[%s878_s0 + $0xf] ss:$16 sm:%s66_s9]   ;;  %v444_v22 = vld [vmem:[%s878_s0 + $0xd] ss:$16 sm:%s167_s19]   ;;  %s502_s26 = smov 96   ;;  %s142_s29 = smov 3 }
   0xa   :  { %v424_v19 = vld [vmem:[%s878_s0 + $0xf] ss:$16 sm:%s71_s13]   ;;  %v69_v20 = vsel %vm46_vm1, %v423_v18, %v64_v17  ;;  %106 = vrot.lane.b32.xlu1 %v105_v16, %s502_s26  ;;  %v170_v23 = vsel %vm41_vm0, %v444_v22, %v443_v21  ;;  %s145_s30 = smov 12  ;;  %s150_s4 = smov 48 }
   0xb   :  { %v445_v24 = vld [vmem:[%s878_s0 + $0xd] ss:$16 sm:%s172_s24]   ;;  %v439_v25 = vld [vmem:[%s878_s0 + $0x5] ss:$16 sm:%s142_s29]   ;;  %v74_v26 = vsel %vm51_vm2, %v424_v19, %v69_v20  ;;  %s111_s9 = smov 3  ;;  %s114_s10 = smov 12 }
   0xc   :  { %v175_v27 = vsel %vm46_vm1, %v445_v24, %v170_v23  ;;  %v446_v28 = vld [vmem:[%s878_s0 + $0xd] ss:$16 sm:%s177_s25]   ;;  %v440_v29 = vld [vmem:[%s878_s0 + $0x5] ss:$16 sm:%s145_s30]   ;;  %s119_s16 = smov 48  ;;  %s124_s17 = smov 192 }
   0xd   :  { %v441_v30 = vld [vmem:[%s878_s0 + $0x5] ss:$16 sm:%s150_s4]   ;;  %v432_v31 = vld [vmem:[%s878_s0 + $0xe] ss:$16 sm:%s111_s9]   ;;  %v148_v32 = vsel %vm41_vm0, %v440_v29, %v439_v25  ;;  %s155_s18 = smov 192  ;;  %s217_s23 = smov 3  ;;  %v180_v35 = vsel %vm51_vm2, %v446_v28, %v175_v27 }
   0xe   :  { %v433_v33 = vld [vmem:[%s878_s0 + $0xe] ss:$16 sm:%s114_s10]   ;;  %s220_s25 = smov 12  ;;  %s225_s27 = smov 48  ;;  %v454_v39 = vld [vmem:[%s878_s0 + $0xc] ss:$16 sm:%s217_s23]   ;;  %v153_v41 = vsel %vm46_vm1, %v441_v30, %v148_v32 }
   0xf   :  { %v434_v34 = vld [vmem:[%s878_s0 + $0xe] ss:$16 sm:%s119_s16]   ;;  %75 = vrot.lane.b32.xlu0 %v74_v26, %s501_s11  ;;  %v117_v36 = vsel %vm41_vm0, %v433_v33, %v432_v31  ;;  %s195_s3 = smov 3  ;;  %s230_s8 = smov 192 }
  0x10   :  { %v435_v37 = vld [vmem:[%s878_s0 + $0xe] ss:$16 sm:%s124_s17]   ;;  %v122_v38 = vsel %vm46_vm1, %v434_v34, %v117_v36  ;;  %v455_v40 = vld [vmem:[%s878_s0 + $0xc] ss:$16 sm:%s220_s25]   ;;  %s198_s9 = smov 12  ;;  %s503_s10 = smov 80  }
  0x11   :  { %v442_v42 = vld [vmem:[%s878_s0 + $0x5] ss:$16 sm:%s155_s18]   ;;  %v127_v43 = vsel %vm51_vm2, %v435_v37, %v122_v38  ;;  %v223_v44 = vsel %vm41_vm0, %v455_v40, %v454_v39  ;;  %v456_v45 = vld [vmem:[%s878_s0 + $0xc] ss:$16 sm:%s225_s27]   ;;  %s203_s12 = smov 48  ;;  %s270_s17 = smov 3 }
  0x12   :  { %181 = vrot.lane.b32.xlu1 %v180_v35, %s503_s10  ;;  %128 = vrot.lane.b32.xlu2 %v127_v43, %s502_s26  ;;  %v450_v46 = vld [vmem:[%s878_s0 + $0x4] ss:$16 sm:%s195_s3]   ;;  %v158_v48 = vsel %vm51_vm2, %v442_v42, %v153_v41  ;;  %v228_v49 = vsel %vm46_vm1, %v456_v45, %v223_v44  ;;  %s134_s20 = smov 3  ;;  %s273_s21 = smov 12 }
  0x13   :  { %v451_v47 = vld [vmem:[%s878_s0 + $0x4] ss:$16 sm:%s198_s9]   ;;  %v457_v50 = vld [vmem:[%s878_s0 + $0xc] ss:$16 sm:%s230_s8]   ;;  %s208_s11 = smov 192  ;;  %s278_s29 = smov 48 }
  0x14   :  { %v452_v51 = vld [vmem:[%s878_s0 + $0x4] ss:$16 sm:%s203_s12]   ;;  %v201_v52 = vsel %vm41_vm0, %v451_v47, %v450_v46  ;;  %v465_v53 = vld [vmem:[%s878_s0 + $0xb] ss:$16 sm:%s270_s17]   ;;  %v233_v55 = vsel %vm51_vm2, %v457_v50, %v228_v49  ;;  %s248_s3 = smov 3  ;;  %s251_s4 = smov 12 }
  0x15   :  { %v466_v54 = vld [vmem:[%s878_s0 + $0xb] ss:$16 sm:%s273_s21]   ;;  %v437_v56 = vld [vmem:[%s878_s0 + $0x86] ss:$8 sm:%s134_s20]   ;;  %v206_v57 = vsel %vm46_vm1, %v452_v51, %v201_v52  ;;  %s283_s9 = smov 192  ;;  %s504_s12 = smov 64  }
  0x16   :  { %v453_v58 = vld [vmem:[%s878_s0 + $0x4] ss:$16 sm:%s208_s11]   ;;  %v276_v59 = vsel %vm41_vm0, %v466_v54, %v465_v53  ;;  %v467_v60 = vld [vmem:[%s878_s0 + $0xb] ss:$16 sm:%s278_s29]   ;;  %s323_s17 = smov 3  ;;  %s326_s18 = smov 12 }
  0x17   :  { %159 = vrot.lane.b32.xlu0 %v158_v48, %s503_s10  ;;  %v461_v61 = vld [vmem:[%s878_s0 + $0x3] ss:$16 sm:%s248_s3]   ;;  %v211_v63 = vsel %vm51_vm2, %v453_v58, %v206_v57  ;;  %v281_v0 = vsel %vm46_vm1, %v467_v60, %v276_v59  ;;  %s187_s21 = smov 3  ;;  %s261_s11 = smov 192 }
  0x18   :  { %v462_v62 = vld [vmem:[%s878_s0 + $0x3] ss:$16 sm:%s251_s4]   ;;  %v468_v1 = vld [vmem:[%s878_s0 + $0xb] ss:$16 sm:%s283_s9]   ;;  %s331_s29 = smov 48  ;;  %s301_s3 = smov 3 }
  0x19   :  { %v254_v3 = vsel %vm41_vm0, %v462_v62, %v461_v61  ;;  %v476_v4 = vld [vmem:[%s878_s0 + $0xa] ss:$16 sm:%s323_s17]   ;;  %v286_v6 = vsel %vm51_vm2, %v468_v1, %v281_v0  ;;  %v448_v7 = vld [vmem:[%s878_s0 + $0x85] ss:$8 sm:%s187_s21]   ;;  %s304_s4 = smov 12  ;;  %s336_s9 = smov 192 }
  0x1a   :  { %234 = vrot.lane.b32.xlu1 %v233_v55, %s504_s12  ;;  %136 = vrot.lane.b32.xlu2 %v437_v56, %s502_s26  ;;  %s256_s26 = smov 48  ;;  %v477_v5 = vld [vmem:[%s878_s0 + $0xa] ss:$16 sm:%s326_s18]   ;;  %s376_s17 = smov 3 }
  0x1b   :  { %v463_v2 = vld [vmem:[%s878_s0 + $0x3] ss:$16 sm:%s256_s26]   ;;  %v329_v10 = vsel %vm41_vm0, %v477_v5, %v476_v4  ;;  %v478_v11 = vld [vmem:[%s878_s0 + $0xa] ss:$16 sm:%s331_s29]   ;;  %s505_s26 = smov 48   ;;  %s379_s18 = smov 12 }
  0x1c   :  { %v259_v8 = vsel %vm46_vm1, %v463_v2, %v254_v3  ;;  %v464_v9 = vld [vmem:[%s878_s0 + $0x3] ss:$16 sm:%s261_s11]   ;;  %v472_v12 = vld [vmem:[%s878_s0 + $0x2] ss:$16 sm:%s301_s3]   ;;  %v334_v15 = vsel %vm46_vm1, %v478_v11, %v329_v10  ;;  %s240_s21 = smov 3  ;;  %s314_s11 = smov 192 }
  0x1d   :  { %v473_v13 = vld [vmem:[%s878_s0 + $0x2] ss:$16 sm:%s304_s4]   ;;  %v264_v14 = vsel %vm51_vm2, %v464_v9, %v259_v8  ;;  %v479_v16 = vld [vmem:[%s878_s0 + $0xa] ss:$16 sm:%s336_s9]   ;;  %s384_s29 = smov 48  ;;  %s354_s3 = smov 3 }
  0x1e   :  { %v307_v18 = vsel %vm41_vm0, %v473_v13, %v472_v12  ;;  %v487_v19 = vld [vmem:[%s878_s0 + $0x9] ss:$16 sm:%s376_s17]   ;;  %v339_v21 = vsel %vm51_vm2, %v479_v16, %v334_v15  ;;  %v459_v22 = vld [vmem:[%s878_s0 + $0x84] ss:$8 sm:%s240_s21]   ;;  %s357_s4 = smov 12  ;;  %s389_s9 = smov 192 }
  0x1f   :  { %212 = vrot.lane.b32.xlu0 %v211_v63, %s504_s12  ;;  %v488_v20 = vld [vmem:[%s878_s0 + $0x9] ss:$16 sm:%s379_s18]   ;;  %s362_s16 = smov 48  ;;  %s293_s19 = smov 3 }
  0x20   :  { %v475_v24 = vld [vmem:[%s878_s0 + $0x2] ss:$16 sm:%s314_s11]   ;;  %v382_v25 = vsel %vm41_vm0, %v488_v20, %v487_v19  ;;  %v489_v26 = vld [vmem:[%s878_s0 + $0x9] ss:$16 sm:%s384_s29]   ;;  %s367_s22 = smov 192  ;;  %s507_s27 = smov 16  }
  0x21   :  { %v483_v27 = vld [vmem:[%s878_s0 + $0x1] ss:$16 sm:%s354_s3]   ;;  %v387_v30 = vsel %vm46_vm1, %v489_v26, %v382_v25  ;;  %v490_v31 = vld [vmem:[%s878_s0 + $0x9] ss:$16 sm:%s389_s9]   ;;  %s399_s30 = smov 3  ;;  %s30_s21 = smov 3 }
  0x22   :  { %287 = vrot.lane.b32.xlu1 %v286_v6, %s505_s26  ;;  %189 = vrot.lane.b32.xlu2 %v448_v7, %s503_s10  ;;  %s309_s10 = smov 48  ;;  %v484_v28 = vld [vmem:[%s878_s0 + $0x1] ss:$16 sm:%s357_s4]   ;;  %v392_v34 = vsel %vm51_vm2, %v490_v31, %v387_v30 }
  0x23   :  { %v474_v17 = vld [vmem:[%s878_s0 + $0x2] ss:$16 sm:%s309_s10]   ;;  %s506_s10 = smov 32   ;;  %v360_v32 = vsel %vm41_vm0, %v484_v28, %v483_v27  ;;  %v485_v33 = vld [vmem:[%s878_s0 + $0x1] ss:$16 sm:%s362_s16]  }
  0x24   :  { %v312_v23 = vsel %vm46_vm1, %v474_v17, %v307_v18  ;;  %v470_v35 = vld [vmem:[%s878_s0 + $0x83] ss:$8 sm:%s293_s19]   ;;  %v365_v36 = vsel %vm46_vm1, %v485_v33, %v360_v32  ;;  %v486_v37 = vld [vmem:[%s878_s0 + $0x1] ss:$16 sm:%s367_s22]  }
  0x25   :  { %v317_v29 = vsel %vm51_vm2, %v475_v24, %v312_v23  ;;  %v370_v38 = vsel %vm51_vm2, %v486_v37, %v365_v36  ;;  %v492_v40 = vld [vmem:[%s878_s0 + $0x81] ss:$8 sm:%s399_s30]   ;;  %v2_v41 = vld [vmem:[%s878_s0] ss:$8 sm:$0xf]  }
  0x26   :  { %v3_v42 = vld [vmem:[%s878_s0] ss:$8 sm:$0xf0]  }
  0x27   :  { %265 = vrot.lane.b32.xlu0 %v264_v14, %s505_s26  ;;  %v5_v43 = vsel %vm4_vm3, %v3_v42, %v2_v41  ;;  %v409_v44 = vld [vmem:[%s878_s0 + $0x40] ss:$8 sm:$0xf]  }
  0x28   :  { %v410_v45 = vld [vmem:[%s878_s0 + $0x40] ss:$8 sm:$0xf0]   ;;  %7 = vst.msk [vmem:[%s879_s1] ss:$8 sm:$0x3] %vm6_vm4, %v5_v43  }
  0x29   :  { %406 = vst.msk [vmem:[%s879_s1 - $0xf] ss:$8 sm:$0xc] %vm6_vm4, %v5_v43   ;;  %v19_v46 = vsel %vm4_vm3, %v410_v45, %v409_v44  ;;  %v415_v47 = vld [vmem:[%s878_s0 + $0x80] ss:$8 sm:%s30_s21]  }
  0x2a   :  { %340 = vrot.lane.b32.xlu1 %v339_v21, %s506_s10  ;;  %242 = vrot.lane.b32.xlu2 %v459_v22, %s504_s12  ;;  %407 = vst.msk [vmem:[%s879_s1 - $0x1e] ss:$8 sm:$0x30] %vm6_vm4, %v5_v43  }
  0x2b   :  { %408 = vst.msk [vmem:[%s879_s1 - $0x2d] ss:$8 sm:$0xc0] %vm6_vm4, %v5_v43  }
  0x2c   :  { %411 = vst.msk [vmem:[%s879_s1 + $0x4] ss:$8 sm:$0x3] %vm6_vm4, %v19_v46  }
  0x2d   :  { %412 = vst.msk [vmem:[%s879_s1 - $0xb] ss:$8 sm:$0xc] %vm6_vm4, %v19_v46  }
  0x2e   :  { %413 = vst.msk [vmem:[%s879_s1 - $0x1a] ss:$8 sm:$0x30] %vm6_vm4, %v19_v46  }
  0x2f   :  { %318 = vrot.lane.b32.xlu0 %v317_v29, %s506_s10  ;;  %414 = vst.msk [vmem:[%s879_s1 - $0x29] ss:$8 sm:$0xc0] %vm6_vm4, %v19_v46  }
  0x30   :  { %416 = vst.msk [vmem:[%s879_s1 + $0x10] ss:$8 sm:$0x3] %vm6_vm4, %v415_v47  }
  0x32   :  { %393 = vrot.lane.b32.xlu1 %v392_v34, %s507_s27  ;;  %295 = vrot.lane.b32.xlu2 %v470_v35, %s505_s26  ;;  %s346_s26 = smov 3 }
  0x33   :  { %v481_v39 = vld [vmem:[%s878_s0 + $0x82] ss:$8 sm:%s346_s26]  }
  0x37   :  { %371 = vrot.lane.b32.xlu0 %v370_v38, %s507_s27 }
  0x3a   :  { %348 = vrot.lane.b32.xlu2 %v481_v39, %s506_s10 }
  0x42   :  { %401 = vrot.lane.b32.xlu2 %v492_v40, %s507_s27 }
  0x6c   :  { %v129_v48 = vpop.permute.xlu2 %128  }
  0x74   :  { %v84_v49 = vpop.permute.xlu1 %83   ;;  %v137_v50 = vpop.permute.xlu2 %136  }
  0x75   :  { %427 = vst.msk [vmem:[%s879_s1 + $0x10] ss:$8 sm:$0x3] %vm55_vm5, %v84_v49  }
  0x76   :  { %438 = vst.msk [vmem:[%s879_s1 + $0x10] ss:$8 sm:$0x3] %vm108_vm6, %v137_v50  }
  0x79   :  { %v54_v51 = vpop.permute.xlu0 %53  }
  0x7a   :  { %56 = vst.msk [vmem:[%s879_s1] sm:$0xff] %vm55_vm5, %v54_v51  }
  0x7c   :  { %v107_v52 = vpop.permute.xlu1 %106   ;;  %v190_v53 = vpop.permute.xlu2 %189  }
  0x7d   :  { %109 = vst.msk [vmem:[%s879_s1] sm:$0xff] %vm108_vm6, %v107_v52  }
  0x7e   :  { %449 = vst.msk [vmem:[%s879_s1 + $0x10] ss:$8 sm:$0x3] %vm161_vm7, %v190_v53  }
  0x81   :  { %v76_v54 = vpop.permute.xlu0 %75  }
  0x82   :  { %425 = vst.msk [vmem:[%s879_s1 + $0x8] sm:$0xff] %vm55_vm5, %v76_v54  }
  0x83   :  { %436 = vst.msk [vmem:[%s879_s1 + $0x8] sm:$0xff] %vm108_vm6, %v129_v48  }
  0x84   :  { %v182_v55 = vpop.permute.xlu1 %181   ;;  %v243_v56 = vpop.permute.xlu2 %242  }
  0x85   :  { %447 = vst.msk [vmem:[%s879_s1 + $0x8] sm:$0xff] %vm161_vm7, %v182_v55  }
  0x86   :  { %460 = vst.msk [vmem:[%s879_s1 + $0x10] ss:$8 sm:$0x3] %vm214_vm8, %v243_v56  }
  0x89   :  { %v160_v57 = vpop.permute.xlu0 %159  }
  0x8a   :  { %162 = vst.msk [vmem:[%s879_s1] sm:$0xff] %vm161_vm7, %v160_v57  }
  0x8c   :  { %v235_v58 = vpop.permute.xlu1 %234   ;;  %v296_v59 = vpop.permute.xlu2 %295  }
  0x8d   :  { %458 = vst.msk [vmem:[%s879_s1 + $0x8] sm:$0xff] %vm214_vm8, %v235_v58  }
  0x8e   :  { %471 = vst.msk [vmem:[%s879_s1 + $0x10] ss:$8 sm:$0x3] %vm267_vm9, %v296_v59  }
  0x91   :  { %v213_v60 = vpop.permute.xlu0 %212  }
  0x92   :  { %215 = vst.msk [vmem:[%s879_s1] sm:$0xff] %vm214_vm8, %v213_v60  }
  0x94   :  { %v288_v61 = vpop.permute.xlu1 %287   ;;  %v349_v62 = vpop.permute.xlu2 %348  }
  0x95   :  { %469 = vst.msk [vmem:[%s879_s1 + $0x8] sm:$0xff] %vm267_vm9, %v288_v61  }
  0x96   :  { %482 = vst.msk [vmem:[%s879_s1 + $0x10] ss:$8 sm:$0x3] %vm320_vm10, %v349_v62  }
  0x99   :  { %v266_v63 = vpop.permute.xlu0 %265  }
  0x9a   :  { %268 = vst.msk [vmem:[%s879_s1] sm:$0xff] %vm267_vm9, %v266_v63  }
  0x9c   :  { %v341_v0 = vpop.permute.xlu1 %340   ;;  %v402_v1 = vpop.permute.xlu2 %401  }
  0x9d   :  { %480 = vst.msk [vmem:[%s879_s1 + $0x8] sm:$0xff] %vm320_vm10, %v341_v0  }
  0x9e   :  { %493 = vst.msk [vmem:[%s879_s1 + $0x10] ss:$8 sm:$0x3] %vm373_vm11, %v402_v1  }
  0xa1   :  { %v319_v2 = vpop.permute.xlu0 %318  }
  0xa2   :  { %321 = vst.msk [vmem:[%s879_s1] sm:$0xff] %vm320_vm10, %v319_v2  }
  0xa4   :  { %v394_v3 = vpop.permute.xlu1 %393  }
  0xa5   :  { %491 = vst.msk [vmem:[%s879_s1 + $0x8] sm:$0xff] %vm373_vm11, %v394_v3  }
  0xa9   :  { %v372_v4 = vpop.permute.xlu0 %371  }
  0xaa   :  { %374 = vst.msk [vmem:[%s879_s1] sm:$0xff] %vm373_vm11, %v372_v4  }

// kernel: tile.49
= control target key start
LH: loop header
LB: loop body
LE: loop exit
PB: predicated region body
PF: predicated region fallthrough
CT: control target
= control target key end

     0   :  { %s60_s6 = smov 3  ;;  %s63_s7 = smov 12  ;;  %vm65_vm0 = vcmask 1043458   ;;  %vm70_vm1 = vcmask 1045508   ;;  %vm75_vm2 = vcmask 1047558   ;;  %vm4_vm3 = vcmask 1047556   ;;  %s1502_s0 = inlined_call_operand.vmem [shape: f32[16,16,16], index: 0, kind: input, shape index: {}]   ;;  %s1503_s1 = inlined_call_operand.vmem [shape: f32[16,256], index: 1, kind: output, shape index: {}]  }
   0x1   :  { %v717_v0 = vld [vmem:[%s1502_s0 + $0x7] ss:$16 sm:%s60_s6]   ;;  %s68_s12 = smov 48  ;;  %s73_s13 = smov 192  ;;  %vm6_vm4 = vcmask 130048   ;;  %vm79_vm5 = vcmask 1048448  }
   0x2   :  { %v718_v1 = vld [vmem:[%s1502_s0 + $0x7] ss:$16 sm:%s63_s7]   ;;  %s105_s18 = smov 3  ;;  %s108_s21 = smov 12  ;;  %vm170_vm6 = vcmask 917248   ;;  %vm261_vm7 = vcmask 786048  }
   0x3   :  { %v66_v2 = vsel %vm65_vm0, %v718_v1, %v717_v0  ;;  %v719_v3 = vld [vmem:[%s1502_s0 + $0x7] ss:$16 sm:%s68_s12]   ;;  %s113_s22 = smov 48  ;;  %s118_s27 = smov 192  ;;  %vm352_vm8 = vcmask 654848   ;;  %vm443_vm9 = vcmask 523648  }
   0x4   :  { %v720_v4 = vld [vmem:[%s1502_s0 + $0x7] ss:$16 sm:%s73_s13]   ;;  %v71_v5 = vsel %vm70_vm1, %v719_v3, %v66_v2  ;;  %s82_s28 = smov 3  ;;  %s857_s29 = smov 112   ;;  %vm534_vm10 = vcmask 392448   ;;  %vm625_vm11 = vcmask 261248  }
   0x5   :  { %v726_v6 = vld [vmem:[%s1502_s0 + $0x87] ss:$16 sm:%s105_s18]   ;;  %v76_v7 = vsel %vm75_vm2, %v720_v4, %v71_v5  ;;  %s85_s3 = smov 12  ;;  %s90_s4 = smov 48  ;;  %v721_v13 = vld [vmem:[%s1502_s0 + $0xf] ss:$16 sm:%s82_s28]  }
   0x6   :  { %v727_v8 = vld [vmem:[%s1502_s0 + $0x87] ss:$16 sm:%s108_s21]   ;;  %77 = vrot.lane.b32.xlu0 %v76_v7, %s857_s29  ;;  %s95_s9 = smov 192  ;;  %s128_s10 = smov 3 }
   0x7   :  { %v728_v9 = vld [vmem:[%s1502_s0 + $0x87] ss:$16 sm:%s113_s22]   ;;  %v111_v10 = vsel %vm65_vm0, %v727_v8, %v726_v6  ;;  %v722_v14 = vld [vmem:[%s1502_s0 + $0xf] ss:$16 sm:%s85_s3]   ;;  %s131_s15 = smov 12  ;;  %s136_s16 = smov 48 }
   0x8   :  { %v729_v11 = vld [vmem:[%s1502_s0 + $0x87] ss:$16 sm:%s118_s27]   ;;  %v116_v12 = vsel %vm70_vm1, %v728_v9, %v111_v10  ;;  %v88_v16 = vsel %vm65_vm0, %v722_v14, %v721_v13  ;;  %v723_v17 = vld [vmem:[%s1502_s0 + $0xf] ss:$16 sm:%s90_s4]   ;;  %s141_s19 = smov 192  ;;  %s196_s24 = smov 3 }
   0x9   :  { %v121_v15 = vsel %vm75_vm2, %v729_v11, %v116_v12  ;;  %v724_v18 = vld [vmem:[%s1502_s0 + $0xf] ss:$16 sm:%s95_s9]   ;;  %v93_v19 = vsel %vm70_vm1, %v723_v17, %v88_v16  ;;  %s199_s25 = smov 12  ;;  %v745_v26 = vld [vmem:[%s1502_s0 + $0x86] ss:$16 sm:%s196_s24]   ;;  %s204_s2 = smov 48 }
   0xa   :  { %122 = vrot.lane.b32.xlu1 %v121_v15, %s857_s29  ;;  %v731_v20 = vld [vmem:[%s1502_s0 + $0x8f] ss:$16 sm:%s128_s10]   ;;  %v98_v23 = vsel %vm75_vm2, %v724_v18, %v93_v19  ;;  %s219_s5 = smov 3  ;;  %s222_s6 = smov 12 }
   0xb   :  { %v732_v21 = vld [vmem:[%s1502_s0 + $0x8f] ss:$16 sm:%s131_s15]   ;;  %v746_v28 = vld [vmem:[%s1502_s0 + $0x86] ss:$16 sm:%s199_s25]   ;;  %s209_s9 = smov 192  ;;  %s227_s12 = smov 48 }
   0xc   :  { %v733_v22 = vld [vmem:[%s1502_s0 + $0x8f] ss:$16 sm:%s136_s16]   ;;  %v134_v24 = vsel %vm65_vm0, %v732_v21, %v731_v20  ;;  %v202_v29 = vsel %vm65_vm0, %v746_v28, %v745_v26  ;;  %v747_v30 = vld [vmem:[%s1502_s0 + $0x86] ss:$16 sm:%s204_s2]   ;;  %s232_s15 = smov 192  ;;  %s264_s16 = smov 3 }
   0xd   :  { %v734_v25 = vld [vmem:[%s1502_s0 + $0x8f] ss:$16 sm:%s141_s19]   ;;  %v139_v27 = vsel %vm70_vm1, %v733_v22, %v134_v24  ;;  %v750_v31 = vld [vmem:[%s1502_s0 + $0x8e] ss:$16 sm:%s219_s5]   ;;  %s267_s17 = smov 12  ;;  %v207_v34 = vsel %vm70_vm1, %v747_v30, %v202_v29  ;;  %s272_s22 = smov 48 }
   0xe   :  { %99 = vrot.lane.b32.xlu0 %v98_v23, %s857_s29  ;;  %v144_v32 = vsel %vm75_vm2, %v734_v25, %v139_v27  ;;  %v751_v33 = vld [vmem:[%s1502_s0 + $0x8e] ss:$16 sm:%s222_s6]   ;;  %s151_s23 = smov 3  ;;  %s154_s27 = smov 12 }
   0xf   :  { %v748_v35 = vld [vmem:[%s1502_s0 + $0x86] ss:$16 sm:%s209_s9]   ;;  %v225_v36 = vsel %vm65_vm0, %v751_v33, %v750_v31  ;;  %v752_v37 = vld [vmem:[%s1502_s0 + $0x8e] ss:$16 sm:%s227_s12]   ;;  %s159_s28 = smov 48  ;;  %s164_s5 = smov 192 }
  0x10   :  { %v753_v38 = vld [vmem:[%s1502_s0 + $0x8e] ss:$16 sm:%s232_s15]   ;;  %v759_v39 = vld [vmem:[%s1502_s0 + $0xd] ss:$16 sm:%s264_s16]   ;;  %s287_s6 = smov 3  ;;  %v212_v42 = vsel %vm75_vm2, %v748_v35, %v207_v34  ;;  %v230_v43 = vsel %vm70_vm1, %v752_v37, %v225_v36  ;;  %s290_s11 = smov 12 }
  0x11   :  { %v760_v40 = vld [vmem:[%s1502_s0 + $0xd] ss:$16 sm:%s267_s17]   ;;  %v736_v41 = vld [vmem:[%s1502_s0 + $0x6] ss:$16 sm:%s151_s23]   ;;  %s277_s14 = smov 192  ;;  %s295_s21 = smov 48  ;;  %v235_v53 = vsel %vm75_vm2, %v753_v38, %v230_v43 }
  0x12   :  { %145 = vrot.lane.b32.xlu1 %v144_v32, %s857_s29  ;;  %v737_v44 = vld [vmem:[%s1502_s0 + $0x6] ss:$16 sm:%s154_s27]   ;;  %v270_v49 = vsel %vm65_vm0, %v760_v40, %v759_v39  ;;  %s858_s23 = smov 96   ;;  %s300_s29 = smov 192 }
  0x13   :  { %v738_v45 = vld [vmem:[%s1502_s0 + $0x6] ss:$16 sm:%s159_s28]   ;;  %v761_v46 = vld [vmem:[%s1502_s0 + $0xd] ss:$16 sm:%s272_s22]   ;;  %v157_v47 = vsel %vm65_vm0, %v737_v44, %v736_v41  ;;  %s333_s22 = smov 3  ;;  %s336_s24 = smov 12 }
  0x14   :  { %v739_v48 = vld [vmem:[%s1502_s0 + $0x6] ss:$16 sm:%s164_s5]   ;;  %v162_v50 = vsel %vm70_vm1, %v738_v45, %v157_v47  ;;  %v764_v51 = vld [vmem:[%s1502_s0 + $0x85] ss:$16 sm:%s287_s6]   ;;  %s173_s27 = smov 3  ;;  %s176_s28 = smov 12  ;;  %v275_v56 = vsel %vm70_vm1, %v761_v46, %v270_v49 }
  0x15   :  { %v765_v52 = vld [vmem:[%s1502_s0 + $0x85] ss:$16 sm:%s290_s11]   ;;  %v167_v54 = vsel %vm75_vm2, %v739_v48, %v162_v50  ;;  %v762_v55 = vld [vmem:[%s1502_s0 + $0xd] ss:$16 sm:%s277_s14]   ;;  %s181_s5 = smov 48  ;;  %s186_s6 = smov 192 }
  0x16   :  { %213 = vrot.lane.b32.xlu0 %v212_v42, %s858_s23  ;;  %168 = vrot.lane.b32.xlu2 %v167_v54, %s858_s23  ;;  %v293_v57 = vsel %vm65_vm0, %v765_v52, %v764_v51  ;;  %v766_v58 = vld [vmem:[%s1502_s0 + $0x85] ss:$16 sm:%s295_s21]   ;;  %s341_s11 = smov 48  ;;  %s355_s16 = smov 3  ;;  %v280_v0 = vsel %vm75_vm2, %v762_v55, %v275_v56 }
  0x17   :  { %v774_v59 = vld [vmem:[%s1502_s0 + $0x4] ss:$16 sm:%s333_s22]   ;;  %v767_v60 = vld [vmem:[%s1502_s0 + $0x85] ss:$16 sm:%s300_s29]   ;;  %s358_s17 = smov 12  ;;  %v298_v1 = vsel %vm70_vm1, %v766_v58, %v293_v57  ;;  %s346_s18 = smov 192 }
  0x18   :  { %v775_v61 = vld [vmem:[%s1502_s0 + $0x4] ss:$16 sm:%s336_s24]   ;;  %v740_v62 = vld [vmem:[%s1502_s0 + $0xe] ss:$16 sm:%s173_s27]   ;;  %s363_s25 = smov 48  ;;  %s401_s2 = smov 3  ;;  %v303_v11 = vsel %vm75_vm2, %v767_v60, %v298_v1 }
  0x19   :  { %v741_v63 = vld [vmem:[%s1502_s0 + $0xe] ss:$16 sm:%s176_s28]   ;;  %v776_v5 = vld [vmem:[%s1502_s0 + $0x4] ss:$16 sm:%s341_s11]   ;;  %v339_v7 = vsel %vm65_vm0, %v775_v61, %v774_v59  ;;  %s404_s3 = smov 12  ;;  %s859_s4 = smov 80  }
  0x1a   :  { %236 = vrot.lane.b32.xlu1 %v235_v53, %s858_s23  ;;  %v179_v2 = vsel %vm65_vm0, %v741_v63, %v740_v62  ;;  %v742_v3 = vld [vmem:[%s1502_s0 + $0xe] ss:$16 sm:%s181_s5]   ;;  %s242_s7 = smov 3  ;;  %s245_s9 = smov 12  ;;  %v344_v14 = vsel %vm70_vm1, %v776_v5, %v339_v7 }
  0x1b   :  { %v743_v4 = vld [vmem:[%s1502_s0 + $0xe] ss:$16 sm:%s186_s6]   ;;  %v184_v6 = vsel %vm70_vm1, %v742_v3, %v179_v2  ;;  %v778_v9 = vld [vmem:[%s1502_s0 + $0xc] ss:$16 sm:%s355_s16]   ;;  %s250_s10 = smov 48  ;;  %s368_s11 = smov 192 }
  0x1c   :  { %v189_v8 = vsel %vm75_vm2, %v743_v4, %v184_v6  ;;  %v779_v10 = vld [vmem:[%s1502_s0 + $0xc] ss:$16 sm:%s358_s17]   ;;  %v777_v12 = vld [vmem:[%s1502_s0 + $0x4] ss:$16 sm:%s346_s18]   ;;  %s255_s16 = smov 192  ;;  %s409_s17 = smov 48 }
  0x1d   :  { %v780_v13 = vld [vmem:[%s1502_s0 + $0xc] ss:$16 sm:%s363_s25]   ;;  %v361_v15 = vsel %vm65_vm0, %v779_v10, %v778_v9  ;;  %v755_v18 = vld [vmem:[%s1502_s0 + $0x5] ss:$16 sm:%s242_s7]   ;;  %s424_s24 = smov 3  ;;  %s427_s25 = smov 12  ;;  %v349_v21 = vsel %vm75_vm2, %v777_v12, %v344_v14 }
  0x1e   :  { %281 = vrot.lane.b32.xlu0 %v280_v0, %s859_s4  ;;  %190 = vrot.lane.b32.xlu2 %v189_v8, %s858_s23  ;;  %v788_v16 = vld [vmem:[%s1502_s0 + $0x8c] ss:$16 sm:%s401_s2]   ;;  %v366_v22 = vsel %vm70_vm1, %v780_v13, %v361_v15  ;;  %s414_s28 = smov 192  ;;  %s432_s6 = smov 48 }
  0x1f   :  { %v789_v17 = vld [vmem:[%s1502_s0 + $0x8c] ss:$16 sm:%s404_s3]   ;;  %v756_v19 = vld [vmem:[%s1502_s0 + $0x5] ss:$16 sm:%s245_s9]   ;;  %s469_s7 = smov 3  ;;  %s310_s12 = smov 3 }
  0x20   :  { %v757_v20 = vld [vmem:[%s1502_s0 + $0x5] ss:$16 sm:%s250_s10]   ;;  %v781_v23 = vld [vmem:[%s1502_s0 + $0xc] ss:$16 sm:%s368_s11]   ;;  %v248_v24 = vsel %vm65_vm0, %v756_v19, %v755_v18  ;;  %v407_v28 = vsel %vm65_vm0, %v789_v17, %v788_v16  ;;  %s472_s11 = smov 12  ;;  %s860_s13 = smov 64  }
  0x21   :  { %v758_v25 = vld [vmem:[%s1502_s0 + $0x5] ss:$16 sm:%s255_s16]   ;;  %v790_v26 = vld [vmem:[%s1502_s0 + $0x8c] ss:$16 sm:%s409_s17]   ;;  %v253_v27 = vsel %vm70_vm1, %v757_v20, %v248_v24  ;;  %v371_v32 = vsel %vm75_vm2, %v781_v23, %v366_v22  ;;  %s313_s16 = smov 12  ;;  %s318_s19 = smov 48 }
  0x22   :  { %304 = vrot.lane.b32.xlu1 %v303_v11, %s859_s4  ;;  %v258_v29 = vsel %vm75_vm2, %v758_v25, %v253_v27  ;;  %v793_v30 = vld [vmem:[%s1502_s0 + $0x3] ss:$16 sm:%s424_s24]   ;;  %s323_s20 = smov 192  ;;  %v412_v35 = vsel %vm70_vm1, %v790_v26, %v407_v28  ;;  %s437_s21 = smov 192 }
  0x23   :  { %v794_v31 = vld [vmem:[%s1502_s0 + $0x3] ss:$16 sm:%s427_s25]   ;;  %v791_v33 = vld [vmem:[%s1502_s0 + $0x8c] ss:$16 sm:%s414_s28]   ;;  %s477_s28 = smov 48  ;;  %s492_s23 = smov 3 }
  0x24   :  { %v795_v34 = vld [vmem:[%s1502_s0 + $0x3] ss:$16 sm:%s432_s6]   ;;  %v430_v36 = vsel %vm65_vm0, %v794_v31, %v793_v30  ;;  %v769_v39 = vld [vmem:[%s1502_s0 + $0x8d] ss:$16 sm:%s310_s12]   ;;  %s495_s8 = smov 12  ;;  %v417_v44 = vsel %vm75_vm2, %v791_v33, %v412_v35  ;;  %s500_s15 = smov 48 }
  0x25   :  { %v802_v37 = vld [vmem:[%s1502_s0 + $0x83] ss:$16 sm:%s469_s7]   ;;  %v770_v40 = vld [vmem:[%s1502_s0 + $0x8d] ss:$16 sm:%s313_s16]   ;;  %v435_v45 = vsel %vm70_vm1, %v795_v34, %v430_v36  ;;  %s537_s16 = smov 3  ;;  %s381_s22 = smov 12 }
  0x26   :  { %350 = vrot.lane.b32.xlu0 %v349_v21, %s860_s13  ;;  %259 = vrot.lane.b32.xlu2 %v258_v29, %s859_s4  ;;  %v803_v38 = vld [vmem:[%s1502_s0 + $0x83] ss:$16 sm:%s472_s11]   ;;  %v316_v41 = vsel %vm65_vm0, %v770_v40, %v769_v39  ;;  %s482_s11 = smov 192  ;;  %s386_s25 = smov 48 }
  0x27   :  { %v771_v42 = vld [vmem:[%s1502_s0 + $0x8d] ss:$16 sm:%s318_s19]   ;;  %v796_v46 = vld [vmem:[%s1502_s0 + $0x3] ss:$16 sm:%s437_s21]   ;;  %v475_v50 = vsel %vm65_vm0, %v803_v38, %v802_v37  ;;  %s378_s21 = smov 3  ;;  %s540_s27 = smov 12 }
  0x28   :  { %v772_v43 = vld [vmem:[%s1502_s0 + $0x8d] ss:$16 sm:%s323_s20]   ;;  %v321_v47 = vsel %vm70_vm1, %v771_v42, %v316_v41  ;;  %v804_v48 = vld [vmem:[%s1502_s0 + $0x83] ss:$16 sm:%s477_s28]   ;;  %v440_v53 = vsel %vm75_vm2, %v796_v46, %v435_v45  ;;  %s391_s28 = smov 192  ;;  %s505_s30 = smov 192 }
  0x29   :  { %v326_v49 = vsel %vm75_vm2, %v772_v43, %v321_v47  ;;  %v807_v51 = vld [vmem:[%s1502_s0 + $0x8b] ss:$16 sm:%s492_s23]   ;;  %v805_v54 = vld [vmem:[%s1502_s0 + $0x83] ss:$16 sm:%s482_s11]   ;;  %v480_v56 = vsel %vm70_vm1, %v804_v48, %v475_v50  ;;  %s545_s9 = smov 48  ;;  %s560_s17 = smov 3 }
  0x2a   :  { %372 = vrot.lane.b32.xlu1 %v371_v32, %s860_s13  ;;  %v808_v52 = vld [vmem:[%s1502_s0 + $0x8b] ss:$16 sm:%s495_s8]   ;;  %s861_s8 = smov 48   ;;  %s563_s18 = smov 12  ;;  %v485_v2 = vsel %vm75_vm2, %v805_v54, %v480_v56 }
  0x2b   :  { %v809_v55 = vld [vmem:[%s1502_s0 + $0x8b] ss:$16 sm:%s500_s15]   ;;  %v498_v57 = vsel %vm65_vm0, %v808_v52, %v807_v51  ;;  %v816_v58 = vld [vmem:[%s1502_s0 + $0xa] ss:$16 sm:%s537_s16]   ;;  %s454_s2 = smov 48  ;;  %s459_s23 = smov 192 }
  0x2c   :  { %v783_v59 = vld [vmem:[%s1502_s0 + $0x84] ss:$16 sm:%s378_s21]   ;;  %v817_v63 = vld [vmem:[%s1502_s0 + $0xa] ss:$16 sm:%s540_s27]   ;;  %v503_v3 = vsel %vm70_vm1, %v809_v55, %v498_v57  ;;  %s550_s21 = smov 192  ;;  %s573_s12 = smov 192 }
  0x2d   :  { %v784_v60 = vld [vmem:[%s1502_s0 + $0x84] ss:$16 sm:%s381_s22]   ;;  %v810_v4 = vld [vmem:[%s1502_s0 + $0x8b] ss:$16 sm:%s505_s30]   ;;  %s568_s22 = smov 48  ;;  %v543_v7 = vsel %vm65_vm0, %v817_v63, %v816_v58  ;;  %s449_s30 = smov 12 }
  0x2e   :  { %418 = vrot.lane.b32.xlu0 %v417_v44, %s860_s13  ;;  %327 = vrot.lane.b32.xlu2 %v326_v49, %s859_s4  ;;  %v384_v61 = vsel %vm65_vm0, %v784_v60, %v783_v59  ;;  %v785_v62 = vld [vmem:[%s1502_s0 + $0x84] ss:$16 sm:%s386_s25]   ;;  %s446_s25 = smov 3  ;;  %v508_v10 = vsel %vm75_vm2, %v810_v4, %v503_v3  ;;  %s631_s4 = smov 12 }
  0x2f   :  { %v389_v0 = vsel %vm70_vm1, %v785_v62, %v384_v61  ;;  %v786_v1 = vld [vmem:[%s1502_s0 + $0x84] ss:$16 sm:%s391_s28]   ;;  %v818_v5 = vld [vmem:[%s1502_s0 + $0xa] ss:$16 sm:%s545_s9]   ;;  %s609_s9 = smov 12  ;;  %s619_s28 = smov 192 }
  0x30   :  { %v394_v6 = vsel %vm75_vm2, %v786_v1, %v389_v0  ;;  %v821_v8 = vld [vmem:[%s1502_s0 + $0x82] ss:$16 sm:%s560_s17]   ;;  %v819_v11 = vld [vmem:[%s1502_s0 + $0xa] ss:$16 sm:%s550_s21]   ;;  %v548_v14 = vsel %vm70_vm1, %v818_v5, %v543_v7  ;;  %s518_s5 = smov 12  ;;  %s523_s10 = smov 48 }
  0x31   :  { %v822_v9 = vld [vmem:[%s1502_s0 + $0x82] ss:$16 sm:%s563_s18]   ;;  %v797_v13 = vld [vmem:[%s1502_s0 + $0xb] ss:$16 sm:%s446_s25]   ;;  %s614_s18 = smov 48  ;;  %s628_s25 = smov 3  ;;  %v553_v23 = vsel %vm75_vm2, %v819_v11, %v548_v14 }
  0x32   :  { %441 = vrot.lane.b32.xlu1 %v440_v53, %s861_s8  ;;  %v823_v12 = vld [vmem:[%s1502_s0 + $0x82] ss:$16 sm:%s568_s22]   ;;  %v566_v15 = vsel %vm65_vm0, %v822_v9, %v821_v8  ;;  %s862_s11 = smov 32   ;;  %s641_s15 = smov 192 }
  0x33   :  { %v798_v16 = vld [vmem:[%s1502_s0 + $0xb] ss:$16 sm:%s449_s30]   ;;  %v832_v21 = vld [vmem:[%s1502_s0 + $0x1] ss:$16 sm:%s609_s9]   ;;  %v571_v24 = vsel %vm70_vm1, %v823_v12, %v566_v15  ;;  %s515_s30 = smov 3  ;;  %s636_s9 = smov 48 }
  0x34   :  { %v799_v17 = vld [vmem:[%s1502_s0 + $0xb] ss:$16 sm:%s454_s2]   ;;  %v452_v18 = vsel %vm65_vm0, %v798_v16, %v797_v13  ;;  %v824_v25 = vld [vmem:[%s1502_s0 + $0x82] ss:$16 sm:%s573_s12]   ;;  %s677_s19 = smov 12  ;;  %s586_s26 = smov 12 }
  0x35   :  { %v800_v19 = vld [vmem:[%s1502_s0 + $0xb] ss:$16 sm:%s459_s23]   ;;  %v457_v22 = vsel %vm70_vm1, %v799_v17, %v452_v18  ;;  %v833_v26 = vld [vmem:[%s1502_s0 + $0x1] ss:$16 sm:%s614_s18]   ;;  %v576_v31 = vsel %vm75_vm2, %v824_v25, %v571_v24  ;;  %s528_s18 = smov 192  ;;  %s682_s23 = smov 48 }
  0x36   :  { %486 = vrot.lane.b32.xlu0 %v485_v2, %s861_s8  ;;  %395 = vrot.lane.b32.xlu2 %v394_v6, %s860_s13  ;;  %s606_s13 = smov 3  ;;  %v462_v27 = vsel %vm75_vm2, %v800_v19, %v457_v22  ;;  %v835_v29 = vld [vmem:[%s1502_s0 + $0x9] ss:$16 sm:%s628_s25]   ;;  %s591_s14 = smov 48 }
  0x37   :  { %v831_v20 = vld [vmem:[%s1502_s0 + $0x1] ss:$16 sm:%s606_s13]   ;;  %v836_v30 = vld [vmem:[%s1502_s0 + $0x9] ss:$16 sm:%s631_s4]   ;;  %s583_s4 = smov 3  ;;  %s687_s17 = smov 192 }
  0x38   :  { %v612_v28 = vsel %vm65_vm0, %v832_v21, %v831_v20  ;;  %v834_v32 = vld [vmem:[%s1502_s0 + $0x1] ss:$16 sm:%s619_s28]   ;;  %v812_v33 = vld [vmem:[%s1502_s0 + $0x2] ss:$16 sm:%s515_s30]   ;;  %v634_v36 = vsel %vm65_vm0, %v836_v30, %v835_v29  ;;  %s596_s20 = smov 192  ;;  %s651_s29 = smov 3 }
  0x39   :  { %v813_v34 = vld [vmem:[%s1502_s0 + $0x2] ss:$16 sm:%s518_s5]   ;;  %v617_v35 = vsel %vm70_vm1, %v833_v26, %v612_v28  ;;  %v837_v37 = vld [vmem:[%s1502_s0 + $0x9] ss:$16 sm:%s636_s9]   ;;  %s654_s24 = smov 12  ;;  %s659_s2 = smov 48 }
  0x3a   :  { %509 = vrot.lane.b32.xlu1 %v508_v10, %s861_s8  ;;  %v521_v38 = vsel %vm65_vm0, %v813_v34, %v812_v33  ;;  %v814_v39 = vld [vmem:[%s1502_s0 + $0x2] ss:$16 sm:%s523_s10]   ;;  %v622_v45 = vsel %vm75_vm2, %v834_v32, %v617_v35  ;;  %v639_v46 = vsel %vm70_vm1, %v837_v37, %v634_v36  ;;  %s664_s6 = smov 192  ;;  %v2_v4 = vld [vmem:[%s1502_s0] ss:$8 sm:$0xf]  }
  0x3b   :  { %v838_v40 = vld [vmem:[%s1502_s0 + $0x9] ss:$16 sm:%s641_s15]   ;;  %v526_v41 = vsel %vm70_vm1, %v814_v39, %v521_v38  ;;  %v815_v42 = vld [vmem:[%s1502_s0 + $0x2] ss:$16 sm:%s528_s18]   ;;  %s863_s18 = smov 16  }
  0x3c   :  { %v846_v44 = vld [vmem:[%s1502_s0 + $0x89] ss:$16 sm:%s677_s19]   ;;  %v826_v47 = vld [vmem:[%s1502_s0 + $0x8a] ss:$16 sm:%s583_s4]   ;;  %v531_v49 = vsel %vm75_vm2, %v815_v42, %v526_v41  ;;  %v644_v52 = vsel %vm75_vm2, %v838_v40, %v639_v46 }
  0x3d   :  { %v827_v48 = vld [vmem:[%s1502_s0 + $0x8a] ss:$16 sm:%s586_s26]   ;;  %v847_v51 = vld [vmem:[%s1502_s0 + $0x89] ss:$16 sm:%s682_s23]  }
  0x3e   :  { %554 = vrot.lane.b32.xlu0 %v553_v23, %s862_s11  ;;  %463 = vrot.lane.b32.xlu2 %v462_v27, %s861_s8  ;;  %s674_s8 = smov 3  ;;  %v589_v53 = vsel %vm65_vm0, %v827_v48, %v826_v47  ;;  %v828_v54 = vld [vmem:[%s1502_s0 + $0x8a] ss:$16 sm:%s591_s14]  }
  0x3f   :  { %v845_v43 = vld [vmem:[%s1502_s0 + $0x89] ss:$16 sm:%s674_s8]   ;;  %v594_v57 = vsel %vm70_vm1, %v828_v54, %v589_v53  ;;  %v829_v58 = vld [vmem:[%s1502_s0 + $0x8a] ss:$16 sm:%s596_s20]  }
  0x40   :  { %v680_v50 = vsel %vm65_vm0, %v846_v44, %v845_v43  ;;  %v848_v56 = vld [vmem:[%s1502_s0 + $0x89] ss:$16 sm:%s687_s17]   ;;  %v840_v60 = vld [vmem:[%s1502_s0 + $0x81] ss:$16 sm:%s651_s29]   ;;  %v599_v62 = vsel %vm75_vm2, %v829_v58, %v594_v57 }
  0x41   :  { %v685_v55 = vsel %vm70_vm1, %v847_v51, %v680_v50  ;;  %v841_v61 = vld [vmem:[%s1502_s0 + $0x81] ss:$16 sm:%s654_s24]   ;;  %v3_v5 = vld [vmem:[%s1502_s0] ss:$8 sm:$0xf0]  }
  0x42   :  { %577 = vrot.lane.b32.xlu1 %v576_v31, %s862_s11  ;;  %v690_v59 = vsel %vm75_vm2, %v848_v56, %v685_v55  ;;  %v657_v63 = vsel %vm65_vm0, %v841_v61, %v840_v60  ;;  %v842_v0 = vld [vmem:[%s1502_s0 + $0x81] ss:$16 sm:%s659_s2]   ;;  %v5_v6 = vsel %vm4_vm3, %v3_v5, %v2_v4  ;;  %v699_v7 = vld [vmem:[%s1502_s0 + $0x40] ss:$8 sm:$0xf]  }
  0x43   :  { %v662_v1 = vsel %vm70_vm1, %v842_v0, %v657_v63  ;;  %v843_v2 = vld [vmem:[%s1502_s0 + $0x81] ss:$16 sm:%s664_s6]   ;;  %7 = vst.msk [vmem:[%s1503_s1] ss:$8 sm:$0x3] %vm6_vm4, %v5_v6  }
  0x44   :  { %v667_v3 = vsel %vm75_vm2, %v843_v2, %v662_v1  ;;  %v700_v8 = vld [vmem:[%s1502_s0 + $0x40] ss:$8 sm:$0xf0]   ;;  %696 = vst.msk [vmem:[%s1503_s1 - $0xf] ss:$8 sm:$0xc] %vm6_vm4, %v5_v6  }
  0x45   :  { %v19_v9 = vsel %vm4_vm3, %v700_v8, %v699_v7  ;;  %697 = vst.msk [vmem:[%s1503_s1 - $0x1e] ss:$8 sm:$0x30] %vm6_vm4, %v5_v6   ;;  %v705_v10 = vld [vmem:[%s1502_s0 + $0x80] ss:$8 sm:$0xf]  }
  0x46   :  { %623 = vrot.lane.b32.xlu0 %v622_v45, %s863_s18  ;;  %532 = vrot.lane.b32.xlu2 %v531_v49, %s862_s11  ;;  %698 = vst.msk [vmem:[%s1503_s1 - $0x2d] ss:$8 sm:$0xc0] %vm6_vm4, %v5_v6   ;;  %v706_v11 = vld [vmem:[%s1502_s0 + $0x80] ss:$8 sm:$0xf0]  }
  0x47   :  { %701 = vst.msk [vmem:[%s1503_s1 + $0x4] ss:$8 sm:$0x3] %vm6_vm4, %v19_v9   ;;  %v34_v12 = vsel %vm4_vm3, %v706_v11, %v705_v10  ;;  %v711_v13 = vld [vmem:[%s1502_s0 + $0xc0] ss:$8 sm:$0xf]  }
  0x48   :  { %702 = vst.msk [vmem:[%s1503_s1 - $0xb] ss:$8 sm:$0xc] %vm6_vm4, %v19_v9   ;;  %v712_v14 = vld [vmem:[%s1502_s0 + $0xc0] ss:$8 sm:$0xf0]  }
  0x49   :  { %703 = vst.msk [vmem:[%s1503_s1 - $0x1a] ss:$8 sm:$0x30] %vm6_vm4, %v19_v9   ;;  %v49_v15 = vsel %vm4_vm3, %v712_v14, %v711_v13 }
  0x4a   :  { %645 = vrot.lane.b32.xlu1 %v644_v52, %s863_s18  ;;  %704 = vst.msk [vmem:[%s1503_s1 - $0x29] ss:$8 sm:$0xc0] %vm6_vm4, %v19_v9  }
  0x4b   :  { %707 = vst.msk [vmem:[%s1503_s1 + $0x10] ss:$8 sm:$0x3] %vm6_vm4, %v34_v12  }
  0x4c   :  { %708 = vst.msk [vmem:[%s1503_s1 + $0x1] ss:$8 sm:$0xc] %vm6_vm4, %v34_v12  }
  0x4d   :  { %709 = vst.msk [vmem:[%s1503_s1 - $0xe] ss:$8 sm:$0x30] %vm6_vm4, %v34_v12  }
  0x4e   :  { %691 = vrot.lane.b32.xlu0 %v690_v59, %s863_s18  ;;  %600 = vrot.lane.b32.xlu2 %v599_v62, %s862_s11  ;;  %710 = vst.msk [vmem:[%s1503_s1 - $0x1d] ss:$8 sm:$0xc0] %vm6_vm4, %v34_v12  }
  0x4f   :  { %713 = vst.msk [vmem:[%s1503_s1 + $0x14] ss:$8 sm:$0x3] %vm6_vm4, %v49_v15  }
  0x50   :  { %714 = vst.msk [vmem:[%s1503_s1 + $0x5] ss:$8 sm:$0xc] %vm6_vm4, %v49_v15  }
  0x51   :  { %715 = vst.msk [vmem:[%s1503_s1 - $0xa] ss:$8 sm:$0x30] %vm6_vm4, %v49_v15  }
  0x52   :  { %716 = vst.msk [vmem:[%s1503_s1 - $0x19] ss:$8 sm:$0xc0] %vm6_vm4, %v49_v15  }
  0x56   :  { %668 = vrot.lane.b32.xlu2 %v667_v3, %s863_s18 }
  0x70   :  { %v169_v16 = vpop.permute.xlu2 %168  }
  0x78   :  { %v78_v17 = vpop.permute.xlu0 %77   ;;  %v191_v18 = vpop.permute.xlu2 %190  }
  0x79   :  { %80 = vst.msk [vmem:[%s1503_s1] sm:$0xff] %vm79_vm5, %v78_v17  }
  0x7a   :  { %171 = vst.msk [vmem:[%s1503_s1] sm:$0xff] %vm170_vm6, %v169_v16  }
  0x7c   :  { %v123_v19 = vpop.permute.xlu1 %122  }
  0x7d   :  { %730 = vst.msk [vmem:[%s1503_s1 + $0x10] sm:$0xff] %vm79_vm5, %v123_v19  }
  0x80   :  { %v100_v20 = vpop.permute.xlu0 %99   ;;  %v260_v21 = vpop.permute.xlu2 %259  }
  0x81   :  { %725 = vst.msk [vmem:[%s1503_s1 + $0x8] sm:$0xff] %vm79_vm5, %v100_v20  }
  0x82   :  { %744 = vst.msk [vmem:[%s1503_s1 + $0x8] sm:$0xff] %vm170_vm6, %v191_v18  }
  0x83   :  { %262 = vst.msk [vmem:[%s1503_s1] sm:$0xff] %vm261_vm7, %v260_v21  }
  0x84   :  { %v146_v22 = vpop.permute.xlu1 %145  }
  0x85   :  { %735 = vst.msk [vmem:[%s1503_s1 + $0x18] sm:$0xff] %vm79_vm5, %v146_v22  }
  0x88   :  { %v214_v23 = vpop.permute.xlu0 %213   ;;  %v328_v24 = vpop.permute.xlu2 %327  }
  0x89   :  { %749 = vst.msk [vmem:[%s1503_s1 + $0x10] sm:$0xff] %vm170_vm6, %v214_v23  }
  0x8c   :  { %v237_v25 = vpop.permute.xlu1 %236  }
  0x8d   :  { %754 = vst.msk [vmem:[%s1503_s1 + $0x18] sm:$0xff] %vm170_vm6, %v237_v25  }
  0x8e   :  { %773 = vst.msk [vmem:[%s1503_s1 + $0x18] sm:$0xff] %vm261_vm7, %v328_v24  }
  0x90   :  { %v282_v26 = vpop.permute.xlu0 %281   ;;  %v396_v27 = vpop.permute.xlu2 %395  }
  0x91   :  { %763 = vst.msk [vmem:[%s1503_s1 + $0x8] sm:$0xff] %vm261_vm7, %v282_v26  }
  0x94   :  { %v305_v28 = vpop.permute.xlu1 %304  }
  0x95   :  { %768 = vst.msk [vmem:[%s1503_s1 + $0x10] sm:$0xff] %vm261_vm7, %v305_v28  }
  0x96   :  { %787 = vst.msk [vmem:[%s1503_s1 + $0x10] sm:$0xff] %vm352_vm8, %v396_v27  }
  0x98   :  { %v351_v29 = vpop.permute.xlu0 %350   ;;  %v464_v30 = vpop.permute.xlu2 %463  }
  0x99   :  { %353 = vst.msk [vmem:[%s1503_s1] sm:$0xff] %vm352_vm8, %v351_v29  }
  0x9c   :  { %v373_v31 = vpop.permute.xlu1 %372  }
  0x9d   :  { %782 = vst.msk [vmem:[%s1503_s1 + $0x8] sm:$0xff] %vm352_vm8, %v373_v31  }
  0x9e   :  { %801 = vst.msk [vmem:[%s1503_s1 + $0x8] sm:$0xff] %vm443_vm9, %v464_v30  }
  0xa0   :  { %v419_v32 = vpop.permute.xlu0 %418   ;;  %v533_v33 = vpop.permute.xlu2 %532  }
  0xa1   :  { %792 = vst.msk [vmem:[%s1503_s1 + $0x18] sm:$0xff] %vm352_vm8, %v419_v32  }
  0xa4   :  { %v442_v34 = vpop.permute.xlu1 %441  }
  0xa5   :  { %444 = vst.msk [vmem:[%s1503_s1] sm:$0xff] %vm443_vm9, %v442_v34  }
  0xa6   :  { %535 = vst.msk [vmem:[%s1503_s1] sm:$0xff] %vm534_vm10, %v533_v33  }
  0xa8   :  { %v487_v35 = vpop.permute.xlu0 %486   ;;  %v601_v36 = vpop.permute.xlu2 %600  }
  0xa9   :  { %806 = vst.msk [vmem:[%s1503_s1 + $0x10] sm:$0xff] %vm443_vm9, %v487_v35  }
  0xac   :  { %v510_v37 = vpop.permute.xlu1 %509  }
  0xad   :  { %811 = vst.msk [vmem:[%s1503_s1 + $0x18] sm:$0xff] %vm443_vm9, %v510_v37  }
  0xae   :  { %830 = vst.msk [vmem:[%s1503_s1 + $0x18] sm:$0xff] %vm534_vm10, %v601_v36  }
  0xb0   :  { %v555_v38 = vpop.permute.xlu0 %554   ;;  %v669_v39 = vpop.permute.xlu2 %668  }
  0xb1   :  { %820 = vst.msk [vmem:[%s1503_s1 + $0x8] sm:$0xff] %vm534_vm10, %v555_v38  }
  0xb4   :  { %v578_v40 = vpop.permute.xlu1 %577  }
  0xb5   :  { %825 = vst.msk [vmem:[%s1503_s1 + $0x10] sm:$0xff] %vm534_vm10, %v578_v40  }
  0xb6   :  { %844 = vst.msk [vmem:[%s1503_s1 + $0x10] sm:$0xff] %vm625_vm11, %v669_v39  }
  0xb8   :  { %v624_v41 = vpop.permute.xlu0 %623  }
  0xb9   :  { %626 = vst.msk [vmem:[%s1503_s1] sm:$0xff] %vm625_vm11, %v624_v41  }
  0xbc   :  { %v646_v42 = vpop.permute.xlu1 %645  }
  0xbd   :  { %839 = vst.msk [vmem:[%s1503_s1 + $0x8] sm:$0xff] %vm625_vm11, %v646_v42  }
  0xc0   :  { %v692_v43 = vpop.permute.xlu0 %691  }
  0xc1   :  { %849 = vst.msk [vmem:[%s1503_s1 + $0x18] sm:$0xff] %vm625_vm11, %v692_v43  }

// kernel: efficientnet_block.4
= control target key start
LH: loop header
LB: loop body
LE: loop exit
PB: predicated region body
PF: predicated region fallthrough
CT: control target
= control target key end

     0   :  { %vm31_vm0 = vcmask 523264   ;;  %vm123_vm1 = vcmask 1040384   ;;  %s274_s1 = inlined_call_operand.vmem [shape: f32[64,256], index: 1, kind: input, shape index: {}]   ;;  %s275_s0 = inlined_call_operand.vmem [shape: f32[32,64], index: 0, kind: input, shape index: {}]   ;;  %s276_s2 = inlined_call_operand.vmem [shape: f32[1,2,256], index: 2, kind: output, shape index: {}]  }
   0x1   :  { %v29_v0 = vld [vmem:[%s274_s1 + $0x70] sm:$0xff]  ;;  %v30_v1 = vld [vmem:[%s274_s1 + $0x78] sm:$0xff]  ;;  %v27_v2 = vld [vmem:[%s274_s1 + $0x60] sm:$0xff] }
   0x2   :  { %52 = vmatpush.msra.mxu0 %v29_v0  ;;  %177 = vmatpush.msra.mxu2 %v29_v0  ;;  %v28_v3 = vld [vmem:[%s274_s1 + $0x68] sm:$0xff]  ;;  %v25_v4 = vld [vmem:[%s274_s1 + $0x50] sm:$0xff]  ;;  %v26_v5 = vld [vmem:[%s274_s1 + $0x58] sm:$0xff] }
   0x3   :  { %81 = vmatpush.msra.mxu1 %v30_v1  ;;  %185 = vmatpush.msra.mxu3 %v30_v1  ;;  %v23_v6 = vld [vmem:[%s274_s1 + $0x40] sm:$0xff]  ;;  %v24_v7 = vld [vmem:[%s274_s1 + $0x48] sm:$0xff]  ;;  %v21_v8 = vld [vmem:[%s274_s1 + $0x30] sm:$0xff]  ;;  %v126_v1 = vlaneseq }
   0x4   :  { %53 = vmatpush.msra.mxu0 %v27_v2  ;;  %178 = vmatpush.msra.mxu2 %v27_v2  ;;  %v22_v9 = vld [vmem:[%s274_s1 + $0x38] sm:$0xff]  ;;  %v19_v10 = vld [vmem:[%s274_s1 + $0x20] sm:$0xff]  ;;  %v20_v11 = vld [vmem:[%s274_s1 + $0x28] sm:$0xff] }
   0x5   :  { %82 = vmatpush.msra.mxu1 %v28_v3  ;;  %186 = vmatpush.msra.mxu3 %v28_v3  ;;  %v17_v12 = vld [vmem:[%s274_s1 + $0x10] sm:$0xff]  ;;  %v18_v13 = vld [vmem:[%s274_s1 + $0x18] sm:$0xff]  ;;  %v15_v14 = vld [vmem:[%s274_s1] sm:$0xff]  ;;  %vm128_vm2 = vcmp.lt.s32.totalorder %v126_v1, 256 }
   0x6   :  { %54 = vmatpush.msra.mxu0 %v25_v4  ;;  %179 = vmatpush.msra.mxu2 %v25_v4  ;;  %v16_v15 = vld [vmem:[%s274_s1 + $0x8] sm:$0xff]  ;;  %v11_v16 = vld [vmem:[%s275_s0] sm:$0xff]  ;;  %v13_v17 = vld [vmem:[%s275_s0 + $0x10] sm:$0xff] }
   0x7   :  { %83 = vmatpush.msra.mxu1 %v26_v5  ;;  %187 = vmatpush.msra.mxu3 %v26_v5  ;;  %v12_v18 = vld [vmem:[%s275_s0 + $0x8] sm:$0xff]  ;;  %v14_v19 = vld [vmem:[%s275_s0 + $0x18] sm:$0xff] }
   0x8   :  { %55 = vmatpush.msra.mxu0 %v23_v6  ;;  %180 = vmatpush.msra.mxu2 %v23_v6 }
   0x9   :  { %84 = vmatpush.msra.mxu1 %v24_v7  ;;  %188 = vmatpush.msra.mxu3 %v24_v7 }
   0xa   :  { %56 = vmatpush.msra.mxu0 %v21_v8  ;;  %181 = vmatpush.msra.mxu2 %v21_v8 }
   0xb   :  { %85 = vmatpush.msra.mxu1 %v22_v9  ;;  %189 = vmatpush.msra.mxu3 %v22_v9 }
   0xc   :  { %57 = vmatpush.msra.mxu0 %v19_v10  ;;  %182 = vmatpush.msra.mxu2 %v19_v10 }
   0xd   :  { %86 = vmatpush.msra.mxu1 %v20_v11  ;;  %190 = vmatpush.msra.mxu3 %v20_v11 }
   0xe   :  { %58 = vmatpush.msra.mxu0 %v17_v12  ;;  %183 = vmatpush.msra.mxu2 %v17_v12 }
   0xf   :  { %87 = vmatpush.msra.mxu1 %v18_v13  ;;  %191 = vmatpush.msra.mxu3 %v18_v13 }
  0x10   :  { %59 = vmatpush.msra.mxu0 %v15_v14  ;;  %184 = vmatpush.msra.mxu2 %v15_v14 }
  0x11   :  { %88 = vmatpush.msra.mxu1 %v16_v15  ;;  %192 = vmatpush.msra.mxu3 %v16_v15 }
  0x12   :  { %168 = vmatmul.msk.f32.vlgmr.msra.gmra.mxu0 %vm31_vm0, %v11_v16  ;;  %170 = vmatmul.msk.f32.vlgmr.msra.gmra.mxu2 %vm31_vm0, %v13_v17 }
  0x13   :  { %172 = vmatmul.msk.f32.vlgmr.msra.gmra.mxu1 %vm31_vm0, %v11_v16  ;;  %174 = vmatmul.msk.f32.vlgmr.msra.gmra.mxu3 %vm31_vm0, %v13_v17 }
  0x1a   :  { %169 = vmatmul.msk.f32.gmra.mxu0 %vm31_vm0, %v12_v18  ;;  %171 = vmatmul.msk.f32.gmra.mxu2 %vm31_vm0, %v14_v19 }
  0x1b   :  { %173 = vmatmul.msk.f32.gmra.mxu1 %vm31_vm0, %v12_v18  ;;  %175 = vmatmul.msk.f32.gmra.mxu3 %vm31_vm0, %v14_v19 }
  0x8f   :  { %v61_v20 = vpop.f32.mrf.mxu0 }
  0x90   :  { %v90_v21 = vpop.f32.mrf.mxu1  ;;  %v131_v25 = vmul.f32 %v61_v20, %v61_v20 }
  0x91   :  { %v132_v29 = vmul.f32 %v90_v21, %v90_v21 }
  0x95   :  { %v67_v22 = vpop.f32.mrf.mxu2 }
  0x96   :  { %v96_v23 = vpop.f32.mrf.mxu3  ;;  %v135_v34 = vmul.f32 %v67_v22, %v67_v22 }
  0x97   :  { %v64_v24 = vpop.f32.mrf.mxu0  ;;  %v136_v36 = vmul.f32 %v96_v23, %v96_v23 }
  0x98   :  { %v102_v26 = vadd.f32 %v64_v24, %v61_v20  ;;  %v133_v27 = vmul.f32 %v64_v24, %v64_v24  ;;  %v93_v28 = vpop.f32.mrf.mxu1 }
  0x99   :  { %v111_v30 = vadd.f32 %v93_v28, %v90_v21  ;;  %v134_v31 = vmul.f32 %v93_v28, %v93_v28 }
  0x9a   :  { %v139_v32 = vadd.f32 %v133_v27, %v131_v25  ;;  %v103_v35 = vadd.f32 %v102_v26, %v67_v22 }
  0x9b   :  { %v148_v33 = vadd.f32 %v134_v31, %v132_v29  ;;  %v112_v38 = vadd.f32 %v111_v30, %v96_v23 }
  0x9c   :  { %v140_v41 = vadd.f32 %v139_v32, %v135_v34 }
  0x9d   :  { %v70_v37 = vpop.f32.mrf.mxu2  ;;  %v149_v45 = vadd.f32 %v148_v33, %v136_v36 }
  0x9e   :  { %v104_v39 = vadd.f32 %v103_v35, %v70_v37  ;;  %v137_v40 = vmul.f32 %v70_v37, %v70_v37  ;;  %v99_v42 = vpop.f32.mrf.mxu3 }
  0x9f   :  { %v113_v43 = vadd.f32 %v112_v38, %v99_v42  ;;  %v138_v44 = vmul.f32 %v99_v42, %v99_v42 }
  0xa0   :  { %v105_v46 = vrot.slane %v104_v39, 4  ;;  %v141_v47 = vadd.f32 %v140_v41, %v137_v40 }
  0xa1   :  { %v114_v48 = vrot.slane %v113_v43, 4  ;;  %v150_v49 = vadd.f32 %v149_v45, %v138_v44 }
  0xa2   :  { %v106_v50 = vadd.f32 %v105_v46, %v104_v39  ;;  %v142_v51 = vrot.slane %v141_v47, 4 }
  0xa3   :  { %v115_v52 = vadd.f32 %v114_v48, %v113_v43  ;;  %v151_v53 = vrot.slane %v150_v49, 4 }
  0xa4   :  { %v107_v54 = vrot.slane %v106_v50, 2  ;;  %v143_v55 = vadd.f32 %v142_v51, %v141_v47 }
  0xa5   :  { %v116_v56 = vrot.slane %v115_v52, 2  ;;  %v152_v57 = vadd.f32 %v151_v53, %v150_v49 }
  0xa6   :  { %v108_v58 = vadd.f32 %v107_v54, %v106_v50  ;;  %v144_v59 = vrot.slane %v143_v55, 2 }
  0xa7   :  { %v117_v60 = vadd.f32 %v116_v56, %v115_v52  ;;  %v153_v61 = vrot.slane %v152_v57, 2 }
  0xa8   :  { %v145_v62 = vadd.f32 %v144_v59, %v143_v55  ;;  %v109_v63 = vrot.slane %v108_v58, 1 }
  0xa9   :  { %v118_v0 = vrot.slane %v117_v60, 1  ;;  %v154_v2 = vadd.f32 %v153_v61, %v152_v57 }
  0xaa   :  { %v146_v3 = vrot.slane %v145_v62, 1  ;;  %v110_v6 = vadd.f32 %v109_v63, %v108_v58 }
  0xab   :  { %v119_v4 = vadd.f32 %v118_v0, %v117_v60  ;;  %v155_v5 = vrot.slane %v154_v2, 1 }
  0xac   :  { %v147_v9 = vadd.f32 %v146_v3, %v145_v62 }
  0xad   :  { %v122_v7 = vrot.slane %v119_v4, 7  ;;  %v156_v8 = vadd.f32 %v155_v5, %v154_v2 }
  0xaf   :  { %v124_v10 = vsel %vm123_vm1, %v110_v6, %v122_v7  ;;  %v159_v11 = vrot.slane %v156_v8, 7 }
  0xb0   :  { %130 = vst.msk [vmem:[%s276_s2] ss:$2 sm:$0x3] %vm128_vm2, %v124_v10 }
  0xb1   :  { %v160_v12 = vsel %vm123_vm1, %v147_v9, %v159_v11 }
  0xb2   :  { %176 = vst.msk [vmem:[%s276_s2 + $0x1] ss:$2 sm:$0x3] %vm128_vm2, %v160_v12 }

// kernel: tile.73
= control target key start
LH: loop header
LB: loop body
LE: loop exit
PB: predicated region body
PF: predicated region fallthrough
CT: control target
= control target key end

     0   :  { %s28_s0 = inlined_call_operand.vmem [shape: f32[4], index: 0, kind: input, shape index: {}]   ;;  %s29_s1 = inlined_call_operand.vmem [shape: f32[16,4], index: 1, kind: output, shape index: {}]  }
   0x1   :  { %v4_v0 = vld [vmem:[%s28_s0] ss:$0 sm:$0xff] }
   0x2   :  { %5 = vst [vmem:[%s29_s1] sm:$0xff] %v4_v0 }
   0x3   :  { %8 = vst [vmem:[%s29_s1 + $0x8] sm:$0xff] %v4_v0 }

// kernel: tile.74
= control target key start
LH: loop header
LB: loop body
LE: loop exit
PB: predicated region body
PF: predicated region fallthrough
CT: control target
= control target key end

     0   :  { %s131_s10 = smov 60   ;;  %s132_s11 = smov 52   ;;  %vm3_vm0 = vcmask 31744   ;;  %vm9_vm1 = vcmask 523744   ;;  %vm15_vm2 = vcmask 490944   ;;  %vm21_vm3 = vcmask 458144   ;;  %s207_s0 = inlined_call_operand.vmem [shape: f32[16,4], index: 0, kind: input, shape index: {}]   ;;  %s208_s1 = inlined_call_operand.vmem [shape: f32[1,64], index: 1, kind: output, shape index: {}]  }
   0x1   :  { %v101_v0 = vld [vmem:[%s207_s0 + $0xf] sm:$0x1]   ;;  %v103_v1 = vld [vmem:[%s207_s0 + $0xd] sm:$0x1]   ;;  %v105_v2 = vld [vmem:[%s207_s0 + $0xb] sm:$0x1]  }
   0x2   :  { %7 = vrot.lane.b32.xlu0 %v101_v0, %s131_s10  ;;  %19 = vrot.lane.b32.xlu1 %v103_v1, %s132_s11  ;;  %s133_s14 = smov 44   ;;  %v102_v3 = vld [vmem:[%s207_s0 + $0xe] sm:$0x1]   ;;  %v104_v4 = vld [vmem:[%s207_s0 + $0xc] sm:$0x1]   ;;  %s134_s19 = smov 56  }
   0x3   :  { %31 = vrot.lane.b32.xlu2 %v105_v2, %s133_s14  ;;  %s135_s20 = smov 48   ;;  %v106_v5 = vld [vmem:[%s207_s0 + $0xa] sm:$0x1]   ;;  %s136_s23 = smov 40   ;;  %v107_v6 = vld [vmem:[%s207_s0 + $0x9] sm:$0x1]  }
   0x4   :  { %v108_v7 = vld [vmem:[%s207_s0 + $0x8] sm:$0x1]   ;;  %s137_s28 = smov 36   ;;  %s138_s29 = smov 32   ;;  %v109_v8 = vld [vmem:[%s207_s0 + $0x7] sm:$0x1]  }
   0x5   :  { %s139_s3 = smov 28   ;;  %v110_v9 = vld [vmem:[%s207_s0 + $0x6] sm:$0x1]   ;;  %v111_v10 = vld [vmem:[%s207_s0 + $0x5] sm:$0x1]   ;;  %s140_s8 = smov 24  }
   0x6   :  { %s141_s9 = smov 20   ;;  %v112_v11 = vld [vmem:[%s207_s0 + $0x4] sm:$0x1]   ;;  %s142_s12 = smov 16   ;;  %v113_v12 = vld [vmem:[%s207_s0 + $0x3] sm:$0x1]  }
   0x7   :  { %v114_v13 = vld [vmem:[%s207_s0 + $0x2] sm:$0x1]   ;;  %s143_s17 = smov 12   ;;  %s144_s18 = smov 8   ;;  %v115_v14 = vld [vmem:[%s207_s0 + $0x1] sm:$0x1]  }
   0x8   :  { %s145_s21 = smov 4   ;;  %v2_v15 = vld [vmem:[%s207_s0] sm:$0x1]   ;;  %vm27_vm4 = vcmask 425344   ;;  %vm33_vm5 = vcmask 392544   ;;  %vm39_vm6 = vcmask 359744  }
   0x9   :  { %4 = vst.msk [vmem:[#allocation0] sm:$0x1] %vm3_vm0, %v2_v15   ;;  %vm45_vm7 = vcmask 326944   ;;  %vm51_vm8 = vcmask 294144   ;;  %vm57_vm9 = vcmask 261344   ;;  %vm63_vm10 = vcmask 228544  }
   0xa   :  { %13 = vrot.lane.b32.xlu0 %v102_v3, %s134_s19  ;;  %25 = vrot.lane.b32.xlu1 %v104_v4, %s135_s20  ;;  %vm69_vm11 = vcmask 195744   ;;  %vm75_vm12 = vcmask 162944   ;;  %vm81_vm13 = vcmask 130144   ;;  %vm87_vm14 = vcmask 97344  }
   0xb   :  { %37 = vrot.lane.b32.xlu2 %v106_v5, %s136_s23  ;;  %vm93_vm15 = vcmask 64544  }
  0x12   :  { %43 = vrot.lane.b32.xlu0 %v107_v6, %s137_s28  ;;  %49 = vrot.lane.b32.xlu1 %v108_v7, %s138_s29 }
  0x13   :  { %55 = vrot.lane.b32.xlu2 %v109_v8, %s139_s3 }
  0x1a   :  { %61 = vrot.lane.b32.xlu0 %v110_v9, %s140_s8  ;;  %67 = vrot.lane.b32.xlu1 %v111_v10, %s141_s9 }
  0x1b   :  { %73 = vrot.lane.b32.xlu2 %v112_v11, %s142_s12 }
  0x22   :  { %79 = vrot.lane.b32.xlu0 %v113_v12, %s143_s17  ;;  %85 = vrot.lane.b32.xlu1 %v114_v13, %s144_s18 }
  0x23   :  { %91 = vrot.lane.b32.xlu2 %v115_v14, %s145_s21 }
  0x5d   :  { %v32_v16 = vpop.permute.xlu2 %31  }
  0x65   :  { %v38_v17 = vpop.permute.xlu2 %37  }
  0x6d   :  { %v56_v18 = vpop.permute.xlu2 %55  }
  0x74   :  { %v8_v19 = vpop.permute.xlu0 %7   ;;  %v20_v20 = vpop.permute.xlu1 %19  }
  0x75   :  { %10 = vst.msk [vmem:[#allocation0] sm:$0x1] %vm9_vm1, %v8_v19   ;;  %v74_v21 = vpop.permute.xlu2 %73  }
  0x7c   :  { %v14_v22 = vpop.permute.xlu0 %13   ;;  %v26_v23 = vpop.permute.xlu1 %25  }
  0x7d   :  { %16 = vst.msk [vmem:[#allocation0] sm:$0x1] %vm15_vm2, %v14_v22   ;;  %v92_v24 = vpop.permute.xlu2 %91  }
  0x7e   :  { %22 = vst.msk [vmem:[#allocation0] sm:$0x1] %vm21_vm3, %v20_v20  }
  0x7f   :  { %28 = vst.msk [vmem:[#allocation0] sm:$0x1] %vm27_vm4, %v26_v23  }
  0x80   :  { %34 = vst.msk [vmem:[#allocation0] sm:$0x1] %vm33_vm5, %v32_v16  }
  0x81   :  { %40 = vst.msk [vmem:[#allocation0] sm:$0x1] %vm39_vm6, %v38_v17  }
  0x84   :  { %v44_v25 = vpop.permute.xlu0 %43   ;;  %v50_v26 = vpop.permute.xlu1 %49  }
  0x85   :  { %46 = vst.msk [vmem:[#allocation0] sm:$0x1] %vm45_vm7, %v44_v25  }
  0x86   :  { %52 = vst.msk [vmem:[#allocation0] sm:$0x1] %vm51_vm8, %v50_v26  }
  0x87   :  { %58 = vst.msk [vmem:[#allocation0] sm:$0x1] %vm57_vm9, %v56_v18  }
  0x8c   :  { %v62_v27 = vpop.permute.xlu0 %61   ;;  %v68_v28 = vpop.permute.xlu1 %67  }
  0x8d   :  { %64 = vst.msk [vmem:[#allocation0] sm:$0x1] %vm63_vm10, %v62_v27  }
  0x8e   :  { %70 = vst.msk [vmem:[#allocation0] sm:$0x1] %vm69_vm11, %v68_v28  }
  0x8f   :  { %76 = vst.msk [vmem:[#allocation0] sm:$0x1] %vm75_vm12, %v74_v21  }
  0x94   :  { %v80_v29 = vpop.permute.xlu0 %79   ;;  %v86_v30 = vpop.permute.xlu1 %85  }
  0x95   :  { %82 = vst.msk [vmem:[#allocation0] sm:$0x1] %vm81_vm13, %v80_v29  }
  0x96   :  { %88 = vst.msk [vmem:[#allocation0] sm:$0x1] %vm87_vm14, %v86_v30  }
  0x97   :  { %94 = vst.msk [vmem:[#allocation0] sm:$0x1] %vm93_vm15, %v92_v24  }
  0x9e   :  { %v97_v31 = vld [vmem:[#allocation0] sm:$0x1] }
  0x9f   :  { %100 = vst [vmem:[%s208_s1] sm:$0x1] %v97_v31 }

// kernel: efficientnet_block.5
= control target key start
LH: loop header
LB: loop body
LE: loop exit
PB: predicated region body
PF: predicated region fallthrough
CT: control target
= control target key end

     0   :  { %s1258_s21 = smov 0   ;;  %s1711_s0 = inlined_call_operand.vmem [shape: f32[2,16,64], index: 0, kind: input, shape index: {}]   ;;  %s1712_s1 = inlined_call_operand.vmem [shape: f32[64,256], index: 1, kind: input, shape index: {}]   ;;  %s1713_s2 = inlined_call_operand.vmem [shape: f32[1,256], index: 2, kind: input, shape index: {}]   ;;  %s1714_s3 = inlined_call_operand.vmem [shape: f32[1,256], index: 3, kind: input, shape index: {}]   ;;  %s1715_s4 = inlined_call_operand.vmem [shape: f32[9,256], index: 4, kind: input, shape index: {}]   ;;  %s1716_s5 = inlined_call_operand.vmem [shape: bf16[2,16,256], index: 5, kind: output, shape index: {0}]   ;;  %s1717_s6 = inlined_call_operand.vmem [shape: f32[2,2,256], index: 6, kind: output, shape index: {1}]  }
   0x1 LB: > { %s1132_s22 = sadd.s32 4294967295, %s1216_s21   ;;  %p1136_p0 = scmp.ge.s32.totalorder %s1216_s21, 1  ;;  %s1216_s21 = sphi %s1258_s21, %s17_s21  }
   0x2   : > { %p215_p1 = scmp.lt.s32.totalorder %s1216_s21, 3 }
   0x4   : > { %p216_p2 = pnand %p1136_p0, %p215_p1 }
   0x5   : > { %p250_p3 = scmp.lt.s32.totalorder (!%p216_p2), %s1132_s22, 1  ;;  %s1218_s15 = smov (!%p216_p2), 16  }
   0x6   : > { %219 = sbr.rel (%p216_p2) target bundleno = 547 (0x223), region = 40  ;;  %s1219_s20 = smov (!%p216_p2), 32  }
   0x7   : > { %s1221_s10 = smov (!%p216_p2), 96   ;;  %s1222_s11 = smov (!%p216_p2), 112  }
   0xb   : > { %v281_v0 = vld [vmem:[%s1712_s1 + $0x70] sm:$0xff]  ;;  %v282_v1 = vld [vmem:[%s1712_s1 + $0x78] sm:$0xff]  ;;  %v279_v2 = vld [vmem:[%s1712_s1 + $0x60] sm:$0xff]  ;;  %s1725_s22 = smov (!%p250_p3, %s1132_s22), 1  ;;  %vm283_vm0 = vcmask 523264  }
   0xc   : > { %298 = vmatpush.msra.mxu0 %v281_v0  ;;  %1165 = vmatpush.msra.mxu2 %v281_v0  ;;  %v280_v3 = vld [vmem:[%s1712_s1 + $0x68] sm:$0xff]  ;;  %v277_v4 = vld [vmem:[%s1712_s1 + $0x50] sm:$0xff]  ;;  %v278_v5 = vld [vmem:[%s1712_s1 + $0x58] sm:$0xff]  ;;  %s1162_s23 = sshll.u32 %s1725_s22, 4 }
   0xd   : > { %321 = vmatpush.msra.mxu1 %v282_v1  ;;  %1173 = vmatpush.msra.mxu3 %v282_v1  ;;  %v275_v6 = vld [vmem:[%s1712_s1 + $0x40] sm:$0xff]  ;;  %v276_v7 = vld [vmem:[%s1712_s1 + $0x48] sm:$0xff]  ;;  %v273_v8 = vld [vmem:[%s1712_s1 + $0x30] sm:$0xff]  ;;  %s254_s8 = scalar_lea.vmem %s1711_s0, %s1162_s23 }
   0xe   : > { %299 = vmatpush.msra.mxu0 %v279_v2  ;;  %1166 = vmatpush.msra.mxu2 %v279_v2  ;;  %v274_v9 = vld [vmem:[%s1712_s1 + $0x38] sm:$0xff]  ;;  %v271_v10 = vld [vmem:[%s1712_s1 + $0x20] sm:$0xff]  ;;  %v272_v11 = vld [vmem:[%s1712_s1 + $0x28] sm:$0xff] }
   0xf   : > { %322 = vmatpush.msra.mxu1 %v280_v3  ;;  %1174 = vmatpush.msra.mxu3 %v280_v3  ;;  %v269_v12 = vld [vmem:[%s1712_s1 + $0x10] sm:$0xff]  ;;  %v270_v13 = vld [vmem:[%s1712_s1 + $0x18] sm:$0xff]  ;;  %v267_v14 = vld [vmem:[%s1712_s1] sm:$0xff] }
  0x10   : > { %300 = vmatpush.msra.mxu0 %v277_v4  ;;  %1167 = vmatpush.msra.mxu2 %v277_v4  ;;  %v268_v15 = vld [vmem:[%s1712_s1 + $0x8] sm:$0xff]  ;;  %v265_v16 = vld [vmem:[%s254_s8] sm:$0xff]  ;;  %v1158_v31 = vld [vmem:[%s1715_s4 + $0x10] ss:$8 sm:$0x3] }
  0x11   : > { %323 = vmatpush.msra.mxu1 %v278_v5  ;;  %1175 = vmatpush.msra.mxu3 %v278_v5  ;;  %v266_v17 = vld [vmem:[%s254_s8 + $0x8] sm:$0xff]  ;;  %v926_v33 = vperm.slane %v1158_v31, 0  ;;  %v336_v34 = vld [vmem:[%s1713_s2] sm:$0x3]  ;;  %v927_v42 = vperm.slane %v1158_v31, 1 }
  0x12   : > { %301 = vmatpush.msra.mxu0 %v275_v6  ;;  %1168 = vmatpush.msra.mxu2 %v275_v6  ;;  %v1151_v18 = vld [vmem:[%s1715_s4 + $0x1] ss:$8 sm:$0x3]  ;;  %v1152_v21 = vld [vmem:[%s1715_s4 + $0x2] ss:$8 sm:$0x3] }
  0x13   : > { %324 = vmatpush.msra.mxu1 %v276_v7  ;;  %1176 = vmatpush.msra.mxu3 %v276_v7  ;;  %v528_v19 = vperm.slane %v1151_v18, 1  ;;  %v527_v20 = vperm.slane %v1151_v18, 0  ;;  %v1154_v22 = vld [vmem:[%s1715_s4 + $0x4] ss:$8 sm:$0x3]  ;;  %v577_v23 = vperm.slane %v1152_v21, 0 }
  0x14   : > { %302 = vmatpush.msra.mxu0 %v273_v8  ;;  %1169 = vmatpush.msra.mxu2 %v273_v8  ;;  %v672_v24 = vperm.slane %v1154_v22, 0  ;;  %v578_v25 = vperm.slane %v1152_v21, 1  ;;  %v1155_v26 = vld [vmem:[%s1715_s4 + $0x5] ss:$8 sm:$0x3]  ;;  %v673_v27 = vperm.slane %v1154_v22, 1 }
  0x15   : > { %325 = vmatpush.msra.mxu1 %v274_v9  ;;  %1177 = vmatpush.msra.mxu3 %v274_v9  ;;  %v743_v28 = vperm.slane %v1155_v26, 1  ;;  %v742_v29 = vperm.slane %v1155_v26, 0  ;;  %v1157_v30 = vld [vmem:[%s1715_s4 + $0x7] ss:$8 sm:$0x3]  ;;  %v338_v37 = vperm.slane %v336_v34, 0 }
  0x16   : > { %303 = vmatpush.msra.mxu0 %v271_v10  ;;  %1170 = vmatpush.msra.mxu2 %v271_v10  ;;  %v856_v32 = vperm.slane %v1157_v30, 0  ;;  %v857_v35 = vperm.slane %v1157_v30, 1  ;;  %v346_v36 = vld [vmem:[%s1714_s3] sm:$0x3]  ;;  %v339_v38 = vperm.slane %v336_v34, 1 }
  0x17   : > { %326 = vmatpush.msra.mxu1 %v272_v11  ;;  %1178 = vmatpush.msra.mxu3 %v272_v11  ;;  %v348_v39 = vperm.slane %v346_v36, 0  ;;  %v349_v41 = vperm.slane %v346_v36, 1 }
  0x18   : > { %304 = vmatpush.msra.mxu0 %v269_v12  ;;  %1171 = vmatpush.msra.mxu2 %v269_v12 }
  0x19   : > { %327 = vmatpush.msra.mxu1 %v270_v13  ;;  %1179 = vmatpush.msra.mxu3 %v270_v13 }
  0x1a   : > { %305 = vmatpush.msra.mxu0 %v267_v14  ;;  %1172 = vmatpush.msra.mxu2 %v267_v14 }
  0x1b   : > { %328 = vmatpush.msra.mxu1 %v268_v15  ;;  %1180 = vmatpush.msra.mxu3 %v268_v15 }
  0x1c   : > { %1143 = vmatmul.msk.f32.vlgmr.msra.gmra.mxu0 %vm283_vm0, %v265_v16  ;;  %1144 = vmatmul.msk.f32.vlgmr.msra.gmra.mxu2 %vm283_vm0, %v266_v17 }
  0x1d   : > { %1145 = vmatmul.msk.f32.vlgmr.msra.gmra.mxu1 %vm283_vm0, %v265_v16  ;;  %1146 = vmatmul.msk.f32.vlgmr.msra.gmra.mxu3 %vm283_vm0, %v266_v17 }
  0x1e   : > { %531 = vrot.lane.b32.xlu1 %v528_v19, %s1218_s15  ;;  %529 = vrot.lane.b32.xlu0 %v527_v20, %s1218_s15 }
  0x1f   : > { %579 = vrot.lane.b32.xlu2 %v577_v23, %s1219_s20 }
  0x26   : > { %674 = vrot.lane.b32.xlu1 %v672_v24, %s1218_s15  ;;  %581 = vrot.lane.b32.xlu0 %v578_v25, %s1219_s20 }
  0x27   : > { %676 = vrot.lane.b32.xlu2 %v673_v27, %s1218_s15 }
  0x2e   : > { %746 = vrot.lane.b32.xlu1 %v743_v28, %s1219_s20  ;;  %744 = vrot.lane.b32.xlu0 %v742_v29, %s1219_s20 }
  0x2f   : > { %858 = vrot.lane.b32.xlu2 %v856_v32, %s1218_s15 }
  0x36   : > { %928 = vrot.lane.b32.xlu1 %v926_v33, %s1219_s20  ;;  %860 = vrot.lane.b32.xlu0 %v857_v35, %s1218_s15 }
  0x37   : > { %930 = vrot.lane.b32.xlu2 %v927_v42, %s1219_s20  ;;  %s259_s20 = scalar_lea.vmem %s1716_s5, %s1162_s23  ;;  %s1164_s23 = sshll.u32 %s1725_s22, 2 }
  0x38   : > { %s264_s26 = scalar_lea.vmem %s1717_s6, %s1164_s23 }
  0x99   : > { %v307_v40 = vpop.f32.mrf.mxu0 }
  0x9a   : > { %v342_v43 = vmul.f32 %v338_v37, %v307_v40  ;;  %v330_v44 = vpop.f32.mrf.mxu1 }
  0x9b   : > { %v343_v45 = vmul.f32 %v339_v38, %v330_v44 }
  0x9c   : > { %v1357_v46 = vadd.f32 %v348_v39, %v342_v43 }
  0x9d   : > { %v1359_v47 = vadd.f32 %v349_v41, %v343_v45 }
  0x9e   : > { %v1147_v48 = vmul.f32 -1.442695, %v1357_v46 }
  0x9f   : > { %v1148_v49 = vmul.f32 -1.442695, %v1359_v47  ;;  %v310_v50 = vpop.f32.mrf.mxu2 }
  0xa0   : > { %1194 = vpow2.f32 %v1147_v48  ;;  %v344_v51 = vmul.f32 %v338_v37, %v310_v50  ;;  %v333_v52 = vpop.f32.mrf.mxu3 }
  0xa1   : > { %1196 = vpow2.f32 %v1148_v49  ;;  %v345_v53 = vmul.f32 %v339_v38, %v333_v52 }
  0xa2   : > { %v1364_v54 = vadd.f32 %v348_v39, %v344_v51 }
  0xa3   : > { %v1366_v55 = vadd.f32 %v349_v41, %v345_v53 }
  0xa4   : > { %v1149_v56 = vmul.f32 -1.442695, %v1364_v54 }
  0xa5   : > { %v1150_v57 = vmul.f32 -1.442695, %v1366_v55 }
  0xa6   : > { %v1195_v58 = vpop.eup %1194  ;;  %1198 = vpow2.f32 %v1149_v56 }
  0xa7   : > { %v1197_v59 = vpop.eup %1196  ;;  %v368_v60 = vadd.f32 1.0, %v1195_v58  ;;  %1200 = vpow2.f32 %v1150_v57  ;;  %v1220_v57 = vmov 0.0  }
  0xa8   : > { %v369_v61 = vadd.f32 1.0, %v1197_v59  ;;  %v530_v59 = vpop.permute.xlu0 %529 }
  0xa9   : > { %1202 = vrcp.f32 %v368_v60  ;;  %v381_v5 = vand.u32 2147483647, %v368_v60  ;;  %v383_v6 = vand.u32 2147483648, %v368_v60  ;;  %vm377_vm1 = vweird.f32 %v368_v60 }
  0xaa   : > { %1204 = vrcp.f32 %v369_v61  ;;  %vm392_vm3 = vweird.f32 %v369_v61  ;;  %v396_v11 = vand.u32 2147483647, %v369_v61  ;;  %v398_v16 = vand.u32 2147483648, %v369_v61 }
  0xab   : > { %vm1370_vm4 = vcmp.eq.f32.partialorder %v381_v5, 8.507059e+37  ;;  %v384_v14 = vor.u32 1.1754944e-38, %v383_v6 }
  0xac   : > { %v1199_v62 = vpop.eup %1198  ;;  %v399_v34 = vor.u32 1.1754944e-38, %v398_v16  ;;  %vm397_vm12 = vcmp.eq.f32.partialorder %v396_v11, 8.507059e+37 }
  0xad   : > { %v1201_v63 = vpop.eup %1200  ;;  %v370_v0 = vadd.f32 1.0, %v1199_v62 }
  0xae   : > { %v371_v1 = vadd.f32 1.0, %v1201_v63 }
  0xaf   : > { %v1203_v2 = vpop.eup %1202  ;;  %1206 = vrcp.f32 %v370_v0  ;;  %vm407_vm5 = vweird.f32 %v370_v0  ;;  %v411_v20 = vand.u32 2147483647, %v370_v0  ;;  %v413_v21 = vand.u32 2147483648, %v370_v0 }
  0xb0   : > { %v1205_v3 = vpop.eup %1204  ;;  %1208 = vrcp.f32 %v371_v1  ;;  %v373_v4 = vmul.f32 %v1203_v2, %v368_v60  ;;  %vm378_vm2 = vweird.f32 %v1203_v2  ;;  %vm422_vm8 = vweird.f32 %v371_v1  ;;  %v1416_v62 = vpop.permute.xlu0 %581 }
  0xb1   : > { %v388_v7 = vmul.f32 %v1205_v3, %v369_v61  ;;  %vm393_vm6 = vweird.f32 %v1205_v3  ;;  %vm379_vm7 = vmor %vm377_vm1, %vm378_vm2  ;;  %v426_v26 = vand.u32 2147483647, %v371_v1  ;;  %v428_v30 = vand.u32 2147483648, %v371_v1  ;;  %v1414_v61 = vpop.permute.xlu1 %531 }
  0xb2   : > { %v374_v8 = vsub.f32 1.0, %v373_v4  ;;  %vm1378_vm9 = vmor %vm392_vm3, %vm393_vm6  ;;  %v414_v39 = vor.u32 1.1754944e-38, %v413_v21  ;;  %vm412_vm15 = vcmp.eq.f32.partialorder %v411_v20, 8.507059e+37  ;;  %vm461_vm1 = vcmask 1040384  }
  0xb3   : > { %v389_v9 = vsub.f32 1.0, %v388_v7  ;;  %v429_v42 = vor.u32 1.1754944e-38, %v428_v30  ;;  %vm427_vm0 = vcmp.eq.f32.partialorder %v426_v26, 8.507059e+37  ;;  %vm449_vm2 = vcmask 122880  }
  0xb4   : > { %v375_v10 = vmul.f32 %v1203_v2, %v374_v8  ;;  %vm447_vm3 = vcmask 130048   ;;  %450 = vst.msk [vmem:[#allocation2 + $0x30] sm:$0x1] %vm449_vm2, %v1220_v57  ;;  %vm445_vm6 = vcmask 130049  }
  0xb5   : > { %v1207_v12 = vpop.eup %1206  ;;  %v390_v15 = vmul.f32 %v1205_v3, %v389_v9  ;;  %448 = vst.msk [vmem:[#allocation2 + $0x18] sm:$0xff] %vm447_vm3, %v1220_v57 }
  0xb6   : > { %v1209_v17 = vpop.eup %1208  ;;  %v376_v18 = vadd.f32 %v1203_v2, %v375_v10  ;;  %v403_v19 = vmul.f32 %v1207_v12, %v370_v0  ;;  %vm408_vm11 = vweird.f32 %v1207_v12  ;;  %446 = vst.msk [vmem:[#allocation2] sm:$0xfe] %vm445_vm6, %v1220_v57 }
  0xb7   : > { %v391_v22 = vadd.f32 %v1205_v3, %v390_v15  ;;  %v418_v23 = vmul.f32 %v1209_v17, %v371_v1  ;;  %vm423_vm10 = vweird.f32 %v1209_v17  ;;  %vm409_vm14 = vmor %vm407_vm5, %vm408_vm11  ;;  %vm455_vm5 = vcmask 254080  }
  0xb8   : > { %v380_v24 = vsel %vm379_vm7, %v1203_v2, %v376_v18  ;;  %v404_v25 = vsub.f32 1.0, %v403_v19  ;;  %vm1386_vm13 = vmor %vm422_vm8, %vm423_vm10  ;;  %456 = vst.msk [vmem:[#allocation2 + $0x40] sm:$0x1] %vm455_vm5, %v1220_v57  ;;  %vm451_vm7 = vcmask 261249   ;;  %vm453_vm8 = vcmask 261248   ;;  %v1422_v1 = vpop.permute.xlu0 %744 }
  0xb9   : > { %v385_v27 = vsel %vm1370_vm4, %v384_v14, %v380_v24  ;;  %v419_v29 = vsub.f32 1.0, %v418_v23  ;;  %v395_v33 = vsel %vm1378_vm9, %v1205_v3, %v391_v22  ;;  %452 = vst.msk [vmem:[#allocation2 + $0x10] sm:$0xfe] %vm451_vm7, %v1220_v57  ;;  %v1420_v0 = vpop.permute.xlu1 %674  ;;  %vm500_vm9 = vcmask 1040512  }
  0xba   : > { %v432_v31 = vmul.f32 %v385_v27, %v1357_v46  ;;  %v405_v32 = vmul.f32 %v1207_v12, %v404_v25  ;;  %v400_v40 = vsel %vm397_vm12, %v399_v34, %v395_v33  ;;  %454 = vst.msk [vmem:[#allocation2 + $0x28] sm:$0xff] %vm453_vm8, %v1220_v57  ;;  %vm492_vm10 = vcmask 1047681   ;;  %v1156_v23 = vld [vmem:[%s1715_s4 + $0x6] ss:$8 sm:$0x3] }
  0xbb   : > { %v420_v35 = vmul.f32 %v1209_v17, %v419_v29  ;;  %v433_v48 = vmul.f32 %v400_v40, %v1359_v47  ;;  %v436_v47 = vlaneseq  ;;  %vm496_vm11 = vcmask 1047680   ;;  %v1153_v24 = vld [vmem:[%s1715_s4 + $0x3] ss:$8 sm:$0x3] }
  0xbc   : > { %v462_v36 = vrot.slane %v432_v31, 7  ;;  %v406_v37 = vadd.f32 %v1207_v12, %v405_v32  ;;  %v533_v18 = vsel %vm447_vm3, %v530_v59, %v1414_v61  ;;  %vm583_vm12 = vcmask 261120  }
  0xbd   : > { %v421_v41 = vadd.f32 %v1209_v17, %v420_v35  ;;  %v463_v52 = vrot.slane %v433_v48, 7  ;;  %vm438_vm4 = vcmp.lt.s32.totalorder %v436_v47, 288  ;;  %v816_v27 = vperm.slane %v1156_v23, 0 }
  0xbe   : > { %468 = vrot.lane.b32.xlu0 %v462_v36, %s1218_s15  ;;  %v410_v43 = vsel %vm409_vm14, %v1207_v12, %v406_v37  ;;  %440 = vst.msk [vmem:[#allocation2] ss:$8 sm:$0x7] %vm438_vm4, %v1220_v57  ;;  %v632_v28 = vperm.slane %v1153_v24, 0  ;;  %v817_v34 = vperm.slane %v1156_v23, 1  ;;  %v633_v35 = vperm.slane %v1153_v24, 1 }
  0xbf   : > { %v415_v44 = vsel %vm412_vm15, %v414_v39, %v410_v43  ;;  %v425_v45 = vsel %vm1386_vm13, %v1209_v17, %v421_v41  ;;  %443 = vst.msk [vmem:[#allocation2 + $0x31] ss:$8 sm:$0x7] %vm438_vm4, %v1220_v57  ;;  %vm648_vm13 = vcmask 1046528   ;;  %vm832_vm14 = vcmask 1045504  }
  0xc0   : > { %v434_v46 = vmul.f32 %v415_v44, %v1364_v54  ;;  %v430_v49 = vsel %vm427_vm0, %v429_v42, %v425_v45  ;;  %v1426_v5 = vpop.permute.xlu0 %860  ;;  %vm561_vm15 = vcmask 916480   ;;  %vm612_vm0 = vcmask 785408  }
  0xc1   : > { %v435_v53 = vmul.f32 %v430_v49, %v1366_v55  ;;  %v1407_v55 = vpop.permute.xlu2 %579  ;;  %v1424_v3 = vpop.permute.xlu1 %746 }
  0xc2   : > { %v464_v50 = vrot.slane %v434_v46, 7  ;;  %v584_v26 = vsel %vm583_vm12, %v1407_v55, %v1416_v62 }
  0xc3   : > { %v466_v56 = vrot.slane %v435_v53, 7 }
  0xc4   : > { %476 = vrot.lane.b32.xlu2 %v464_v50, %s1218_s15  ;;  %v465_v51 = vsel %vm461_vm1, %v462_v36, %v464_v50 }
  0xc5   : > { %472 = vrot.lane.b32.xlu1 %v465_v51, %s1218_s15  ;;  %v467_v54 = vsel %vm461_vm1, %v463_v52, %v466_v56 }
  0xc6   : > { %470 = vrot.lane.b32.xlu0 %v463_v52, %s1218_s15 }
  0xc9   : > { %v1409_v58 = vpop.permute.xlu2 %676  ;;  %v1430_v7 = vpop.permute.xlu1 %928 }
  0xcc   : > { %478 = vrot.lane.b32.xlu2 %v466_v56, %s1218_s15 }
  0xcd   : > { %474 = vrot.lane.b32.xlu1 %v467_v54, %s1218_s15 }
  0xd1   : > { %v1411_v60 = vpop.permute.xlu2 %858 }
  0xd9   : > { %v1418_v63 = vpop.permute.xlu2 %930 }
 0x11e   : > { %v477_v2 = vpop.permute.xlu2 %476 }
 0x11f   : > { %501 = vst.msk [vmem:[#allocation2 + $0x30] sm:$0x1] %vm500_vm9, %v477_v2 }
 0x126   : > { %v479_v4 = vpop.permute.xlu2 %478  ;;  %v1466_v29 = vld [vmem:[#allocation2 + $0x30] sm:$0x3] }
 0x127   : > { %503 = vst.msk [vmem:[#allocation2 + $0x40] sm:$0x1] %vm449_vm2, %v479_v4  ;;  %v482_v6 = vsel %vm447_vm3, %v477_v2, %v479_v4  ;;  %v1470_v32 = vld [vmem:[#allocation2 + $0x30] sm:$0x1]  ;;  %v824_v38 = vmul.f32 %v816_v27, %v1466_v29  ;;  %vm1016_vm2 = vcmp.lt.s32.totalorder %v436_v47, 256 }
 0x128   : > { %502 = vst [vmem:[#allocation2 + $0x38] sm:$0x1] %v482_v6  ;;  %v640_v41 = vmul.f32 %v632_v28, %v1470_v32 }
 0x129   : > { %v839_v49 = vrot.slane %v824_v38, 2 }
 0x12a   : > { %v655_v54 = vrot.slane %v640_v41, 1 }
 0x12f   : > { %v1476_v36 = vld [vmem:[#allocation2 + $0x38] sm:$0x1] }
 0x130   : > { %v469_v8 = vpop.permute.xlu0 %468  ;;  %v1478_v37 = vld [vmem:[#allocation2 + $0x38] sm:$0x3]  ;;  %v641_v45 = vmul.f32 %v633_v35, %v1476_v36 }
 0x131   : > { %493 = vst.msk [vmem:[#allocation2] sm:$0xfe] %vm492_vm10, %v469_v8  ;;  %v825_v43 = vmul.f32 %v817_v34, %v1478_v37 }
 0x132   : > { %v657_v4 = vrot.slane %v641_v45, 1 }
 0x133   : > { %v841_v2 = vrot.slane %v825_v43, 2 }
 0x137   : > { %v473_v9 = vpop.permute.xlu1 %472 }
 0x138   : > { %497 = vst.msk [vmem:[#allocation2 + $0x18] sm:$0xff] %vm496_vm11, %v473_v9  ;;  %v471_v10 = vpop.permute.xlu0 %470  ;;  %v1432_v11 = vld [vmem:[#allocation2] sm:$0xff] }
 0x139   : > { %v480_v12 = vsel %vm447_vm3, %v469_v8, %v471_v10  ;;  %495 = vst.msk [vmem:[#allocation2 + $0x10] sm:$0xfe] %vm445_vm6, %v471_v10  ;;  %v588_v13 = vmul.f32 %v1407_v55, %v1432_v11  ;;  %v537_v14 = vmul.f32 %v530_v59, %v1432_v11  ;;  %v1482_v39 = vld [vmem:[#allocation2] sm:$0xfe] }
 0x13a   : > { %494 = vst [vmem:[#allocation2 + $0x8] sm:$0xfe] %v480_v12  ;;  %v1484_v40 = vld [vmem:[#allocation2] sm:$0xfc]  ;;  %v682_v46 = vmul.f32 %v1420_v0, %v1482_v39  ;;  %v636_v51 = vmul.f32 %v632_v28, %v1482_v39 }
 0x13b   : > { %600 = vrot.lane.b32.xlu0 %v588_v13, %s1221_s10  ;;  %549 = vrot.lane.b32.xlu2 %v537_v14, %s1222_s11  ;;  %v820_v48 = vmul.f32 %v816_v27, %v1484_v40 }
 0x13c   : > { %v700_v6 = vrot.slane %v682_v46, 1  ;;  %v649_v13 = vrot.slane %v636_v51, 1  ;;  %v688_v51 = vmul.f32 %v1420_v0, %v1470_v32 }
 0x13d   : > { %v833_v8 = vrot.slane %v820_v48, 2 }
 0x13f   : > { %v475_v15 = vpop.permute.xlu1 %474  ;;  %v1461_v25 = vld [vmem:[#allocation2 + $0x18] sm:$0xff] }
 0x140   : > { %v1442_v16 = vsel %vm447_vm3, %v473_v9, %v475_v15  ;;  %499 = vst.msk [vmem:[#allocation2 + $0x28] sm:$0xff] %vm447_vm3, %v475_v15  ;;  %v522_v17 = vld [vmem:[#allocation2 + $0x10] sm:$0xff]  ;;  %v540_v31 = vmul.f32 %v530_v59, %v1461_v25  ;;  %v591_v33 = vmul.f32 %v1407_v55, %v1461_v25  ;;  %v638_v9 = vmul.f32 %v632_v28, %v1461_v25 }
 0x141   : > { %v590_v19 = vmul.f32 %v1416_v62, %v522_v17  ;;  %v539_v20 = vmul.f32 %v1414_v61, %v522_v17  ;;  %v1449_v21 = vld [vmem:[#allocation2 + $0x8] sm:$0xff]  ;;  %v1496_v50 = vld [vmem:[#allocation2 + $0x10] sm:$0xfe]  ;;  %v541_v57 = vmul.f32 %v533_v18, %v1442_v16  ;;  %v639_v10 = vmul.f32 %v633_v35, %v1442_v16 }
 0x142   : > { %v538_v22 = vmul.f32 %v533_v18, %v1449_v21  ;;  %v589_v30 = vmul.f32 %v584_v26, %v1449_v21  ;;  %v1490_v44 = vld [vmem:[#allocation2 + $0x8] sm:$0xfc]  ;;  %v822_v12 = vmul.f32 %v816_v27, %v1461_v25  ;;  %v592_v14 = vmul.f32 %v584_v26, %v1442_v16 }
 0x143   : > { %604 = vrot.lane.b32.xlu2 %v590_v19, %s1221_s10  ;;  %553 = vrot.lane.b32.xlu1 %v539_v20, %s1222_s11  ;;  %v821_v56 = vmul.f32 %v817_v34, %v1490_v44  ;;  %v1507_v59 = vld [vmem:[#allocation2 + $0x8] sm:$0xfe]  ;;  %v823_v18 = vmul.f32 %v817_v34, %v1442_v16  ;;  %v650_v20 = vrot.slane %v638_v9, 1  ;;  %v668_v34 = vld [vmem:[#allocation2 + $0x40] sm:$0x1]  ;;  %v758_v9 = vmul.f32 %v1422_v1, %v1470_v32 }
 0x144   : > { %551 = vrot.lane.b32.xlu0 %v538_v22, %s1222_s11  ;;  %v637_v17 = vmul.f32 %v633_v35, %v1507_v59  ;;  %v653_v22 = vrot.slane %v639_v10, 1  ;;  %v834_v23 = vrot.slane %v822_v12, 2  ;;  %v754_v10 = vmul.f32 %v1424_v3, %v1496_v50 }
 0x145   : > { %v836_v15 = vrot.slane %v821_v56, 2  ;;  %v837_v28 = vrot.slane %v823_v18, 2  ;;  %v1532_v35 = vsel %vm648_vm13, %v649_v13, %v650_v20 }
 0x146   : > { %v1526_v27 = vsel %vm648_vm13, %v653_v22, %v657_v4  ;;  %v1529_v26 = vsel %vm832_vm14, %v834_v23, %v839_v49  ;;  %v1544_v45 = vsel %vm832_vm14, %v833_v8, %v834_v23 }
 0x147   : > { %v1487_v42 = vld [vmem:[#allocation2 + $0x28] sm:$0xff]  ;;  %v1538_v41 = vsel %vm832_vm14, %v836_v15, %v837_v28  ;;  %v1541_v43 = vsel %vm832_vm14, %v837_v28, %v841_v2  ;;  %v1557_v2 = vld [vmem:[#allocation2 + $0x40] sm:$0x3]  ;;  %v779_v15 = vrot.slane %v758_v9, 1 }
 0x148   : > { %v593_v52 = vmul.f32 %v1416_v62, %v1487_v42  ;;  %v542_v53 = vmul.f32 %v1414_v61, %v1487_v42  ;;  %v687_v55 = vmul.f32 %v1409_v58, %v1487_v42  ;;  %v684_v62 = vmul.f32 %v1409_v58, %v1496_v50 }
 0x149   : > { %v685_v61 = vmul.f32 %v1420_v0, %v1461_v25  ;;  %v757_v49 = vmul.f32 %v1424_v3, %v1487_v42  ;;  %v871_v8 = vmul.f32 %v1426_v5, %v1487_v42  ;;  %v874_v12 = vmul.f32 %v1426_v5, %v1557_v2 }
 0x14a   : > { %v707_v19 = vrot.slane %v687_v55, 1  ;;  %v706_v24 = vrot.slane %v684_v62, 1 }
 0x14b   : > { %602 = vrot.lane.b32.xlu1 %v589_v30, %s1221_s10  ;;  %555 = vrot.lane.b32.xlu2 %v540_v31, %s1222_s11  ;;  %v701_v30 = vrot.slane %v685_v61, 1  ;;  %v652_v31 = vrot.slane %v637_v17, 1  ;;  %v777_v56 = vrot.slane %v757_v49, 1  ;;  %v755_v61 = vmul.f32 %v1422_v1, %v1461_v25  ;;  %v851_v49 = vld [vmem:[#allocation2 + $0x10] sm:$0xfc] }
 0x14c   : > { %606 = vrot.lane.b32.xlu0 %v591_v33, %s1221_s10  ;;  %v1523_v33 = vsel %vm648_vm13, %v650_v20, %v655_v54  ;;  %v708_v46 = vsel %vm648_vm13, %v706_v24, %v707_v19  ;;  %v709_v54 = vrot.slane %v688_v51, 1  ;;  %v776_v17 = vrot.slane %v754_v10, 1 }
 0x14d   : > { %v1535_v38 = vsel %vm648_vm13, %v652_v31, %v653_v22  ;;  %v702_v48 = vsel %vm648_vm13, %v700_v6, %v701_v30  ;;  %v771_v13 = vrot.slane %v755_v61, 1  ;;  %v897_v18 = vrot.slane %v874_v12, 2 }
 0x14e   : > { %v710_v4 = vsel %vm648_vm13, %v701_v30, %v709_v54  ;;  %v778_v32 = vsel %vm648_vm13, %v776_v17, %v777_v56  ;;  %v869_v22 = vmul.f32 %v1411_v60, %v1461_v25  ;;  %v932_v17 = vsel %vm583_vm12, %v1430_v7, %v1418_v63 }
 0x14f   : > { %v780_v20 = vsel %vm648_vm13, %v771_v13, %v779_v15 }
 0x150   : > { %v885_v30 = vrot.slane %v869_v22, 2 }
 0x153   : > { %610 = vrot.lane.b32.xlu2 %v593_v52, %s1221_s10  ;;  %559 = vrot.lane.b32.xlu1 %v542_v53, %s1222_s11  ;;  %v690_v52 = vmul.f32 %v1409_v58, %v668_v34  ;;  %v760_v53 = vmul.f32 %v1424_v3, %v668_v34 }
 0x154   : > { %557 = vrot.lane.b32.xlu0 %v541_v57, %s1222_s11 }
 0x155   : > { %v713_v57 = vrot.slane %v690_v52, 1  ;;  %v783_v55 = vrot.slane %v760_v53, 1 }
 0x157   : > { %v714_v62 = vsel %vm648_vm13, %v707_v19, %v713_v57  ;;  %v784_v6 = vsel %vm648_vm13, %v777_v56, %v783_v55  ;;  %v678_v19 = vsel %vm447_vm3, %v1420_v0, %v1409_v58  ;;  %v872_v58 = vmul.f32 %v1411_v60, %v1466_v29 }
 0x158   : > { %v686_v23 = vmul.f32 %v678_v19, %v1442_v16  ;;  %v752_v0 = vmul.f32 %v1422_v1, %v1482_v39  ;;  %v689_v24 = vmul.f32 %v678_v19, %v1476_v36  ;;  %v683_v22 = vmul.f32 %v678_v19, %v1507_v59 }
 0x159   : > { %v893_v28 = vrot.slane %v872_v58, 2  ;;  %v939_v19 = vmul.f32 %v1430_v7, %v1461_v25 }
 0x15a   : > { %v704_v31 = vrot.slane %v686_v23, 1  ;;  %v770_v34 = vrot.slane %v752_v0, 1  ;;  %v943_v23 = vmul.f32 %v932_v17, %v1478_v37  ;;  %v703_v0 = vrot.slane %v683_v22, 1 }
 0x15b   : > { %719 = vrot.lane.b32.xlu2 %v708_v46, %s1222_s11  ;;  %608 = vrot.lane.b32.xlu1 %v592_v14, %s1221_s10  ;;  %v891_v14 = vrot.slane %v871_v8, 2  ;;  %v748_v46 = vsel %vm583_vm12, %v1422_v1, %v1424_v3  ;;  %v894_v51 = vsel %vm832_vm14, %v885_v30, %v893_v28  ;;  %v868_v3 = vmul.f32 %v1426_v5, %v851_v49 }
 0x15c   : > { %715 = vrot.lane.b32.xlu0 %v702_v48, %s1222_s11  ;;  %v711_v48 = vrot.slane %v689_v24, 1  ;;  %v772_v52 = vsel %vm648_vm13, %v770_v34, %v771_v13  ;;  %v756_v53 = vmul.f32 %v748_v46, %v1442_v16  ;;  %v753_v56 = vmul.f32 %v748_v46, %v1507_v59 }
 0x15d   : > { %v898_v50 = vsel %vm832_vm14, %v891_v14, %v897_v18  ;;  %v759_v1 = vmul.f32 %v748_v46, %v1476_v36  ;;  %v705_v59 = vsel %vm648_vm13, %v703_v0, %v704_v31  ;;  %v941_v34 = vmul.f32 %v1418_v63, %v1487_v42 }
 0x15e   : > { %v712_v39 = vsel %vm648_vm13, %v704_v31, %v711_v48  ;;  %v774_v54 = vrot.slane %v756_v53, 1  ;;  %v773_v57 = vrot.slane %v753_v56, 1  ;;  %v938_v46 = vmul.f32 %v1418_v63, %v851_v49 }
 0x15f   : > { %v781_v55 = vrot.slane %v759_v1, 1  ;;  %v944_v31 = vmul.f32 %v1418_v63, %v1557_v2  ;;  %v955_v48 = vrot.slane %v939_v19, 2  ;;  %v936_v63 = vmul.f32 %v1430_v7, %v1484_v40 }
 0x160   : > { %v775_v36 = vsel %vm648_vm13, %v773_v57, %v774_v54  ;;  %v960_v42 = vrot.slane %v938_v46, 2 }
 0x161   : > { %v782_v61 = vsel %vm648_vm13, %v774_v54, %v781_v55  ;;  %v967_v53 = vrot.slane %v944_v31, 2  ;;  %v954_v49 = vrot.slane %v936_v63, 2  ;;  %v508_v55 = vld [vmem:[%s1715_s4] ss:$8 sm:$0x3] }
 0x163   : > { %721 = vrot.lane.b32.xlu2 %v710_v4, %s1222_s11  ;;  %725 = vrot.lane.b32.xlu1 %v714_v62, %s1222_s11  ;;  %v890_v4 = vrot.slane %v868_v3, 2  ;;  %v862_v62 = vsel %vm447_vm3, %v1411_v60, %v1426_v5  ;;  %v866_v5 = vmul.f32 %v1411_v60, %v1484_v40  ;;  %v956_v1 = vsel %vm832_vm14, %v954_v49, %v955_v48 }
 0x164   : > { %795 = vrot.lane.b32.xlu0 %v784_v6, %s1221_s10  ;;  %v870_v8 = vmul.f32 %v862_v62, %v1442_v16  ;;  %v867_v9 = vmul.f32 %v862_v62, %v1490_v44  ;;  %v873_v10 = vmul.f32 %v862_v62, %v1478_v37  ;;  %v510_v62 = vperm.slane %v508_v55, 0 }
 0x165   : > { %v892_v6 = vsel %vm832_vm14, %v890_v4, %v891_v14  ;;  %v884_v15 = vrot.slane %v866_v5, 2 }
 0x166   : > { %v888_v12 = vrot.slane %v870_v8, 2  ;;  %v887_v13 = vrot.slane %v867_v9, 2  ;;  %v895_v14 = vrot.slane %v873_v10, 2 }
 0x168   : > { %v896_v18 = vsel %vm832_vm14, %v888_v12, %v895_v14  ;;  %v889_v60 = vsel %vm832_vm14, %v887_v13, %v888_v12 }
 0x16b   : > { %791 = vrot.lane.b32.xlu2 %v780_v20, %s1221_s10  ;;  %789 = vrot.lane.b32.xlu1 %v778_v32, %s1221_s10  ;;  %v886_v20 = vsel %vm832_vm14, %v884_v15, %v885_v30  ;;  %v940_v32 = vmul.f32 %v932_v17, %v1442_v16  ;;  %v965_v30 = vrot.slane %v943_v23, 2 }
 0x16c   : > { %909 = vrot.lane.b32.xlu0 %v898_v50, %s1222_s11  ;;  %v937_v50 = vmul.f32 %v932_v17, %v1490_v44  ;;  %v942_v44 = vmul.f32 %v1430_v7, %v1466_v29  ;;  %v514_v7 = vmul.f32 %v510_v62, %v1432_v11 }
 0x16d   : > { %v958_v58 = vrot.slane %v940_v32, 2 }
 0x16e   : > { %v957_v24 = vrot.slane %v937_v50, 2 }
 0x16f   : > { %v966_v28 = vsel %vm832_vm14, %v958_v58, %v965_v30 }
 0x170   : > { %v959_v37 = vsel %vm832_vm14, %v957_v24, %v958_v58  ;;  %v516_v58 = vmul.f32 %v510_v62, %v1461_v25 }
 0x173   : > { %905 = vrot.lane.b32.xlu2 %v894_v51, %s1222_s11  ;;  %785 = vrot.lane.b32.xlu1 %v772_v52, %s1221_s10  ;;  %v961_v51 = vrot.slane %v941_v34, 2  ;;  %v963_v52 = vrot.slane %v942_v44, 2 }
 0x174   : > { %723 = vrot.lane.b32.xlu0 %v712_v39, %s1222_s11 }
 0x175   : > { %v964_v39 = vsel %vm832_vm14, %v955_v48, %v963_v52  ;;  %v962_v56 = vsel %vm832_vm14, %v960_v42, %v961_v51  ;;  %v968_v29 = vsel %vm832_vm14, %v961_v51, %v967_v53 }
 0x17b   : > { %793 = vrot.lane.b32.xlu2 %v782_v61, %s1221_s10  ;;  %903 = vrot.lane.b32.xlu1 %v892_v6, %s1222_s11  ;;  %v511_v61 = vperm.slane %v508_v55, 1 }
 0x17c   : > { %787 = vrot.lane.b32.xlu0 %v775_v36, %s1221_s10 }
 0x17d   : > { %v515_v40 = vmul.f32 %v511_v61, %v1449_v21  ;;  %v517_v0 = vmul.f32 %v511_v61, %v1442_v16 }
 0x183   : > { %907 = vrot.lane.b32.xlu2 %v896_v18, %s1222_s11  ;;  %899 = vrot.lane.b32.xlu1 %v886_v20, %s1222_s11 }
 0x184   : > { %901 = vrot.lane.b32.xlu0 %v889_v60, %s1222_s11 }
 0x18b   : > { %977 = vrot.lane.b32.xlu2 %v966_v28, %s1221_s10  ;;  %717 = vrot.lane.b32.xlu1 %v705_v59, %s1222_s11 }
 0x18c   : > { %971 = vrot.lane.b32.xlu0 %v959_v37, %s1221_s10 }
 0x193   : > { %975 = vrot.lane.b32.xlu2 %v964_v39, %s1221_s10  ;;  %973 = vrot.lane.b32.xlu1 %v962_v56, %s1221_s10 }
 0x194   : > { %979 = vrot.lane.b32.xlu0 %v968_v29, %s1221_s10 }
 0x195   : > { %v550_v2 = vpop.permute.xlu2 %549 }
 0x19b   : > { %969 = vrot.lane.b32.xlu1 %v956_v1, %s1221_s10 }
 0x19d   : > { %v605_v3 = vpop.permute.xlu2 %604 }
 0x1a5   : > { %v556_v54 = vpop.permute.xlu2 %555 }
 0x1ad   : > { %v601_v57 = vpop.permute.xlu0 %600  ;;  %v611_v4 = vpop.permute.xlu2 %610 }
 0x1b5   : > { %v554_v6 = vpop.permute.xlu1 %553  ;;  %v720_v12 = vpop.permute.xlu2 %719 }
 0x1b6   : > { %v552_v8 = vpop.permute.xlu0 %551 }
 0x1b7   : > { %v562_v36 = vsel %vm561_vm15, %v550_v2, %v552_v8  ;;  %v563_v9 = vsel %vm561_vm15, %v552_v8, %v554_v6 }
 0x1b8   : > { %v570_v10 = vadd.f32 %v562_v36, %v514_v7  ;;  %v571_v5 = vadd.f32 %v563_v9, %v515_v40 }
 0x1bd   : > { %v603_v13 = vpop.permute.xlu1 %602  ;;  %v722_v22 = vpop.permute.xlu2 %721 }
 0x1be   : > { %v613_v14 = vsel %vm612_vm0, %v601_v57, %v603_v13  ;;  %v614_v15 = vsel %vm612_vm0, %v603_v13, %v605_v3  ;;  %v607_v17 = vpop.permute.xlu0 %606 }
 0x1bf   : > { %v621_v18 = vadd.f32 %v613_v14, %v570_v10  ;;  %v622_v20 = vadd.f32 %v614_v15, %v571_v5 }
 0x1c1   : > { %v663_v11 = vadd.f32 %v1532_v35, %v621_v18  ;;  %v664_v21 = vadd.f32 %v1535_v38, %v622_v20 }
 0x1c5   : > { %v560_v32 = vpop.permute.xlu1 %559  ;;  %v792_v37 = vpop.permute.xlu2 %791 }
 0x1c6   : > { %v558_v60 = vpop.permute.xlu0 %557 }
 0x1c7   : > { %v564_v50 = vsel %vm561_vm15, %v556_v54, %v558_v60  ;;  %v565_v23 = vsel %vm561_vm15, %v558_v60, %v560_v32 }
 0x1c8   : > { %v572_v24 = vadd.f32 %v564_v50, %v516_v58  ;;  %v573_v30 = vadd.f32 %v565_v23, %v517_v0 }
 0x1cd   : > { %v609_v28 = vpop.permute.xlu1 %608  ;;  %v906_v25 = vpop.permute.xlu2 %905 }
 0x1ce   : > { %v615_v59 = vsel %vm612_vm0, %v607_v17, %v609_v28  ;;  %v616_v35 = vsel %vm612_vm0, %v609_v28, %v611_v4  ;;  %v716_v19 = vpop.permute.xlu0 %715 }
 0x1cf   : > { %v623_v38 = vadd.f32 %v615_v59, %v572_v24  ;;  %v624_v34 = vadd.f32 %v616_v35, %v573_v30 }
 0x1d1   : > { %v665_v44 = vadd.f32 %v1523_v33, %v623_v38  ;;  %v666_v46 = vadd.f32 %v1526_v27, %v624_v34 }
 0x1d5   : > { %v726_v31 = vpop.permute.xlu1 %725  ;;  %v794_v52 = vpop.permute.xlu2 %793 }
 0x1d6   : > { %v796_v48 = vpop.permute.xlu0 %795  ;;  %v799_v2 = vsel %vm612_vm0, %v792_v37, %v794_v52 }
 0x1d7   : > { %v800_v33 = vsel %vm612_vm0, %v794_v52, %v796_v48 }
 0x1dd   : > { %v790_v51 = vpop.permute.xlu1 %789  ;;  %v908_v57 = vpop.permute.xlu2 %907 }
 0x1de   : > { %v910_v16 = vpop.permute.xlu0 %909  ;;  %v913_v14 = vsel %vm561_vm15, %v906_v25, %v908_v57 }
 0x1df   : > { %v914_v20 = vsel %vm561_vm15, %v908_v57, %v910_v16 }
 0x1e5   : > { %v786_v42 = vpop.permute.xlu1 %785  ;;  %v978_v61 = vpop.permute.xlu2 %977 }
 0x1e6   : > { %v724_v53 = vpop.permute.xlu0 %723 }
 0x1e7   : > { %v729_v39 = vsel %vm561_vm15, %v722_v22, %v724_v53  ;;  %v730_v56 = vsel %vm561_vm15, %v724_v53, %v726_v31 }
 0x1e8   : > { %v737_v29 = vadd.f32 %v729_v39, %v665_v44  ;;  %v738_v63 = vadd.f32 %v730_v56, %v666_v46 }
 0x1ea   : > { %v807_v49 = vadd.f32 %v799_v2, %v737_v29  ;;  %v808_v27 = vadd.f32 %v800_v33, %v738_v63 }
 0x1ec   : > { %v849_v1 = vadd.f32 %v1529_v26, %v807_v49  ;;  %v850_v3 = vadd.f32 %v1541_v43, %v808_v27 }
 0x1ed   : > { %v904_v54 = vpop.permute.xlu1 %903  ;;  %v976_v13 = vpop.permute.xlu2 %975 }
 0x1ee   : > { %v788_v55 = vpop.permute.xlu0 %787  ;;  %v921_v18 = vadd.f32 %v913_v14, %v849_v1  ;;  %v922_v50 = vadd.f32 %v914_v20, %v850_v3 }
 0x1ef   : > { %v797_v10 = vsel %vm612_vm0, %v786_v42, %v788_v55  ;;  %v798_v26 = vsel %vm612_vm0, %v788_v55, %v790_v51 }
 0x1f5   : > { %v900_v4 = vpop.permute.xlu1 %899 }
 0x1f6   : > { %v902_v62 = vpop.permute.xlu0 %901 }
 0x1f7   : > { %v911_v59 = vsel %vm561_vm15, %v900_v4, %v902_v62 }
 0x1fd   : > { %v718_v6 = vpop.permute.xlu1 %717 }
 0x1fe   : > { %v727_v7 = vsel %vm561_vm15, %v716_v19, %v718_v6  ;;  %v728_v40 = vsel %vm561_vm15, %v718_v6, %v720_v12  ;;  %v972_v8 = vpop.permute.xlu0 %971  ;;  %v912_v12 = vsel %vm561_vm15, %v902_v62, %v904_v54 }
 0x1ff   : > { %v735_v36 = vadd.f32 %v727_v7, %v663_v11  ;;  %v736_v9 = vadd.f32 %v728_v40, %v664_v21  ;;  %v983_v11 = vsel %vm612_vm0, %v976_v13, %v978_v61 }
 0x200   : > { %v991_v0 = vadd.f32 %v983_v11, %v921_v18 }
 0x201   : > { %v805_v5 = vadd.f32 %v797_v10, %v735_v36  ;;  %v806_v43 = vadd.f32 %v798_v26, %v736_v9 }
 0x202   : > { %v1021_v51 = vmul.f32 %v991_v0, %v991_v0 }
 0x203   : > { %v848_v15 = vadd.f32 %v1538_v41, %v806_v43  ;;  %v847_v17 = vadd.f32 %v1544_v45, %v805_v5 }
 0x205   : > { %v920_v21 = vadd.f32 %v912_v12, %v848_v15  ;;  %v974_v32 = vpop.permute.xlu1 %973  ;;  %v919_v38 = vadd.f32 %v911_v59, %v847_v17 }
 0x206   : > { %v982_v22 = vsel %vm612_vm0, %v972_v8, %v974_v32  ;;  %v980_v60 = vpop.permute.xlu0 %979 }
 0x207   : > { %v990_v23 = vadd.f32 %v982_v22, %v920_v21  ;;  %v984_v58 = vsel %vm612_vm0, %v978_v61, %v980_v60 }
 0x208   : > { %v992_v41 = vadd.f32 %v984_v58, %v922_v50 }
 0x209   : > { %v1020_v45 = vmul.f32 %v990_v23, %v990_v23 }
 0x20a   : > { %v994_v24 = vpack.c.bf16 %v992_v41, %v991_v0  ;;  %v1004_v30 = vadd.f32 %v992_v41, %v990_v23  ;;  %v1022_v28 = vmul.f32 %v992_v41, %v992_v41 }
 0x20c   : > { %996 = vst [vmem:[%s259_s20 + $0x8] sm:$0xff] %v994_v24  ;;  %v1005_v35 = vrot.slane %v1004_v30, 4  ;;  %v1030_v19 = vadd.f32 %v1022_v28, %v1020_v45 }
 0x20d   : > { %v970_v34 = vpop.permute.xlu1 %969 }
 0x20e   : > { %v1006_v37 = vadd.f32 %v1005_v35, %v1004_v30  ;;  %v1031_v44 = vrot.slane %v1030_v19, 4  ;;  %v981_v46 = vsel %vm612_vm0, %v970_v34, %v972_v8 }
 0x20f   : > { %v989_v31 = vadd.f32 %v981_v46, %v919_v38 }
 0x210   : > { %v1007_v48 = vrot.slane %v1006_v37, 2  ;;  %v1032_v25 = vadd.f32 %v1031_v44, %v1030_v19 }
 0x211   : > { %v993_v16 = vpack.c.bf16 %v990_v23, %v989_v31  ;;  %v997_v52 = vadd.f32 %v991_v0, %v989_v31  ;;  %v1019_v42 = vmul.f32 %v989_v31, %v989_v31 }
 0x212   : > { %v1008_v53 = vadd.f32 %v1007_v48, %v1006_v37  ;;  %v1033_v39 = vrot.slane %v1032_v25, 2 }
 0x213   : > { %995 = vst [vmem:[%s259_s20] sm:$0xff] %v993_v16  ;;  %v998_v56 = vrot.slane %v997_v52, 4  ;;  %v1023_v29 = vadd.f32 %v1021_v51, %v1019_v42 }
 0x214   : > { %v1034_v63 = vadd.f32 %v1033_v39, %v1032_v25  ;;  %v1009_v2 = vrot.slane %v1008_v53, 1 }
 0x215   : > { %v999_v33 = vadd.f32 %v998_v56, %v997_v52  ;;  %v1024_v49 = vrot.slane %v1023_v29, 4 }
 0x216   : > { %v1035_v27 = vrot.slane %v1034_v63, 1  ;;  %v1010_v54 = vadd.f32 %v1009_v2, %v1008_v53 }
 0x217   : > { %v1000_v1 = vrot.slane %v999_v33, 2  ;;  %v1025_v3 = vadd.f32 %v1024_v49, %v1023_v29 }
 0x218   : > { %v1036_v4 = vadd.f32 %v1035_v27, %v1034_v63  ;;  %v1013_v6 = vrot.slane %v1010_v54, 7 }
 0x219   : > { %v1001_v57 = vadd.f32 %v1000_v1, %v999_v33  ;;  %v1026_v55 = vrot.slane %v1025_v3, 2 }
 0x21a   : > { %v1039_v8 = vrot.slane %v1036_v4, 7 }
 0x21b   : > { %v1002_v62 = vrot.slane %v1001_v57, 1  ;;  %v1027_v61 = vadd.f32 %v1026_v55, %v1025_v3 }
 0x21d   : > { %v1003_v7 = vadd.f32 %v1002_v62, %v1001_v57  ;;  %v1028_v40 = vrot.slane %v1027_v61, 1 }
 0x21f   : > { %v1014_v36 = vsel %vm461_vm1, %v1003_v7, %v1013_v6  ;;  %v1029_v9 = vadd.f32 %v1028_v40, %v1027_v61 }
 0x220   : > { %1018 = vst.msk [vmem:[%s264_s26] ss:$2 sm:$0x3] %vm1016_vm2, %v1014_v36 }
 0x221   : > { %v1040_v10 = vsel %vm461_vm1, %v1029_v9, %v1039_v8 }
 0x222   : > { %1159 = vst.msk [vmem:[%s264_s26 + $0x1] ss:$2 sm:$0x3] %vm1016_vm2, %v1040_v10 }
 0x223 PF: > { %s17_s21 = sadd.s32 1, %s1216_s21  }
 0x224   : > { %p14_p4 = scmp.ge.s32.totalorder %s17_s21, 4  }
 0x226   :  { %16 = sbr.rel (!%p14_p4) target bundleno = 1 (0x1), region = 92 }

// kernel: efficientnet_block.7
= control target key start
LH: loop header
LB: loop body
LE: loop exit
PB: predicated region body
PF: predicated region fallthrough
CT: control target
= control target key end

     0   :  { %vm49_vm0 = vcmask 523264   ;;  %s130_s0 = inlined_call_operand.vmem [shape: bf16[32,64], index: 0, kind: input, shape index: {}]   ;;  %s131_s2 = inlined_call_operand.vmem [shape: f32[1,64], index: 2, kind: input, shape index: {}]   ;;  %s132_s3 = inlined_call_operand.vmem [shape: f32[1,64], index: 3, kind: input, shape index: {}]   ;;  %s133_s1 = inlined_call_operand.vmem [shape: f32[32,64], index: 1, kind: input, shape index: {}]   ;;  %s134_s4 = inlined_call_operand.vmem [shape: f32[32,64], index: 4, kind: output, shape index: {}]  }
   0x1   :  { %v59_v0 = vld [vmem:[%s130_s0] sm:$0xff]   ;;  %v66_v5 = vld [vmem:[%s130_s0 + $0x8] sm:$0xff]   ;;  %v43_v16 = vld [vmem:[%s133_s1 + $0x10] sm:$0xff] }
   0x2   :  { %v67_v1 = vld [vmem:[%s131_s2] ss:$0 sm:$0xff]  ;;  %v60_v2 = vunpack.c.l.bf16 %v59_v0  ;;  %v61_v4 = vunpack.c.h.bf16 %v59_v0  ;;  %v64_v8 = vunpack.c.l.bf16 %v66_v5  ;;  %v65_v9 = vunpack.c.h.bf16 %v66_v5  ;;  %v42_v11 = vld [vmem:[%s133_s1 + $0x8] sm:$0xff]  ;;  %v44_v17 = vld [vmem:[%s133_s1 + $0x18] sm:$0xff] }
   0x3   :  { %v68_v3 = vld [vmem:[%s132_s3] ss:$0 sm:$0xff] }
   0x4   :  { %v29_v6 = vmul.f32 %v67_v1, %v60_v2  ;;  %v30_v7 = vmul.f32 %v67_v1, %v61_v4  ;;  %v41_v10 = vld [vmem:[%s133_s1] sm:$0xff]  ;;  %v31_v14 = vmul.f32 %v67_v1, %v64_v8  ;;  %v32_v15 = vmul.f32 %v67_v1, %v65_v9 }
   0x6   :  { %v37_v12 = vadd.f32 %v68_v3, %v29_v6  ;;  %v38_v13 = vadd.f32 %v68_v3, %v30_v7  ;;  %v39_v20 = vadd.f32 %v68_v3, %v31_v14  ;;  %v40_v21 = vadd.f32 %v68_v3, %v32_v15 }
   0x8   :  { %v45_v18 = vadd.f32 %v41_v10, %v37_v12  ;;  %v46_v19 = vadd.f32 %v42_v11, %v38_v13  ;;  %v47_v22 = vadd.f32 %v43_v16, %v39_v20  ;;  %v48_v23 = vadd.f32 %v44_v17, %v40_v21 }
   0xa   :  { %50 = vst.msk [vmem:[%s134_s4] sm:$0xff] %vm49_vm0, %v45_v18 }
   0xb   :  { %51 = vst.msk [vmem:[%s134_s4 + $0x8] sm:$0xff] %vm49_vm0, %v46_v19 }
   0xc   :  { %52 = vst.msk [vmem:[%s134_s4 + $0x10] sm:$0xff] %vm49_vm0, %v47_v22 }
   0xd   :  { %53 = vst.msk [vmem:[%s134_s4 + $0x18] sm:$0xff] %vm49_vm0, %v48_v23 }

// kernel: efficientnet_block.6
= control target key start
LH: loop header
LB: loop body
LE: loop exit
PB: predicated region body
PF: predicated region fallthrough
CT: control target
= control target key end

     0   :  { %s1058_s17 = smov 0   ;;  %s1377_s0 = inlined_call_operand.vmem [shape: bf16[2,16,256], index: 0, kind: input, shape index: {}]   ;;  %s1378_s1 = inlined_call_operand.vmem [shape: f32[1,256], index: 1, kind: input, shape index: {}]   ;;  %s1379_s2 = inlined_call_operand.vmem [shape: f32[1,256], index: 2, kind: input, shape index: {}]   ;;  %s1380_s3 = inlined_call_operand.vmem [shape: f32[256,16], index: 3, kind: input, shape index: {}]   ;;  %s1381_s4 = inlined_call_operand.vmem [shape: f32[16,4], index: 4, kind: input, shape index: {}]   ;;  %s1382_s5 = inlined_call_operand.vmem [shape: f32[1,4], index: 5, kind: input, shape index: {}]   ;;  %s1383_s6 = inlined_call_operand.vmem [shape: f32[4,16], index: 6, kind: input, shape index: {}]   ;;  %s1384_s7 = inlined_call_operand.vmem [shape: f32[1,16], index: 7, kind: input, shape index: {}]   ;;  %s1385_s8 = inlined_call_operand.vmem [shape: f32[16,256], index: 8, kind: input, shape index: {}]   ;;  %s1386_s9 = inlined_call_operand.vmem [shape: f32[256,64], index: 9, kind: input, shape index: {}]   ;;  %s1387_s10 = inlined_call_operand.vmem [shape: bf16[2,16,64], index: 10, kind: output, shape index: {0}]   ;;  %s1388_s11 = inlined_call_operand.vmem [shape: f32[2,2,64], index: 11, kind: output, shape index: {1}]  }
   0x1 LB: > { %s933_s18 = sadd.s32 4294967295, %s996_s17   ;;  %p937_p0 = scmp.ge.s32.totalorder %s996_s17, 1  ;;  %s996_s17 = sphi %s1058_s17, %s22_s17  }
   0x2   : > { %p340_p1 = scmp.lt.s32.totalorder %s996_s17, 3 }
   0x4   : > { %p341_p2 = pnand %p937_p0, %p340_p1 }
   0x5   : > { %p384_p3 = scmp.lt.s32.totalorder (!%p341_p2), %s933_s18, 1 }
   0x6   : > { %344 = sbr.rel (%p341_p2) target bundleno = 816 (0x330), region = 60 }
   0xb   : > { %v533_v0 = vld [vmem:[%s1380_s3 + $0x78] sm:$0xff]  ;;  %v532_v2 = vld [vmem:[%s1380_s3 + $0x70] sm:$0xff]  ;;  %v531_v4 = vld [vmem:[%s1380_s3 + $0x68] sm:$0xff]  ;;  %s1400_s18 = smov (!%p384_p3, %s933_s18), 1 }
   0xc   : > { %v549_v1 = vld [vmem:[%s1380_s3 + $0xf8] sm:$0xff]  ;;  %550 = vmatpush.msra.mxu0 %v533_v0  ;;  %v548_v3 = vld [vmem:[%s1380_s3 + $0xf0] sm:$0xff]  ;;  %v547_v5 = vld [vmem:[%s1380_s3 + $0xe8] sm:$0xff]  ;;  %s956_s16 = sshll.u32 %s1400_s18, 4  ;;  %s957_s20 = sshll.u32 %s1400_s18, 3 }
   0xd   : > { %570 = vmatpush.msra.mxu1 %v549_v1  ;;  %v530_v6 = vld [vmem:[%s1380_s3 + $0x60] sm:$0xff]  ;;  %v529_v8 = vld [vmem:[%s1380_s3 + $0x58] sm:$0xff]  ;;  %s388_s25 = scalar_lea.vmem %s1377_s0, %s956_s16  ;;  %v528_v10 = vld [vmem:[%s1380_s3 + $0x50] sm:$0xff]  ;;  %s393_s23 = scalar_lea.vmem %s1387_s10, %s957_s20 }
   0xe   : > { %551 = vmatpush.msra.mxu0 %v532_v2  ;;  %v546_v7 = vld [vmem:[%s1380_s3 + $0xe0] sm:$0xff]  ;;  %v545_v9 = vld [vmem:[%s1380_s3 + $0xd8] sm:$0xff]  ;;  %v544_v11 = vld [vmem:[%s1380_s3 + $0xd0] sm:$0xff]  ;;  %s942_s24 = sshll.u32 %s1400_s18, 1 }
   0xf   : > { %571 = vmatpush.msra.mxu1 %v548_v3  ;;  %v527_v12 = vld [vmem:[%s1380_s3 + $0x48] sm:$0xff]  ;;  %v398_v14 = vld [vmem:[%s388_s25] sm:$0xff]  ;;  %v525_v28 = vld [vmem:[%s1380_s3 + $0x38] sm:$0xff]  ;;  %s397_s27 = scalar_lea.vmem %s1388_s11, %s942_s24 }
  0x10   : > { %552 = vmatpush.msra.mxu0 %v531_v4  ;;  %v543_v13 = vld [vmem:[%s1380_s3 + $0xc8] sm:$0xff]  ;;  %v400_v16 = vunpack.c.l.bf16 %v398_v14  ;;  %v404_v17 = vld [vmem:[%s1378_s1] sm:$0x3]  ;;  %v401_v19 = vunpack.c.h.bf16 %v398_v14  ;;  %v541_v29 = vld [vmem:[%s1380_s3 + $0xb8] sm:$0xff] }
  0x11   : > { %572 = vmatpush.msra.mxu1 %v547_v5  ;;  %v399_v15 = vld [vmem:[%s388_s25 + $0x8] sm:$0xff]  ;;  %v414_v18 = vld [vmem:[%s1379_s2] sm:$0x3]  ;;  %v406_v23 = vperm.slane %v404_v17, 0  ;;  %v407_v26 = vperm.slane %v404_v17, 1  ;;  %v524_v34 = vld [vmem:[%s1380_s3 + $0x30] sm:$0xff] }
  0x12   : > { %553 = vmatpush.msra.mxu0 %v530_v6  ;;  %v526_v20 = vld [vmem:[%s1380_s3 + $0x40] sm:$0xff]  ;;  %v402_v22 = vunpack.c.l.bf16 %v399_v15  ;;  %v416_v24 = vperm.slane %v414_v18, 0  ;;  %v403_v25 = vunpack.c.h.bf16 %v399_v15  ;;  %v417_v27 = vperm.slane %v414_v18, 1  ;;  %v540_v35 = vld [vmem:[%s1380_s3 + $0xb0] sm:$0xff]  ;;  %v523_v40 = vld [vmem:[%s1380_s3 + $0x28] sm:$0xff] }
  0x13   : > { %573 = vmatpush.msra.mxu1 %v546_v7  ;;  %v542_v21 = vld [vmem:[%s1380_s3 + $0xc0] sm:$0xff]  ;;  %v410_v30 = vmul.f32 %v406_v23, %v400_v16  ;;  %v411_v32 = vmul.f32 %v407_v26, %v401_v19  ;;  %v539_v41 = vld [vmem:[%s1380_s3 + $0xa8] sm:$0xff]  ;;  %v521_v48 = vld [vmem:[%s1380_s3 + $0x18] sm:$0xff] }
  0x14   : > { %554 = vmatpush.msra.mxu0 %v529_v8  ;;  %v412_v31 = vmul.f32 %v406_v23, %v402_v22  ;;  %v413_v33 = vmul.f32 %v407_v26, %v403_v25  ;;  %v522_v46 = vld [vmem:[%s1380_s3 + $0x20] sm:$0xff]  ;;  %v537_v49 = vld [vmem:[%s1380_s3 + $0x98] sm:$0xff]  ;;  %v520_v50 = vld [vmem:[%s1380_s3 + $0x10] sm:$0xff] }
  0x15   : > { %574 = vmatpush.msra.mxu1 %v545_v9  ;;  %v1138_v36 = vadd.f32 %v416_v24, %v410_v30  ;;  %v1142_v38 = vadd.f32 %v417_v27, %v411_v32  ;;  %v538_v47 = vld [vmem:[%s1380_s3 + $0xa0] sm:$0xff]  ;;  %v536_v51 = vld [vmem:[%s1380_s3 + $0x90] sm:$0xff]  ;;  %v519_v53 = vld [vmem:[%s1380_s3 + $0x8] sm:$0xff] }
  0x16   : > { %555 = vmatpush.msra.mxu0 %v528_v10  ;;  %v1140_v37 = vadd.f32 %v416_v24, %v412_v31  ;;  %v1144_v39 = vadd.f32 %v417_v27, %v413_v33  ;;  %v535_v54 = vld [vmem:[%s1380_s3 + $0x88] sm:$0xff]  ;;  %v518_v58 = vld [vmem:[%s1380_s3] sm:$0xff] }
  0x17   : > { %575 = vmatpush.msra.mxu1 %v544_v11  ;;  %v943_v42 = vmul.f32 -1.442695, %v1138_v36  ;;  %v944_v44 = vmul.f32 -1.442695, %v1142_v38  ;;  %v534_v59 = vld [vmem:[%s1380_s3 + $0x80] sm:$0xff]  ;;  %v592_v5 = vld [vmem:[%s1381_s4 + $0x8] sm:$0xff] }
  0x18   : > { %556 = vmatpush.msra.mxu0 %v527_v12  ;;  %v945_v43 = vmul.f32 -1.442695, %v1140_v37  ;;  %v946_v45 = vmul.f32 -1.442695, %v1144_v39  ;;  %v687_v25 = vld [vmem:[%s1385_s8] sm:$0xff]  ;;  %v753_v33 = vld [vmem:[%s1386_s9 + $0x68] sm:$0xff] }
  0x19   : > { %576 = vmatpush.msra.mxu1 %v543_v13  ;;  %966 = vpow2.f32 %v943_v42 }
  0x1a   : > { %557 = vmatpush.msra.mxu0 %v526_v20  ;;  %968 = vpow2.f32 %v945_v43 }
  0x1b   : > { %577 = vmatpush.msra.mxu1 %v542_v21  ;;  %970 = vpow2.f32 %v944_v44 }
  0x1c   : > { %558 = vmatpush.msra.mxu0 %v525_v28  ;;  %972 = vpow2.f32 %v946_v45 }
  0x1d   : > { %578 = vmatpush.msra.mxu1 %v541_v29 }
  0x1e   : > { %559 = vmatpush.msra.mxu0 %v524_v34 }
  0x1f   : > { %579 = vmatpush.msra.mxu1 %v540_v35  ;;  %v967_v52 = vpop.eup %966 }
  0x20   : > { %560 = vmatpush.msra.mxu0 %v523_v40  ;;  %v969_v55 = vpop.eup %968  ;;  %v436_v56 = vadd.f32 1.0, %v967_v52 }
  0x21   : > { %580 = vmatpush.msra.mxu1 %v539_v41  ;;  %v971_v57 = vpop.eup %970  ;;  %v438_v60 = vadd.f32 1.0, %v969_v55 }
  0x22   : > { %561 = vmatpush.msra.mxu0 %v522_v46  ;;  %v973_v61 = vpop.eup %972  ;;  %974 = vrcp.f32 %v436_v56  ;;  %v437_v62 = vadd.f32 1.0, %v971_v57  ;;  %v449_v0 = vand.u32 2147483647, %v436_v56  ;;  %v451_v1 = vand.u32 2147483648, %v436_v56 }
  0x23   : > { %581 = vmatpush.msra.mxu1 %v538_v47  ;;  %976 = vrcp.f32 %v438_v60  ;;  %v439_v63 = vadd.f32 1.0, %v973_v61  ;;  %v479_v3 = vand.u32 2147483647, %v438_v60  ;;  %v481_v4 = vand.u32 2147483648, %v438_v60 }
  0x24   : > { %562 = vmatpush.msra.mxu0 %v521_v48  ;;  %978 = vrcp.f32 %v437_v62  ;;  %vm445_vm0 = vweird.f32 %v436_v56  ;;  %vm475_vm1 = vweird.f32 %v438_v60  ;;  %vm1189_vm3 = vcmp.eq.f32.partialorder %v449_v0, 8.507059e+37 }
  0x25   : > { %582 = vmatpush.msra.mxu1 %v537_v49  ;;  %980 = vrcp.f32 %v439_v63  ;;  %v452_v11 = vor.u32 1.1754944e-38, %v451_v1  ;;  %vm1193_vm5 = vcmp.eq.f32.partialorder %v479_v3, 8.507059e+37  ;;  %v482_v15 = vor.u32 1.1754944e-38, %v481_v4 }
  0x26   : > { %563 = vmatpush.msra.mxu0 %v520_v50  ;;  %vm460_vm6 = vweird.f32 %v437_v62  ;;  %v464_v19 = vand.u32 2147483647, %v437_v62  ;;  %v466_v22 = vand.u32 2147483648, %v437_v62  ;;  %vm490_vm8 = vweird.f32 %v439_v63 }
  0x27   : > { %583 = vmatpush.msra.mxu1 %v536_v51  ;;  %v496_v27 = vand.u32 2147483648, %v439_v63  ;;  %v494_v30 = vand.u32 2147483647, %v439_v63 }
  0x28   : > { %564 = vmatpush.msra.mxu0 %v519_v53  ;;  %v975_v2 = vpop.eup %974  ;;  %vm1209_vm12 = vcmp.eq.f32.partialorder %v464_v19, 8.507059e+37  ;;  %v467_v40 = vor.u32 1.1754944e-38, %v466_v22 }
  0x29   : > { %584 = vmatpush.msra.mxu1 %v535_v54  ;;  %v977_v6 = vpop.eup %976  ;;  %v441_v7 = vmul.f32 %v975_v2, %v436_v56  ;;  %vm446_vm2 = vweird.f32 %v975_v2  ;;  %v497_v45 = vor.u32 1.1754944e-38, %v496_v27  ;;  %vm495_vm15 = vcmp.eq.f32.partialorder %v494_v30, 8.507059e+37  ;;  %v639_v27 = vld [vmem:[%s1384_s7] sm:$0x1] }
  0x2a   : > { %565 = vmatpush.msra.mxu0 %v518_v58  ;;  %v471_v8 = vmul.f32 %v977_v6, %v438_v60  ;;  %v979_v12 = vpop.eup %978  ;;  %vm476_vm4 = vweird.f32 %v977_v6  ;;  %vm1198_vm7 = vmor %vm445_vm0, %vm446_vm2  ;;  %vm594_vm0 = vcmask 130048  }
  0x2b   : > { %585 = vmatpush.msra.mxu1 %v534_v59  ;;  %v442_v9 = vsub.f32 1.0, %v441_v7  ;;  %v981_v16 = vpop.eup %980  ;;  %v456_v18 = vmul.f32 %v979_v12, %v437_v62  ;;  %vm1203_vm9 = vmor %vm475_vm1, %vm476_vm4  ;;  %vm461_vm10 = vweird.f32 %v979_v12  ;;  %vm644_vm1 = vcmask 1043456  }
  0x2c   : > { %612 = vmatpush.msrb.mxu0 %v592_v5  ;;  %v472_v13 = vsub.f32 1.0, %v471_v8  ;;  %v486_v23 = vmul.f32 %v981_v16, %v439_v63  ;;  %vm491_vm11 = vweird.f32 %v981_v16  ;;  %vm462_vm13 = vmor %vm460_vm6, %vm461_vm10  ;;  %v593_v5 = vld [vmem:[%s1382_s5] sm:$0x1]  ;;  %vm640_vm6 = vcmask 31744  }
  0x2d   : > { %v443_v17 = vmul.f32 %v975_v2, %v442_v9  ;;  %v457_v26 = vsub.f32 1.0, %v456_v18  ;;  %vm492_vm14 = vmor %vm490_vm8, %vm491_vm11  ;;  %vm820_vm11 = vcmask 519168  }
  0x2e   : > { %v473_v21 = vmul.f32 %v977_v6, %v472_v13  ;;  %v487_v29 = vsub.f32 1.0, %v486_v23  ;;  %v689_v23 = vld [vmem:[%s1385_s8 + $0x10] sm:$0xff] }
  0x2f   : > { %v444_v24 = vadd.f32 %v975_v2, %v443_v17  ;;  %v458_v32 = vmul.f32 %v979_v12, %v457_v26  ;;  %708 = vmatpush.msrb.mxu1 %v689_v23  ;;  %v688_v26 = vld [vmem:[%s1385_s8 + $0x8] sm:$0xff] }
  0x30   : > { %v474_v28 = vadd.f32 %v977_v6, %v473_v21  ;;  %v488_v41 = vmul.f32 %v981_v16, %v487_v29  ;;  %v754_v29 = vld [vmem:[%s1386_s9 + $0x70] sm:$0xff] }
  0x31   : > { %v448_v31 = vsel %vm1198_vm7, %v975_v2, %v444_v24  ;;  %v459_v44 = vadd.f32 %v979_v12, %v458_v32  ;;  %v690_v24 = vld [vmem:[%s1385_s8 + $0x18] sm:$0xff]  ;;  %709 = vmatpush.msrb.mxu1 %v687_v25 }
  0x32   : > { %v453_v34 = vsel %vm1189_vm3, %v452_v11, %v448_v31  ;;  %v478_v35 = vsel %vm1203_vm9, %v977_v6, %v474_v28  ;;  %v489_v47 = vadd.f32 %v981_v16, %v488_v41  ;;  %v638_v6 = vld [vmem:[%s1383_s6] sm:$0xf]  ;;  %728 = vmatpush.msra.mxu2 %v690_v24  ;;  %v755_v28 = vld [vmem:[%s1386_s9 + $0x78] sm:$0xff] }
  0x33   : > { %v483_v42 = vsel %vm1193_vm5, %v482_v15, %v478_v35  ;;  %v1221_v43 = vmul.f32 %v453_v34, %v1138_v36  ;;  %v463_v48 = vsel %vm462_vm13, %v979_v12, %v459_v44  ;;  %949 = vmatpush.msk.msra.mxu3 %vm644_vm1, %v638_v6  ;;  %v771_v31 = vld [vmem:[%s1386_s9 + $0xf8] sm:$0xff]  ;;  %v770_v34 = vld [vmem:[%s1386_s9 + $0xf0] sm:$0xff]  ;;  %v769_v35 = vld [vmem:[%s1386_s9 + $0xe8] sm:$0xff]  ;;  %vm833_vm13 = vcmask 516096  }
  0x34   : > { %v1225_v46 = vmul.f32 %v483_v42, %v1140_v37  ;;  %v468_v50 = vsel %vm1209_vm12, %v467_v40, %v463_v48  ;;  %v493_v51 = vsel %vm492_vm14, %v981_v16, %v489_v47  ;;  %729 = vmatpush.msra.mxu2 %v688_v26  ;;  %v752_v41 = vld [vmem:[%s1386_s9 + $0x60] sm:$0xff]  ;;  %v751_v44 = vld [vmem:[%s1386_s9 + $0x58] sm:$0xff]  ;;  %v750_v47 = vld [vmem:[%s1386_s9 + $0x50] sm:$0xff]  ;;  %vm823_vm12 = vcmask 523264  }
  0x35   : > { %v498_v52 = vsel %vm495_vm15, %v497_v45, %v493_v51  ;;  %v1232_v36 = vmul.f32 %v468_v50, %v1142_v38  ;;  %772 = vmatpush.msrb.mxu3 %v755_v28  ;;  %v768_v42 = vld [vmem:[%s1386_s9 + $0xe0] sm:$0xff]  ;;  %v767_v45 = vld [vmem:[%s1386_s9 + $0xd8] sm:$0xff]  ;;  %v766_v48 = vld [vmem:[%s1386_s9 + $0xd0] sm:$0xff] }
  0x36   : > { %v504_v49 = vadd.f32 %v1225_v46, %v1221_v43  ;;  %v1235_v54 = vmul.f32 %v498_v52, %v1144_v39  ;;  %v591_v39 = vld [vmem:[%s1381_s4] sm:$0xff]  ;;  %795 = vmatpush.msrb.mxu2 %v771_v31  ;;  %v765_v50 = vld [vmem:[%s1386_s9 + $0xc8] sm:$0xff]  ;;  %v742_v6 = vld [vmem:[%s1386_s9 + $0x10] sm:$0xff] }
  0x37   : > { %613 = vmatpush.msrb.mxu0 %v591_v39  ;;  %773 = vmatpush.msrb.mxu3 %v754_v29  ;;  %v748_v52 = vld [vmem:[%s1386_s9 + $0x40] sm:$0xff] }
  0x38   : > { %v505_v53 = vrot.slane %v504_v49, 4  ;;  %v511_v55 = vadd.f32 %v1235_v54, %v1232_v36  ;;  %796 = vmatpush.msrb.mxu2 %v770_v34 }
  0x39   : > { %774 = vmatpush.msrb.mxu3 %v753_v33 }
  0x3a   : > { %v506_v37 = vadd.f32 %v505_v53, %v504_v49  ;;  %v512_v57 = vrot.slane %v511_v55, 4  ;;  %797 = vmatpush.msrb.mxu2 %v769_v35  ;;  %v749_v49 = vld [vmem:[%s1386_s9 + $0x48] sm:$0xff] }
  0x3b   : > { %775 = vmatpush.msrb.mxu3 %v752_v41 }
  0x3c   : > { %v507_v56 = vrot.slane %v506_v37, 2  ;;  %v513_v59 = vadd.f32 %v512_v57, %v511_v55  ;;  %798 = vmatpush.msrb.mxu2 %v768_v42  ;;  %v747_v55 = vld [vmem:[%s1386_s9 + $0x38] sm:$0xff]  ;;  %v746_v57 = vld [vmem:[%s1386_s9 + $0x30] sm:$0xff] }
  0x3d   : > { %776 = vmatpush.msrb.mxu3 %v751_v44 }
  0x3e   : > { %v508_v58 = vadd.f32 %v507_v56, %v506_v37  ;;  %v514_v61 = vrot.slane %v513_v59, 2  ;;  %799 = vmatpush.msrb.mxu2 %v767_v45  ;;  %v764_v37 = vld [vmem:[%s1386_s9 + $0xc0] sm:$0xff]  ;;  %v763_v56 = vld [vmem:[%s1386_s9 + $0xb8] sm:$0xff] }
  0x3f   : > { %777 = vmatpush.msrb.mxu3 %v750_v47 }
  0x40   : > { %v509_v60 = vrot.slane %v508_v58, 1  ;;  %v515_v63 = vadd.f32 %v514_v61, %v513_v59  ;;  %800 = vmatpush.msrb.mxu2 %v766_v48  ;;  %v745_v59 = vld [vmem:[%s1386_s9 + $0x28] sm:$0xff] }
  0x41   : > { %778 = vmatpush.msrb.mxu3 %v749_v49 }
  0x42   : > { %v510_v62 = vadd.f32 %v509_v60, %v508_v58  ;;  %v516_v0 = vrot.slane %v515_v63, 1  ;;  %801 = vmatpush.msrb.mxu2 %v765_v50  ;;  %v762_v58 = vld [vmem:[%s1386_s9 + $0xb0] sm:$0xff]  ;;  %v744_v60 = vld [vmem:[%s1386_s9 + $0x20] sm:$0xff] }
  0x43   : > { %779 = vmatpush.msrb.mxu3 %v748_v52 }
  0x44   : > { %566 = vmatmul.f32.vlgmr.msra.gmra.mxu0 %v510_v62  ;;  %v517_v38 = vadd.f32 %v516_v0, %v515_v63  ;;  %802 = vmatpush.msrb.mxu2 %v764_v37  ;;  %v743_v63 = vld [vmem:[%s1386_s9 + $0x18] sm:$0xff] }
  0x45   : > { %780 = vmatpush.msrb.mxu3 %v747_v55 }
  0x46   : > { %586 = vmatmul.f32.vlgmr.msra.gmra.mxu1 %v517_v38  ;;  %803 = vmatpush.msrb.mxu2 %v763_v56 }
  0x47   : > { %781 = vmatpush.msrb.mxu3 %v746_v57 }
  0x48   : > { %804 = vmatpush.msrb.mxu2 %v762_v58 }
  0x49   : > { %782 = vmatpush.msrb.mxu3 %v745_v59 }
  0x4b   : > { %783 = vmatpush.msrb.mxu3 %v744_v60 }
  0x4d   : > { %784 = vmatpush.msrb.mxu3 %v743_v63 }
  0x4f   : > { %785 = vmatpush.msrb.mxu3 %v742_v6 }
  0xc1   : > { %v567_v1 = vpop.f32.mrf.mxu0 }
  0xc3   : > { %v587_v2 = vpop.f32.mrf.mxu1 }
  0xc4   : > { %v588_v3 = vadd.f32 %v587_v2, %v567_v1 }
  0xc6   : > { %v590_v4 = vmul.f32 0.00390625, %v588_v3 }
  0xc8   : > { %947 = vmatmul.msk.f32.vlgmr.msrb.gmra.mxu0 %vm594_vm0, %v590_v4 }
 0x145   : > { %v615_v7 = vpop.f32.mrf.mxu0 }
 0x146   : > { %v616_v8 = vadd.f32 %v615_v7, %v593_v5  ;;  %v761_v7 = vld [vmem:[%s1386_s9 + $0xa8] sm:$0xff] }
 0x147   : > { %805 = vmatpush.msrb.mxu2 %v761_v7 }
 0x148   : > { %v948_v9 = vmul.f32 -1.442695, %v616_v8 }
 0x14a   : > { %982 = vpow2.f32 %v948_v9  ;;  %v760_v9 = vld [vmem:[%s1386_s9 + $0xa0] sm:$0xff] }
 0x14b   : > { %806 = vmatpush.msrb.mxu2 %v760_v9 }
 0x150   : > { %v983_v10 = vpop.eup %982 }
 0x151   : > { %v621_v11 = vadd.f32 1.0, %v983_v10  ;;  %v740_v10 = vld [vmem:[%s1386_s9] sm:$0xff] }
 0x153   : > { %984 = vrcp.f32 %v621_v11  ;;  %v633_v15 = vand.u32 2147483648, %v621_v11  ;;  %v631_v17 = vand.u32 2147483647, %v621_v11  ;;  %vm627_vm3 = vweird.f32 %v621_v11 }
 0x155   : > { %v634_v19 = vor.u32 1.1754944e-38, %v633_v15  ;;  %vm632_vm5 = vcmp.eq.f32.partialorder %v631_v17, 8.507059e+37 }
 0x159   : > { %v985_v12 = vpop.eup %984 }
 0x15a   : > { %v623_v13 = vmul.f32 %v985_v12, %v621_v11  ;;  %vm628_vm2 = vweird.f32 %v985_v12  ;;  %v759_v11 = vld [vmem:[%s1386_s9 + $0x98] sm:$0xff] }
 0x15b   : > { %vm629_vm4 = vmor %vm627_vm3, %vm628_vm2  ;;  %807 = vmatpush.msrb.mxu2 %v759_v11 }
 0x15c   : > { %v624_v14 = vsub.f32 1.0, %v623_v13  ;;  %v757_v13 = vld [vmem:[%s1386_s9 + $0x88] sm:$0xff] }
 0x15e   : > { %v625_v16 = vmul.f32 %v985_v12, %v624_v14  ;;  %v756_v14 = vld [vmem:[%s1386_s9 + $0x80] sm:$0xff] }
 0x160   : > { %v626_v18 = vadd.f32 %v985_v12, %v625_v16 }
 0x162   : > { %v630_v20 = vsel %vm629_vm4, %v985_v12, %v626_v18  ;;  %v758_v12 = vld [vmem:[%s1386_s9 + $0x90] sm:$0xff] }
 0x163   : > { %v635_v21 = vsel %vm632_vm5, %v634_v19, %v630_v20  ;;  %808 = vmatpush.msrb.mxu2 %v758_v12 }
 0x164   : > { %v637_v22 = vmul.f32 %v635_v21, %v616_v8  ;;  %v741_v8 = vld [vmem:[%s1386_s9 + $0x8] sm:$0xff] }
 0x165   : > { %786 = vmatpush.msrb.mxu3 %v741_v8  ;;  %809 = vmatpush.msrb.mxu2 %v757_v13 }
 0x166   : > { %950 = vmatmul.msk.f32.vlgmr.msra.gmra.mxu3 %vm640_vm6, %v637_v22 }
 0x167   : > { %787 = vmatpush.msrb.mxu3 %v740_v10  ;;  %810 = vmatpush.msrb.mxu2 %v756_v14 }
 0x1e9   : > { %v665_v30 = vpop.f32.mrf.mxu3 }
 0x1ea   : > { %v666_v32 = vadd.f32 %v665_v30, %v639_v27 }
 0x1ec   : > { %v951_v40 = vmul.f32 -1.442695, %v666_v32 }
 0x1ee   : > { %986 = vpow2.f32 %v951_v40 }
 0x1f4   : > { %v987_v51 = vpop.eup %986 }
 0x1f5   : > { %v671_v53 = vadd.f32 1.0, %v987_v51 }
 0x1f7   : > { %988 = vrcp.f32 %v671_v53  ;;  %v683_v38 = vand.u32 2147483648, %v671_v53  ;;  %v681_v1 = vand.u32 2147483647, %v671_v53  ;;  %vm677_vm8 = vweird.f32 %v671_v53 }
 0x1f9   : > { %v684_v3 = vor.u32 1.1754944e-38, %v683_v38  ;;  %vm682_vm10 = vcmp.eq.f32.partialorder %v681_v1, 8.507059e+37 }
 0x1fd   : > { %v989_v61 = vpop.eup %988 }
 0x1fe   : > { %v673_v62 = vmul.f32 %v989_v61, %v671_v53  ;;  %vm678_vm7 = vweird.f32 %v989_v61 }
 0x1ff   : > { %vm679_vm9 = vmor %vm677_vm8, %vm678_vm7 }
 0x200   : > { %v674_v0 = vsub.f32 1.0, %v673_v62 }
 0x202   : > { %v675_v39 = vmul.f32 %v989_v61, %v674_v0 }
 0x204   : > { %v676_v2 = vadd.f32 %v989_v61, %v675_v39 }
 0x206   : > { %v680_v4 = vsel %vm679_vm9, %v989_v61, %v676_v2 }
 0x207   : > { %v685_v5 = vsel %vm682_vm10, %v684_v3, %v680_v4 }
 0x208   : > { %952 = vmatmul.msk.f32.vlgmr.msrb.gmra.mxu1 %vm594_vm0, %v685_v5  ;;  %953 = vmatmul.msk.f32.vlgmr.msra.gmra.mxu2 %vm594_vm0, %v685_v5 }
 0x285   : > { %v711_v15 = vpop.f32.mrf.mxu1 }
 0x286   : > { %v734_v16 = vperm.slane %v711_v15, 0 }
 0x288   : > { %v736_v17 = vmul.f32 %v734_v16, %v1221_v43  ;;  %v738_v21 = vmul.f32 %v734_v16, %v1225_v46 }
 0x28a   : > { %788 = vmatmul.f32.vlgmr.msrb.gmra.mxu3 %v736_v17 }
 0x28b   : > { %v731_v18 = vpop.f32.mrf.mxu2 }
 0x28c   : > { %v735_v19 = vperm.slane %v731_v18, 0 }
 0x28e   : > { %v737_v20 = vmul.f32 %v735_v19, %v1232_v36  ;;  %v739_v22 = vmul.f32 %v735_v19, %v1235_v54 }
 0x290   : > { %811 = vmatmul.f32.vlgmr.msrb.gmra.mxu2 %v737_v20 }
 0x292   : > { %791 = vmatmul.f32.gmra.mxu3 %v738_v21 }
 0x298   : > { %814 = vmatmul.f32.gmra.mxu2 %v739_v22 }
 0x30d   : > { %v789_v23 = vpop.f32.mrf.mxu3 }
 0x313   : > { %v812_v24 = vpop.f32.mrf.mxu2 }
 0x314   : > { %v813_v25 = vadd.f32 %v812_v24, %v789_v23 }
 0x315   : > { %v792_v36 = vpop.f32.mrf.mxu3 }
 0x316   : > { %v818_v43 = vpack.c.bf16 %v813_v25, %v813_v25  ;;  %v835_v27 = vmul.f32 %v813_v25, %v813_v25  ;;  %v824_v28 = vsel %vm823_vm12, %v813_v25, 0.0 }
 0x318   : > { %821 = vst.msk [vmem:[%s393_s23] sm:$0xf] %vm820_vm11, %v818_v43  ;;  %v837_v32 = vsel %vm823_vm12, %v835_v27, 0.0 }
 0x31b   : > { %v815_v26 = vpop.f32.mrf.mxu2 }
 0x31c   : > { %v816_v46 = vadd.f32 %v815_v26, %v792_v36 }
 0x31e   : > { %v819_v54 = vpack.c.bf16 %v816_v46, %v816_v46  ;;  %v825_v29 = vsel %vm823_vm12, %v816_v46, 0.0  ;;  %v836_v30 = vmul.f32 %v816_v46, %v816_v46 }
 0x31f   : > { %v826_v31 = vadd.f32 %v825_v29, %v824_v28 }
 0x320   : > { %822 = vst.msk [vmem:[%s393_s23 + $0x4] sm:$0xf] %vm820_vm11, %v819_v54  ;;  %v838_v33 = vsel %vm823_vm12, %v836_v30, 0.0 }
 0x321   : > { %v827_v34 = vrot.slane %v826_v31, 4  ;;  %v839_v35 = vadd.f32 %v838_v33, %v837_v32 }
 0x323   : > { %v828_v40 = vadd.f32 %v827_v34, %v826_v31  ;;  %v840_v41 = vrot.slane %v839_v35, 4 }
 0x325   : > { %v829_v42 = vrot.slane %v828_v40, 2  ;;  %v841_v44 = vadd.f32 %v840_v41, %v839_v35 }
 0x327   : > { %v830_v45 = vadd.f32 %v829_v42, %v828_v40  ;;  %v842_v47 = vrot.slane %v841_v44, 2 }
 0x329   : > { %v831_v48 = vrot.slane %v830_v45, 1  ;;  %v843_v49 = vadd.f32 %v842_v47, %v841_v44 }
 0x32b   : > { %v832_v50 = vadd.f32 %v831_v48, %v830_v45  ;;  %v844_v51 = vrot.slane %v843_v49, 1 }
 0x32d   : > { %834 = vst.msk [vmem:[%s397_s27] sm:$0x1] %vm833_vm13, %v832_v50  ;;  %v845_v52 = vadd.f32 %v844_v51, %v843_v49 }
 0x32f   : > { %846 = vst.msk [vmem:[%s397_s27 + $0x1] sm:$0x1] %vm833_vm13, %v845_v52 }
 0x330 PF: > { %s22_s17 = sadd.s32 1, %s996_s17  }
 0x331   : > { %p19_p4 = scmp.ge.s32.totalorder %s22_s17, 4  }
 0x333   :  { %21 = sbr.rel (!%p19_p4) target bundleno = 1 (0x1), region = 102 }

</bundles_post_ra>
